<compile_context>
chip_gen: v7x
topology: tpu7x:2x2x1
jax: 0.10.0
libtpu: 0.0.40
codegen_flags: <defaults>
</compile_context>

<pallas_src>
import jax
import jax.numpy as jnp
import numpy as np
from jax import lax
from jax.experimental import pallas as pl
from jax.experimental.pallas import tpu as pltpu


def dynamic_bottleneck_kernel(
    x_ref, gate_ref,
    w1_ref, bn1b_ref,
    w2_ref, bn2b_ref,
    w3_ref, bn3b_ref,
    out_ref,
    pad_ref,
):
    bf16 = jnp.bfloat16
    Bt, H, W, Cin = x_ref.shape
    HW = H * W
    M = Bt * HW

    x = x_ref[...]                                     # (Bt, H, W, Cin) bf16
    x_flat = x.reshape(M, Cin)

    # ---- conv1 (1x1, bn1 scale pre-folded) + shift + relu; bf16 MXU, f32 acc -----
    y1 = jnp.dot(x_flat, w1_ref[...], preferred_element_type=jnp.float32)
    y1 = jnp.maximum(y1 + bn1b_ref[...], 0.0)          # (M, C1) f32
    C1 = y1.shape[-1]
    y1b = y1.reshape(Bt, H, W, C1).astype(bf16)

    # ---- zero-padded bf16 scratch, built in registers, ONE aligned full store -----
    zw = jnp.zeros((Bt, H, 1, C1), bf16)
    zrow = jnp.zeros((Bt, 1, W + 2, C1), bf16)
    wide = jnp.concatenate([zw, y1b, zw], axis=2)               # (Bt, H, W+2, C1)
    pad_ref[...] = jnp.concatenate([zrow, wide, zrow], axis=1)  # (Bt, H+2, W+2, C1)

    # ---- conv2 (3x3, pad=1, stride=1) as a single deep-K im2col matmul -----------
    taps = [pad_ref[:, ky:ky + H, kx:kx + W, :]                 # each (Bt, H, W, C1)
            for ky in range(3) for kx in range(3)]
    patch = jnp.concatenate(taps, axis=-1).reshape(M, 9 * C1)   # lane-dense, bf16
    acc = jnp.dot(patch, w2_ref[...], preferred_element_type=jnp.float32)
    Cw = acc.shape[-1]

    # ---- dynamic context gate (precomputed in XLA) + bn2 shift + relu ------------
    acc = acc.reshape(Bt, HW, Cw)
    y2 = jnp.maximum(acc * gate_ref[...] + bn2b_ref[...], 0.0)
    y2 = y2.reshape(M, Cw).astype(bf16)

    # ---- conv3 (1x1, bn3 scale pre-folded) + shift --------------------------------
    y3 = jnp.dot(y2, w3_ref[...], preferred_element_type=jnp.float32) + bn3b_ref[...]

    # ---- identity shortcut (x upcast once in VMEM) + relu; bf16 HBM output --------
    out = jnp.maximum(y3 + x_flat.astype(jnp.float32), 0.0)
    out_ref[...] = out.reshape(Bt, H, W, -1).astype(out_ref.dtype)


def prepare_params(params):
    """Fold eval-mode BN scales into the conv weights and cast weights to bf16."""
    bf16 = jnp.bfloat16
    w1f = (params["w1"] * params["bn1_scale"][0]).astype(bf16)            # (Cin, C1)
    c1 = w1f.shape[1]
    w2 = params["w2"]                                                     # (3,3,C1,Cw) HWIO
    cw = w2.shape[-1]
    w2f = (w2 * params["bn2_scale"][0]).reshape(9 * c1, cw).astype(bf16)  # (9*C1, Cw)
    w3f = (params["w3"] * params["bn3_scale"][0]).astype(bf16)            # (Cw, Cout)
    return {
        "w1f": w1f, "w2f": w2f, "w3f": w3f,
        "bn1b": params["bn1_shift"], "bn2b": params["bn2_shift"],
        "bn3b": params["bn3_shift"],
        "wc": params["wc"], "bc": params["bc"],
    }


def dynamic_bottleneck(x_nhwc, context, prep, *, block_batch=4, vmem_limit_mib=48):
    """Wrapper: returns (out_nhwc_bf16, context), mirroring the PyTorch forward."""
    B, H, W, Cin = x_nhwc.shape
    C1 = prep["w1f"].shape[1]
    Cw, Cout = prep["w3f"].shape
    assert Cin == Cout, "identity shortcut (downsample=None) needs inplanes == planes*4"

    # Images per grid step (largest divisor of B not exceeding block_batch).
    bt = max(1, min(block_batch, B))
    while B % bt:
        bt -= 1

    # bf16 activations at the HBM boundary.
    x_bf16 = x_nhwc.astype(jnp.bfloat16)

    # Dynamic per-channel gate, computed once in plain XLA (not on the serial
    # per-block kernel path):  sigmoid(context @ Wc + bc) -> (B, 1, Cw) f32.
    gate = jax.nn.sigmoid(context @ prep["wc"] + prep["bc"])
    gate = gate.astype(jnp.float32).reshape(B, 1, Cw)

    def rep(arr):   # whole-array (replicated) block
        return pl.BlockSpec(arr.shape, lambda n, _nd=arr.ndim: (0,) * _nd)

    grid_spec = pltpu.PrefetchScalarGridSpec(
        num_scalar_prefetch=0,
        grid=(B // bt,),
        in_specs=[
            pl.BlockSpec((bt, H, W, Cin), lambda n: (n, 0, 0, 0)),
            pl.BlockSpec((bt, 1, Cw), lambda n: (n, 0, 0)),
            rep(prep["w1f"]), rep(prep["bn1b"]),
            rep(prep["w2f"]), rep(prep["bn2b"]),
            rep(prep["w3f"]), rep(prep["bn3b"]),
        ],
        out_specs=pl.BlockSpec((bt, H, W, Cout), lambda n: (n, 0, 0, 0)),
        scratch_shapes=[pltpu.VMEM((bt, H + 2, W + 2, C1), jnp.bfloat16)],
    )

    out = pl.pallas_call(
        dynamic_bottleneck_kernel,
        out_shape=jax.ShapeDtypeStruct((B, H, W, Cout), jnp.bfloat16),
        grid_spec=grid_spec,
        compiler_params=pltpu.CompilerParams(
            dimension_semantics=("parallel",),
            vmem_limit_bytes=vmem_limit_mib * 1024 * 1024,
        ),
    )(
        x_bf16, gate,
        prep["w1f"], prep["bn1b"],
        prep["w2f"], prep["bn2b"],
        prep["w3f"], prep["bn3b"],
    )
    return out, context


# ----------------------- pure-JAX references ------------------------------------
def ref_forward_matched(x_bf16, context, prep):
    """Mirrors the kernel math exactly (bf16 I/O, folded BN, bf16 MXU, f32 acc)."""
    B, H, W, Cin = x_bf16.shape
    bf16 = jnp.bfloat16
    x_flat = x_bf16.reshape(B, H * W, Cin)
    y1 = jnp.einsum("bpc,cd->bpd", x_flat, prep["w1f"],
                    preferred_element_type=jnp.float32)
    y1 = jnp.maximum(y1 + prep["bn1b"], 0.0)
    C1 = y1.shape[-1]
    y1b = y1.reshape(B, H, W, C1).astype(bf16)
    padded = jnp.pad(y1b, ((0, 0), (1, 1), (1, 1), (0, 0)))
    taps = [padded[:, ky:ky + H, kx:kx + W, :] for ky in range(3) for kx in range(3)]
    patch = jnp.concatenate(taps, axis=-1).reshape(B, H * W, 9 * C1)
    acc = jnp.einsum("bpk,kd->bpd", patch, prep["w2f"],
                     preferred_element_type=jnp.float32)
    gate = jax.nn.sigmoid(context @ prep["wc"] + prep["bc"]).astype(jnp.float32)
    y2 = jnp.maximum(acc * gate[:, None, :] + prep["bn2b"], 0.0)
    y3 = jnp.einsum("bpc,cd->bpd", y2.astype(bf16), prep["w3f"],
                    preferred_element_type=jnp.float32) + prep["bn3b"]
    out = jnp.maximum(y3 + x_flat.astype(jnp.float32), 0.0)
    return out.reshape(B, H, W, -1).astype(bf16), context


def ref_forward_f32(x, context, p):
    """Pure-f32 module-semantics reference (conv -> bn -> act, separate gate)."""
    y = jnp.einsum("bhwc,cd->bhwd", x, p["w1"])
    y = y * p["bn1_scale"][0] + p["bn1_shift"][0]
    y = jnp.maximum(y, 0.0)
    y = lax.conv_general_dilated(
        y, p["w2"], window_strides=(1, 1), padding=((1, 1), (1, 1)),
        dimension_numbers=("NHWC", "HWIO", "NHWC"))
    mask = jax.nn.sigmoid(context @ p["wc"] + p["bc"])            # (B, Cw)
    y = y * mask[:, None, None, :]
    y = y * p["bn2_scale"][0] + p["bn2_shift"][0]
    y = jnp.maximum(y, 0.0)
    y = jnp.einsum("bhwc,cd->bhwd", y, p["w3"])
    y = y * p["bn3_scale"][0] + p["bn3_shift"][0]
    y = jnp.maximum(y + x, 0.0)
    return y, context


# ----------------------- deterministic parameter init ---------------------------
def make_bn(key, c, eps=1e-5):
    k1, k2, k3, k4 = jax.random.split(key, 4)
    gamma = 1.0 + 0.1 * jax.random.normal(k1, (c,), jnp.float32)
    beta = 0.1 * jax.random.normal(k2, (c,), jnp.float32)
    mean = 0.1 * jax.random.normal(k3, (c,), jnp.float32)
    var = 1.0 + 0.1 * jax.random.uniform(k4, (c,), dtype=jnp.float32)
    scale = gamma / jnp.sqrt(var + eps)
    shift = beta - mean * scale
    return scale.reshape(1, c), shift.reshape(1, c)


def init_params(key, inplanes, planes, class_emb_dim,
                base_width=64, cardinality=1, reduce_first=1, expansion=4):
    width = int(np.floor(planes * (base_width / 64)) * cardinality)
    first_planes = width // reduce_first
    outplanes = planes * expansion
    ks = jax.random.split(key, 8)
    p = {}
    p["w1"] = 0.1 * jax.random.normal(ks[0], (inplanes, first_planes), jnp.float32)
    p["bn1_scale"], p["bn1_shift"] = make_bn(ks[1], first_planes)
    p["w2"] = 0.1 * jax.random.normal(ks[2], (3, 3, first_planes, width), jnp.float32)
    p["bn2_scale"], p["bn2_shift"] = make_bn(ks[3], width)
    p["wc"] = 0.1 * jax.random.normal(ks[4], (class_emb_dim, width), jnp.float32)
    p["bc"] = jnp.zeros((1, width), jnp.float32)
    p["w3"] = 0.1 * jax.random.normal(ks[5], (width, outplanes), jnp.float32)
    p["bn3_scale"], p["bn3_shift"] = make_bn(ks[6], outplanes)
    return p


if __name__ == "__main__":
    B, H, W = 8, 8, 8                # B=8, Bt=4 -> grid length 2 (both v7x TCs busy)
    planes = 32
    inplanes = planes * 4            # identity shortcut (downsample=None): Cin == Cout == 128
    class_emb_dim = 16

    key = jax.random.PRNGKey(0)
    kp, kx, kc = jax.random.split(key, 3)
    params = init_params(kp, inplanes, planes, class_emb_dim)
    prep = prepare_params(params)

    x_nchw = jax.random.normal(kx, (B, inplanes, H, W), jnp.float32)   # PyTorch layout
    context = jax.random.normal(kc, (B, class_emb_dim), jnp.float32)
    x_nhwc = jnp.transpose(x_nchw, (0, 2, 3, 1))                       # kernel layout

    out, ctx_out = dynamic_bottleneck(x_nhwc, context, prep, block_batch=4)
    out = jax.block_until_ready(out)
    out_f32 = np.asarray(out.astype(jnp.float32))

    # Tight check vs a reference that mirrors the kernel's bf16/f32 precision exactly.
    ref_m, _ = ref_forward_matched(x_nhwc.astype(jnp.bfloat16), context, prep)
    np.testing.assert_allclose(out_f32, np.asarray(ref_m.astype(jnp.float32)),
                               rtol=2e-3, atol=2e-3)

    # Looser sanity check vs the pure-f32 module-semantics reference (bf16 I/O + MXU).
    ref_f, _ = ref_forward_f32(x_nhwc, context, params)
    np.testing.assert_allclose(out_f32, np.asarray(ref_f), rtol=8e-2, atol=8e-2)

    print("KERNEL_OK")
</pallas_src>

<mosaic_0001>
module attributes {stable_mosaic.version = 11 : i64} {
  func.func @dynamic_bottleneck_kernel(%arg0: i32, %arg1: memref<4x8x8x128xbf16, #tpu.memory_space<vmem>>, %arg2: memref<4x1x32xf32, #tpu.memory_space<vmem>>, %arg3: memref<128x32xbf16, #tpu.memory_space<vmem>>, %arg4: memref<1x32xf32, #tpu.memory_space<vmem>>, %arg5: memref<288x32xbf16, #tpu.memory_space<vmem>>, %arg6: memref<1x32xf32, #tpu.memory_space<vmem>>, %arg7: memref<32x128xbf16, #tpu.memory_space<vmem>>, %arg8: memref<1x128xf32, #tpu.memory_space<vmem>>, %arg9: memref<4x8x8x128xbf16, #tpu.memory_space<vmem>>, %arg10: memref<4x10x10x32xbf16, #tpu.memory_space<vmem>>) attributes {dimension_semantics = [#tpu.dimension_semantics<parallel>], iteration_bounds = array<i64: 2>, scalar_prefetch = 0 : i64, scratch_operands = 1 : i64, tpu.core_type = #tpu.core_type<tc>, window_params = [{transform_indices = @transform_0, window_bounds = array<i64: 4, 8, 8, 128>}, {transform_indices = @transform_1, window_bounds = array<i64: 4, 1, 32>}, {pipeline_mode = #tpu.pipeline_mode<synchronous>, transform_indices = @transform_2, window_bounds = array<i64: 128, 32>}, {pipeline_mode = #tpu.pipeline_mode<synchronous>, transform_indices = @transform_3, window_bounds = array<i64: 1, 32>}, {pipeline_mode = #tpu.pipeline_mode<synchronous>, transform_indices = @transform_4, window_bounds = array<i64: 288, 32>}, {pipeline_mode = #tpu.pipeline_mode<synchronous>, transform_indices = @transform_5, window_bounds = array<i64: 1, 32>}, {pipeline_mode = #tpu.pipeline_mode<synchronous>, transform_indices = @transform_6, window_bounds = array<i64: 32, 128>}, {pipeline_mode = #tpu.pipeline_mode<synchronous>, transform_indices = @transform_7, window_bounds = array<i64: 1, 128>}, {transform_indices = @transform_8, window_bounds = array<i64: 4, 8, 8, 128>}]} {
    %c0 = arith.constant 0 : index
    %c0_0 = arith.constant 0 : index
    %c0_1 = arith.constant 0 : index
    %c0_2 = arith.constant 0 : index
    %0 = vector.load %arg1[%c0, %c0_0, %c0_1, %c0_2] : memref<4x8x8x128xbf16, #tpu.memory_space<vmem>>, vector<4x8x8x128xbf16>
    %1 = vector.shape_cast %0 : vector<4x8x8x128xbf16> to vector<256x128xbf16>
    %c0_3 = arith.constant 0 : index
    %c0_4 = arith.constant 0 : index
    %2 = vector.load %arg3[%c0_3, %c0_4] : memref<128x32xbf16, #tpu.memory_space<vmem>>, vector<128x32xbf16>
    %cst = arith.constant dense<0.000000e+00> : vector<256x32xf32>
    %3 = tpu.matmul %1, %2, %cst {dimension_numbers = #tpu.dot_dimension_numbers<[1], [0], [0], [1], [0, 0, 1, 1], [], []>} : vector<256x128xbf16>, vector<128x32xbf16>, vector<256x32xf32> -> vector<256x32xf32>
    %c0_5 = arith.constant 0 : index
    %c0_6 = arith.constant 0 : index
    %4 = vector.load %arg4[%c0_5, %c0_6] : memref<1x32xf32, #tpu.memory_space<vmem>>, vector<1x32xf32>
    %5 = vector.broadcast %4 : vector<1x32xf32> to vector<256x32xf32>
    %6 = arith.addf %3, %5 : vector<256x32xf32>
    %cst_7 = arith.constant 0.000000e+00 : f32
    %7 = vector.broadcast %cst_7 : f32 to vector<256x32xf32>
    %8 = arith.maximumf %6, %7 : vector<256x32xf32>
    %9 = vector.shape_cast %8 : vector<256x32xf32> to vector<4x8x8x32xf32>
    %10 = arith.truncf %9 : vector<4x8x8x32xf32> to vector<4x8x8x32xbf16>
    %cst_8 = arith.constant 0.000000e+00 : bf16
    %11 = vector.broadcast %cst_8 : bf16 to vector<4x8x1x32xbf16>
    %cst_9 = arith.constant 0.000000e+00 : bf16
    %12 = vector.broadcast %cst_9 : bf16 to vector<4x1x10x32xbf16>
    %13 = tpu.concatenate %11, %10, %11 in 2 : vector<4x8x1x32xbf16>, vector<4x8x8x32xbf16>, vector<4x8x1x32xbf16> -> vector<4x8x10x32xbf16>
    %14 = tpu.concatenate %12, %13, %12 in 1 : vector<4x1x10x32xbf16>, vector<4x8x10x32xbf16>, vector<4x1x10x32xbf16> -> vector<4x10x10x32xbf16>
    %c0_10 = arith.constant 0 : index
    %c0_11 = arith.constant 0 : index
    %c0_12 = arith.constant 0 : index
    %c0_13 = arith.constant 0 : index
    %15 = vector.load %arg10[%c0_10, %c0_11, %c0_12, %c0_13] : memref<4x10x10x32xbf16, #tpu.memory_space<vmem>>, vector<4x10x10x32xbf16>
    tpu.vector_store %arg10[%c0_10, %c0_11, %c0_12, %c0_13], %14 {strides = array<i32>} : memref<4x10x10x32xbf16, #tpu.memory_space<vmem>>, vector<4x10x10x32xbf16>,
    %c0_14 = arith.constant 0 : index
    %c0_15 = arith.constant 0 : index
    %c0_16 = arith.constant 0 : index
    %c0_17 = arith.constant 0 : index
    %16 = vector.load %arg10[%c0_14, %c0_15, %c0_16, %c0_17] : memref<4x10x10x32xbf16, #tpu.memory_space<vmem>>, vector<4x8x8x32xbf16>
    %c0_18 = arith.constant 0 : index
    %c0_19 = arith.constant 0 : index
    %c1 = arith.constant 1 : index
    %c0_20 = arith.constant 0 : index
    %17 = vector.load %arg10[%c0_18, %c0_19, %c1, %c0_20] : memref<4x10x10x32xbf16, #tpu.memory_space<vmem>>, vector<4x8x8x32xbf16>
    %c0_21 = arith.constant 0 : index
    %c0_22 = arith.constant 0 : index
    %c2 = arith.constant 2 : index
    %c0_23 = arith.constant 0 : index
    %18 = vector.load %arg10[%c0_21, %c0_22, %c2, %c0_23] : memref<4x10x10x32xbf16, #tpu.memory_space<vmem>>, vector<4x8x8x32xbf16>
    %c0_24 = arith.constant 0 : index
    %c1_25 = arith.constant 1 : index
    %c0_26 = arith.constant 0 : index
    %c0_27 = arith.constant 0 : index
    %19 = vector.load %arg10[%c0_24, %c1_25, %c0_26, %c0_27] : memref<4x10x10x32xbf16, #tpu.memory_space<vmem>>, vector<4x8x8x32xbf16>
    %c0_28 = arith.constant 0 : index
    %c1_29 = arith.constant 1 : index
    %c1_30 = arith.constant 1 : index
    %c0_31 = arith.constant 0 : index
    %20 = vector.load %arg10[%c0_28, %c1_29, %c1_30, %c0_31] : memref<4x10x10x32xbf16, #tpu.memory_space<vmem>>, vector<4x8x8x32xbf16>
    %c0_32 = arith.constant 0 : index
    %c1_33 = arith.constant 1 : index
    %c2_34 = arith.constant 2 : index
    %c0_35 = arith.constant 0 : index
    %21 = vector.load %arg10[%c0_32, %c1_33, %c2_34, %c0_35] : memref<4x10x10x32xbf16, #tpu.memory_space<vmem>>, vector<4x8x8x32xbf16>
    %c0_36 = arith.constant 0 : index
    %c2_37 = arith.constant 2 : index
    %c0_38 = arith.constant 0 : index
    %c0_39 = arith.constant 0 : index
    %22 = vector.load %arg10[%c0_36, %c2_37, %c0_38, %c0_39] : memref<4x10x10x32xbf16, #tpu.memory_space<vmem>>, vector<4x8x8x32xbf16>
    %c0_40 = arith.constant 0 : index
    %c2_41 = arith.constant 2 : index
    %c1_42 = arith.constant 1 : index
    %c0_43 = arith.constant 0 : index
    %23 = vector.load %arg10[%c0_40, %c2_41, %c1_42, %c0_43] : memref<4x10x10x32xbf16, #tpu.memory_space<vmem>>, vector<4x8x8x32xbf16>
    %c0_44 = arith.constant 0 : index
    %c2_45 = arith.constant 2 : index
    %c2_46 = arith.constant 2 : index
    %c0_47 = arith.constant 0 : index
    %24 = vector.load %arg10[%c0_44, %c2_45, %c2_46, %c0_47] : memref<4x10x10x32xbf16, #tpu.memory_space<vmem>>, vector<4x8x8x32xbf16>
    %25 = tpu.concatenate %16, %17, %18, %19, %20, %21, %22, %23, %24 in 3 : vector<4x8x8x32xbf16>, vector<4x8x8x32xbf16>, vector<4x8x8x32xbf16>, vector<4x8x8x32xbf16>, vector<4x8x8x32xbf16>, vector<4x8x8x32xbf16>, vector<4x8x8x32xbf16>, vector<4x8x8x32xbf16>, vector<4x8x8x32xbf16> -> vector<4x8x8x288xbf16>
    %26 = vector.shape_cast %25 : vector<4x8x8x288xbf16> to vector<256x288xbf16>
    %c0_48 = arith.constant 0 : index
    %c0_49 = arith.constant 0 : index
    %27 = vector.load %arg5[%c0_48, %c0_49] : memref<288x32xbf16, #tpu.memory_space<vmem>>, vector<288x32xbf16>
    %cst_50 = arith.constant dense<0.000000e+00> : vector<256x32xf32>
    %28 = tpu.matmul %26, %27, %cst_50 {dimension_numbers = #tpu.dot_dimension_numbers<[1], [0], [0], [1], [0, 0, 1, 1], [], []>} : vector<256x288xbf16>, vector<288x32xbf16>, vector<256x32xf32> -> vector<256x32xf32>
    %29 = vector.shape_cast %28 : vector<256x32xf32> to vector<4x64x32xf32>
    %c0_51 = arith.constant 0 : index
    %c0_52 = arith.constant 0 : index
    %c0_53 = arith.constant 0 : index
    %30 = vector.load %arg2[%c0_51, %c0_52, %c0_53] : memref<4x1x32xf32, #tpu.memory_space<vmem>>, vector<4x1x32xf32>
    %31 = vector.broadcast %30 : vector<4x1x32xf32> to vector<4x64x32xf32>
    %32 = arith.mulf %29, %31 : vector<4x64x32xf32>
    %c0_54 = arith.constant 0 : index
    %c0_55 = arith.constant 0 : index
    %33 = vector.load %arg6[%c0_54, %c0_55] : memref<1x32xf32, #tpu.memory_space<vmem>>, vector<1x32xf32>
    %34 = vector.shape_cast %33 : vector<1x32xf32> to vector<1x1x32xf32>
    %35 = vector.broadcast %34 : vector<1x1x32xf32> to vector<4x64x32xf32>
    %36 = arith.addf %32, %35 : vector<4x64x32xf32>
    %cst_56 = arith.constant 0.000000e+00 : f32
    %37 = vector.broadcast %cst_56 : f32 to vector<4x64x32xf32>
    %38 = arith.maximumf %36, %37 : vector<4x64x32xf32>
    %39 = vector.shape_cast %38 : vector<4x64x32xf32> to vector<256x32xf32>
    %40 = arith.truncf %39 : vector<256x32xf32> to vector<256x32xbf16>
    %c0_57 = arith.constant 0 : index
    %c0_58 = arith.constant 0 : index
    %41 = vector.load %arg7[%c0_57, %c0_58] : memref<32x128xbf16, #tpu.memory_space<vmem>>, vector<32x128xbf16>
    %cst_59 = arith.constant dense<0.000000e+00> : vector<256x128xf32>
    %42 = tpu.matmul %40, %41, %cst_59 {dimension_numbers = #tpu.dot_dimension_numbers<[1], [0], [0], [1], [0, 0, 1, 1], [], []>} : vector<256x32xbf16>, vector<32x128xbf16>, vector<256x128xf32> -> vector<256x128xf32>
    %c0_60 = arith.constant 0 : index
    %c0_61 = arith.constant 0 : index
    %43 = vector.load %arg8[%c0_60, %c0_61] : memref<1x128xf32, #tpu.memory_space<vmem>>, vector<1x128xf32>
    %44 = vector.broadcast %43 : vector<1x128xf32> to vector<256x128xf32>
    %45 = arith.addf %42, %44 : vector<256x128xf32>
    %46 = arith.extf %1 : vector<256x128xbf16> to vector<256x128xf32>
    %47 = arith.addf %45, %46 : vector<256x128xf32>
    %cst_62 = arith.constant 0.000000e+00 : f32
    %48 = vector.broadcast %cst_62 : f32 to vector<256x128xf32>
    %49 = arith.maximumf %47, %48 : vector<256x128xf32>
    %50 = vector.shape_cast %49 : vector<256x128xf32> to vector<4x8x8x128xf32>
    %51 = arith.truncf %50 : vector<4x8x8x128xf32> to vector<4x8x8x128xbf16>
    %c0_63 = arith.constant 0 : index
    %c0_64 = arith.constant 0 : index
    %c0_65 = arith.constant 0 : index
    %c0_66 = arith.constant 0 : index
    %52 = vector.load %arg9[%c0_63, %c0_64, %c0_65, %c0_66] : memref<4x8x8x128xbf16, #tpu.memory_space<vmem>>, vector<4x8x8x128xbf16>
    tpu.vector_store %arg9[%c0_63, %c0_64, %c0_65, %c0_66], %51 {strides = array<i32>} : memref<4x8x8x128xbf16, #tpu.memory_space<vmem>>, vector<4x8x8x128xbf16>,
    return
  }
  func.func @transform_0(%arg0: i32) -> (i32, i32, i32, i32) {
    %c0_i32 = arith.constant 0 : i32
    %c0_i32_0 = arith.constant 0 : i32
    %c0_i32_1 = arith.constant 0 : i32
    %c0_i32_2 = arith.constant 0 : i32
    return %arg0, %c0_i32, %c0_i32_0, %c0_i32_1 : i32, i32, i32, i32
  }
  func.func @transform_1(%arg0: i32) -> (i32, i32, i32) {
    %c0_i32 = arith.constant 0 : i32
    %c0_i32_0 = arith.constant 0 : i32
    %c0_i32_1 = arith.constant 0 : i32
    return %arg0, %c0_i32, %c0_i32_0 : i32, i32, i32
  }
  func.func @transform_2(%arg0: i32) -> (i32, i32) {
    %c0_i32 = arith.constant 0 : i32
    %c0_i32_0 = arith.constant 0 : i32
    %c0_i32_1 = arith.constant 0 : i32
    return %c0_i32, %c0_i32_0 : i32, i32
  }
  func.func @transform_3(%arg0: i32) -> (i32, i32) {
    %c0_i32 = arith.constant 0 : i32
    %c0_i32_0 = arith.constant 0 : i32
    %c0_i32_1 = arith.constant 0 : i32
    return %c0_i32, %c0_i32_0 : i32, i32
  }
  func.func @transform_4(%arg0: i32) -> (i32, i32) {
    %c0_i32 = arith.constant 0 : i32
    %c0_i32_0 = arith.constant 0 : i32
    %c0_i32_1 = arith.constant 0 : i32
    return %c0_i32, %c0_i32_0 : i32, i32
  }
  func.func @transform_5(%arg0: i32) -> (i32, i32) {
    %c0_i32 = arith.constant 0 : i32
    %c0_i32_0 = arith.constant 0 : i32
    %c0_i32_1 = arith.constant 0 : i32
    return %c0_i32, %c0_i32_0 : i32, i32
  }
  func.func @transform_6(%arg0: i32) -> (i32, i32) {
    %c0_i32 = arith.constant 0 : i32
    %c0_i32_0 = arith.constant 0 : i32
    %c0_i32_1 = arith.constant 0 : i32
    return %c0_i32, %c0_i32_0 : i32, i32
  }
  func.func @transform_7(%arg0: i32) -> (i32, i32) {
    %c0_i32 = arith.constant 0 : i32
    %c0_i32_0 = arith.constant 0 : i32
    %c0_i32_1 = arith.constant 0 : i32
    return %c0_i32, %c0_i32_0 : i32, i32
  }
  func.func @transform_8(%arg0: i32) -> (i32, i32, i32, i32) {
    %c0_i32 = arith.constant 0 : i32
    %c0_i32_0 = arith.constant 0 : i32
    %c0_i32_1 = arith.constant 0 : i32
    %c0_i32_2 = arith.constant 0 : i32
    return %arg0, %c0_i32, %c0_i32_0, %c0_i32_1 : i32, i32, i32, i32
  }
}

</mosaic_0001>

<bundles_post_ra>
// kernel: tpu_custom_call.1
= control target key start
LH: loop header
LB: loop body
LE: loop exit
PB: predicated region body
PF: predicated region fallthrough
CT: control target
= control target key end

     0   :  { %13 = vsyncpa [#allocation4], 0  ;;  %s9507_s0 = inlined_call_operand.vmem [shape: bf16[8,8,8,128], index: 0, kind: input, shape index: {}]   ;;  %s9508_s1 = inlined_call_operand.hbm [shape: f32[8,1,32], index: 1, kind: input, shape index: {}]   ;;  %s9509_s2 = inlined_call_operand.vmem [shape: bf16[128,32], index: 2, kind: input, shape index: {}]   ;;  %s9510_s3 = inlined_call_operand.vmem [shape: f32[1,32], index: 3, kind: input, shape index: {}]   ;;  %s9511_s4 = inlined_call_operand.vmem [shape: bf16[288,32], index: 4, kind: input, shape index: {}]   ;;  %s9512_s5 = inlined_call_operand.vmem [shape: f32[1,32], index: 5, kind: input, shape index: {}]   ;;  %s9513_s6 = inlined_call_operand.vmem [shape: bf16[32,128], index: 6, kind: input, shape index: {}]   ;;  %s9514_s7 = inlined_call_operand.vmem [shape: f32[1,128], index: 7, kind: input, shape index: {}]   ;;  %s9515_s8 = inlined_call_operand.hbm [shape: bf16[8,8,8,128], index: 8, kind: output, shape index: {}]  }
   0x1   :  { %15 = vsyncpa [#allocation4 + $0x1], 0 }
   0x2   :  { %16 = vsyncpa [#allocation5], 0 }
   0x3   :  { %18 = vsyncpa [#allocation5 + $0x1], 0  ;;  %s6974_s27 = smov 0   ;;  %s6976_s28 = smov 0  }
   0x4   :  { %s6978_s29 = smov 0   ;;  %s6980_s30 = smov 0  }
   0x5 LB: > { %s6995_s9 = sadd.s32 4294967295, %s6918_s30   ;;  %s5533_s10 = sadd.s32 4294967294, %s6918_s30   ;;  %s6918_s30 = sphi %s6980_s30, %s9810_s30   ;;  %s6914_s29 = sphi %s6978_s29, %s9809_s29   ;;  %s6910_s28 = sphi %s6976_s28, %s9808_s28   ;;  %s6906_s27 = sphi %s6974_s27, %s9807_s27  }
   0x6   : > { %s6999_s11 = sadd.s32 1, %s6918_s30   ;;  %s57_s12 = sadd.s32 1, %s6914_s29 }
   0x7   : > { %s54_s13 = ssub.s32 %s6918_s30, %s6999_s11  ;;  %p64_p0 = scmp.ne.s32.totalorder %s6914_s29, %s6910_s28 }
   0x8   : > { %p55_p1 = scmp.eq.s32.totalorder %s54_s13, 0  ;;  %p65_p2 = scmp.eq.s32.totalorder %s6918_s30, 0 }
   0x9   : > { %p70_p3 = scmp.ne.s32.totalorder %s6910_s28, %s6906_s27  ;;  %p71_p4 = scmp.eq.s32.totalorder %s6995_s9, 0 }
   0xa   : > { %s7011_s14 = scalar_select %p55_p1, %s6914_s29, %s57_s12  }
   0xb   : > { %p7013_p5 = por %p65_p2, %p64_p0  ;;  %p7017_p6 = por %p71_p4, %p70_p3 }
   0xc   : > { %p220_p7 = scmp.eq.s32.totalorder %s6995_s9, 1  ;;  %p226_p8 = scmp.eq.s32.totalorder %s5533_s10, 1 }
   0xd   : > { %p6423_p10 = scmp.lt.s32.totalorder %s6918_s30, 2  ;;  %s274_s19 = sand.u32 1, %s6914_s29  }
   0xe   : > { %p7024_p11 = por %p220_p7, %p64_p0  ;;  %p7028_p12 = por %p226_p8, %p70_p3 }
   0xf   : > { %s6004_s20 = sshll.u32 %s6918_s30, 6  ;;  %s5536_s21 = sshll.u32 %s274_s19, 2 }
  0x10   : > { %s9557_s17 = scalar_select %p7024_p11, 1, 0 }
  0x11   : > { %s9558_s18 = scalar_select %p7028_p12, 1, 0 }
  0x12   : > { %s7037_s24 = scalar_lea.hbm %s9508_s1, %s6004_s20  ;;  %s278_s25 = scalar_lea.vmem [#allocation3], %s5536_s21 }
  0x13   : > { %s285_s26 = sshll.u32 %s278_s25, 4  ;;  %p7041_p13 = pnand %p6423_p10, %p7013_p5  ;;  %s7045_s26 = int_to_ptr.vmem [resolvable:$true] %s285_s26 }
  0x14   : > { %s7047_s12 = scalar_lea.sflag [#allocation4], %s274_s19  ;;  %s6822_s13 = scalar_lea.hbm %s7037_s24, 64 }
  0x15   : > { %p6823_p0 = scmp.ne.s32.totalorder %s7037_s24, %s6822_s13  ;;  %p6824_p1 = pneg %p7041_p13 }
  0x16   : > { %s6827_s21 = scalar_lea.hbm %s9508_s1, 128  ;;  %p6828_p4 = scmp.lt.u32.totalorder %s7037_s24, %s9508_s1 }
  0x17   : > { %p6825_p2 = pnand %p6824_p1, %p6823_p0  ;;  %p6829_p5 = scmp.lt.u32.totalorder %s6827_s21, %s6822_s13 }
  0x18   : > { %p6831_p8 = scmp.lt.u32.totalorder %s6822_s13, %s7037_s24 }
  0x19   : > { %p6826_p3 = pneg %p6825_p2  ;;  %p6830_p7 = por %p6829_p5, %p6828_p4 }
  0x1b   : > { %p6832_p10 = por %p6831_p8, %p6830_p7 }
  0x1d   : > { %p6833_p9 = pnand %p6832_p10, %p6826_p3 }
  0x1f   : > { %6836 = shalt.err (!%p6833_p9)
}
  0x20   : > { %s6837_s19 = scalar_lea.vmem %s7045_s26, 64  ;;  %s6920_s25 = smov [#allocation3]  }
  0x21   : > { %p6838_p0 = scmp.ne.s32.totalorder %s7045_s26, %s6837_s19  ;;  %s6842_s20 = sshll.u32 %s6920_s25, 4  ;;  %s6843_s20 = int_to_ptr.vmem [resolvable:$false] %s6842_s20 }
  0x22   : > { %s6844_s15 = scalar_lea.vmem %s6843_s20, 128  ;;  %p6845_p11 = scmp.lt.s32.totalorder %s7045_s26, %s6843_s20 }
  0x23   : > { %p6840_p2 = pnand %p6838_p0, %p6824_p1  ;;  %p6846_p4 = scmp.lt.s32.totalorder %s6844_s15, %s6837_s19 }
  0x25   : > { %p6841_p12 = pneg %p6840_p2  ;;  %p6847_p5 = por %p6846_p4, %p6845_p11 }
  0x27   : > { %p6848_p7 = pnand %p6847_p5, %p6841_p12 }
  0x29   : > { %6851 = shalt.err (!%p6848_p7)
}
  0x2a   : > { %s6921_s13 = smov 16   ;;  %s6922_s21 = smov 1  }
  0x2b   : > { %6418 = dma.hbm_to_vmem [thread:$0]  (!%p7041_p13), %s7037_s24, 64, %s7045_s26, %s7047_s12, %s6921_s13, %s6921_s13, %s6922_s21  }
  0x2c   : > { %p5539_p9 = scmp.ge.s32.totalorder %s6918_s30, 1  ;;  %p293_p1 = scmp.lt.s32.totalorder %s6918_s30, 3 }
  0x2e   : > { %p294_p3 = pnand %p5539_p9, %p293_p1 }
  0x30   : > { %297 = sbr.rel (%p294_p3) target bundleno = 1293 (0x50d), region = 52 }
  0x37   : > { %s7078_s22 = sand.u32 1, %s6910_s28  }
  0x38   : > { %s5540_s23 = sshll.u32 %s7078_s22, 2  ;;  %s300_s19 = scalar_lea.sflag [#allocation4], %s7078_s22 }
  0x39   : > { %s7082_s25 = scalar_lea.vmem [#allocation3], %s5540_s23 }
  0x3a   : > { %6897 = dma.done.wait (%p7017_p6), %s300_s19, 64  }
  0x3b   : > { %6899 = vsyncadd (%p7017_p6), %s300_s19, 4294967232  ;;  %s5542_s24 = sshll.u32 %s6995_s9, 2  ;;  %vm1333_vm0 = vcmask 257024   ;;  %vm1335_vm1 = vcmask 253952   ;;  %v6923_v0 = vmov 0   ;;  %v6464_v3 = vld [vmem:[%s9509_s2] sm:$0xff]  }
  0x3c   : > { %p7089_p11 = scmp.lt.s32.totalorder %s5542_s24, 7  ;;  %v5570_v1 = vcombine.low %v6923_v0, %v6923_v0  ;;  %v5571_v2 = vcombine.high %v6923_v0, %v6923_v0  ;;  %v6465_v4 = vld [vmem:[%s9509_s2 + $0x8] sm:$0xff]   ;;  %6275 = vmatprep.subr.bf16.mxu0 %v6464_v3  ;;  %6395 = vmatprep.subr.bf16.mxu1 %v6464_v3  ;;  %v6466_v5 = vld [vmem:[%s9509_s2 + $0x10] sm:$0xff]   ;;  %v6467_v6 = vld [vmem:[%s9509_s2 + $0x18] sm:$0xff]   ;;  %s6924_s13 = smov 64   ;;  %vm1032_vm2 = vcmask 1040384  }
  0x3d   : > { %6276 = vmatpush3.bf16.msra.mxu0 %v6464_v3  ;;  %6403 = vmatpush3.bf16.msra.mxu1 %v6464_v3  ;;  %v6468_v9 = vld [vmem:[%s9509_s2 + $0x20] sm:$0xff]   ;;  %v6469_v15 = vld [vmem:[%s9509_s2 + $0x28] sm:$0xff]   ;;  %v6470_v26 = vld [vmem:[%s9509_s2 + $0x30] sm:$0xff]   ;;  %s6925_s16 = smov 32   ;;  %s6926_s10 = smov 96   ;;  %vm1067_vm4 = vcmask 1044480  }
  0x3e   : > { %1353 = vst.msk [vmem:[#allocation2 + $0x48] sm:$0xf] %vm1333_vm0, %v5570_v1  ;;  %1334 = vst.msk [vmem:[#allocation2] sm:$0xf] %vm1333_vm0, %v5570_v1  ;;  %s9812_s24 = smov (!%p7089_p11, %s5542_s24), 7  ;;  %6277 = vmatprep.subr.bf16.mxu0 %v6465_v4  ;;  %6396 = vmatprep.subr.bf16.mxu1 %v6465_v4  ;;  %v6471_v29 = vld [vmem:[%s9509_s2 + $0x38] sm:$0xff]  }
  0x3f   : > { %1354 = vst.msk [vmem:[#allocation2 + $0x4c] sm:$0x1] %vm1335_vm1, %v5571_v2  ;;  %1336 = vst.msk [vmem:[#allocation2 + $0x4] sm:$0x1] %vm1335_vm1, %v5571_v2  ;;  %s6005_s15 = sshll.u32 %s9812_s24, 5  ;;  %vm3689_vm8 = vcmask 261120  }
  0x40   : > { %1355 = vst.msk [vmem:[#allocation2 + $0x50] sm:$0xf] %vm1333_vm0, %v5570_v1  ;;  %1373 = vst.msk [vmem:[#allocation2 + $0x98] sm:$0xf] %vm1333_vm0, %v5570_v1  ;;  %s7123_s26 = scalar_lea.vmem %s9507_s0, %s6005_s15  ;;  %vm1033_vm3 = vsmask.f32 256 }
  0x41   : > { %1356 = vst.msk [vmem:[#allocation2 + $0x54] sm:$0x1] %vm1335_vm1, %v5571_v2  ;;  %1374 = vst.msk [vmem:[#allocation2 + $0x9c] sm:$0x1] %vm1335_vm1, %v5571_v2  ;;  %6278 = vmatpush3.bf16.msra.mxu0 %v6465_v4  ;;  %6404 = vmatpush3.bf16.msra.mxu1 %v6465_v4  ;;  %v352_v7 = vld [vmem:[%s7123_s26] sm:$0xff]   ;;  %v354_v31 = vld [vmem:[%s7123_s26 + $0x8] sm:$0xff]  }
  0x42   : > { %1375 = vst.msk [vmem:[#allocation2 + $0xa0] sm:$0xf] %vm1333_vm0, %v5570_v1  ;;  %1393 = vst.msk [vmem:[#allocation2 + $0xe8] sm:$0xf] %vm1333_vm0, %v5570_v1  ;;  %6279 = vmatprep.subr.bf16.mxu0 %v6466_v5  ;;  %6397 = vmatprep.subr.bf16.mxu1 %v6466_v5  ;;  %v368_v8 = vld [vmem:[%s7123_s26 + $0x40] sm:$0xff]   ;;  %v370_v32 = vld [vmem:[%s7123_s26 + $0x48] sm:$0xff]  }
  0x43   : > { %1376 = vst.msk [vmem:[#allocation2 + $0xa4] sm:$0x1] %vm1335_vm1, %v5571_v2  ;;  %1394 = vst.msk [vmem:[#allocation2 + $0xec] sm:$0x1] %vm1335_vm1, %v5571_v2  ;;  %6291 = vmatprep.mubr.bf16.mxu0 %v352_v7  ;;  %6307 = vmatprep.mubr.bf16.mxu1 %v368_v8  ;;  %v356_v33 = vld [vmem:[%s7123_s26 + $0x10] sm:$0xff]   ;;  %v358_v35 = vld [vmem:[%s7123_s26 + $0x18] sm:$0xff]  }
  0x44   : > { %1395 = vst.msk [vmem:[#allocation2 + $0xf0] sm:$0xf] %vm1333_vm0, %v5570_v1  ;;  %1413 = vst.msk [vmem:[#allocation2 + $0x138] sm:$0xf] %vm1333_vm0, %v5570_v1  ;;  %v372_v34 = vld [vmem:[%s7123_s26 + $0x50] sm:$0xff]   ;;  %v374_v36 = vld [vmem:[%s7123_s26 + $0x58] sm:$0xff]  }
  0x45   : > { %1396 = vst.msk [vmem:[#allocation2 + $0xf4] sm:$0x1] %vm1335_vm1, %v5571_v2  ;;  %1414 = vst.msk [vmem:[#allocation2 + $0x13c] sm:$0x1] %vm1335_vm1, %v5571_v2  ;;  %6280 = vmatpush3.bf16.msra.mxu0 %v6466_v5  ;;  %6405 = vmatpush3.bf16.msra.mxu1 %v6466_v5  ;;  %v7133_v10 = vld [vmem:[#allocation2 + $0x48] sm:$0xf] }
  0x46   : > { %6281 = vmatprep.subr.bf16.mxu0 %v6467_v6  ;;  %6398 = vmatprep.subr.bf16.mxu1 %v6467_v6  ;;  %v5803_v11 = vcombine.low %v7133_v10, %v7133_v10  ;;  %v1447_v13 = vld [vmem:[#allocation2 + $0x4] sm:$0x1]  ;;  %v1479_v14 = vld [vmem:[#allocation2] sm:$0xe]  ;;  %v362_v39 = vld [vmem:[%s7123_s26 + $0x28] sm:$0xff]   ;;  %vm3786_vm9 = vcmask 523264  }
  0x47   : > { %v7137_v12 = vld [vmem:[#allocation2 + $0x98] sm:$0xf]  ;;  %v5668_v16 = vcombine.low %v1479_v14, %v1447_v13  ;;  %v1415_v17 = vld [vmem:[#allocation2] sm:$0xf]  ;;  %v1487_v21 = vld [vmem:[#allocation2 + $0x50] sm:$0xe] }
  0x48   : > { %3127 = vrot.lane.b32.xlu1 %v5803_v11, %s6924_s13  ;;  %v5811_v18 = vcombine.low %v7137_v12, %v7137_v12  ;;  %v5636_v19 = vcombine.low %v1415_v17, %v1447_v13  ;;  %v1455_v20 = vld [vmem:[#allocation2 + $0x54] sm:$0x1]  ;;  %v360_v37 = vld [vmem:[%s7123_s26 + $0x20] sm:$0xff]   ;;  %v378_v40 = vld [vmem:[%s7123_s26 + $0x68] sm:$0xff]   ;;  %vm1068_vm5 = vsmask.f32 4352 }
  0x49   : > { %6282 = vmatpush3.bf16.msra.mxu0 %v6467_v6  ;;  %6406 = vmatpush3.bf16.msra.mxu1 %v6467_v6  ;;  %v2249_v22 = vrot.slane %v5668_v16, 1  ;;  %v5676_v23 = vcombine.low %v1487_v21, %v1455_v20  ;;  %v376_v38 = vld [vmem:[%s7123_s26 + $0x60] sm:$0xff]   ;;  %v364_v41 = vld [vmem:[%s7123_s26 + $0x30] sm:$0xff]   ;;  %v366_v43 = vld [vmem:[%s7123_s26 + $0x38] sm:$0xff]   ;;  %vm3851_vm10 = vcmask 785408   ;;  %s5541_s21 = sshll.u32 %s7078_s22, 7 }
  0x4a   : > { %6283 = vmatprep.subr.bf16.mxu0 %v6468_v9  ;;  %6399 = vmatprep.subr.bf16.mxu1 %v6468_v9  ;;  %v1868_v24 = vshll.u32 %v5636_v19, 16  ;;  %v1866_v25 = vshrl.u32 %v5636_v19, 16  ;;  %v380_v42 = vld [vmem:[%s7123_s26 + $0x70] sm:$0xff]   ;;  %v382_v44 = vld [vmem:[%s7123_s26 + $0x78] sm:$0xff]   ;;  %v1431_v51 = vld [vmem:[#allocation2 + $0xa0] sm:$0xf] }
  0x4b   : > { %2281 = vrot.lane.b32.xlu0 %v2249_v22, %s6924_s13  ;;  %v2257_v27 = vrot.slane %v5676_v23, 1  ;;  %v1423_v45 = vld [vmem:[#allocation2 + $0x50] sm:$0xf]  ;;  %v1463_v52 = vld [vmem:[#allocation2 + $0xa4] sm:$0x1]  ;;  %vm7215_vm6 = vmand %vm1032_vm2, %vm1033_vm3  ;;  %s9394_s23 = scalar_lea.vmem [#allocation6], %s5541_s21 }
  0x4c   : > { %3143 = vrot.lane.b32.xlu1 %v5811_v18, %s6924_s13  ;;  %v1870_v28 = vrot.slane %v1868_v24, 1  ;;  %v5644_v46 = vcombine.low %v1423_v45, %v1455_v20  ;;  %v5652_v53 = vcombine.low %v1431_v51, %v1463_v52  ;;  %v7170_v54 = vld [vmem:[#allocation2 + $0x4c] sm:$0x1]  ;;  %v7174_v60 = vld [vmem:[#allocation2 + $0x9c] sm:$0x1]  ;;  %vm7227_vm7 = vmand %vm1067_vm4, %vm1068_vm5  ;;  %p9804_p12 = scmp.ne.s32.totalorder %s9557_s17, 0 }
  0x4d   : > { %6284 = vmatpush3.bf16.msra.mxu0 %v6468_v9  ;;  %6407 = vmatpush3.bf16.msra.mxu1 %v6468_v9  ;;  %v5835_v56 = vcombine.low %v7133_v10, %v7170_v54  ;;  %v5843_v63 = vcombine.low %v7137_v12, %v7174_v60  ;;  %v1495_v1 = vld [vmem:[#allocation2 + $0xa0] sm:$0xe]  ;;  %v1439_v2 = vld [vmem:[#allocation2 + $0xf0] sm:$0xf]  ;;  %v1471_v4 = vld [vmem:[#allocation2 + $0xf4] sm:$0x1] }
  0x4e   : > { %6285 = vmatprep.subr.bf16.mxu0 %v6469_v15  ;;  %6400 = vmatprep.subr.bf16.mxu1 %v6469_v15  ;;  %v1871_v30 = vor.u32 %v1870_v28, %v1866_v25  ;;  %v1924_v47 = vshll.u32 %v5644_v46, 16  ;;  %v1922_v48 = vshrl.u32 %v5644_v46, 16  ;;  %v1980_v55 = vshll.u32 %v5652_v53, 16  ;;  %v1632_v16 = vld [vmem:[#allocation2 + $0xe8] sm:$0xf]  ;;  %s6927_s20 = smov [#allocation6]  }
  0x4f   : > { %2297 = vrot.lane.b32.xlu0 %v2257_v27, %s6924_s13  ;;  %v1978_v57 = vshrl.u32 %v5652_v53, 16  ;;  %v3325_v61 = vshll.u32 %v5835_v56, 16  ;;  %v3323_v62 = vshrl.u32 %v5835_v56, 16  ;;  %v5684_v3 = vcombine.low %v1495_v1, %v1463_v52  ;;  %v1664_v17 = vld [vmem:[#allocation2 + $0xec] sm:$0x1]  ;;  %v6511_v27 = vld [vmem:[%s9511_s4 + $0x80] sm:$0xff]  }
  0x50   : > { %2089 = vrot.lane.b32.xlu1 %v1871_v30, %s6925_s16  ;;  %v1926_v49 = vrot.slane %v1924_v47, 1  ;;  %v1982_v58 = vrot.slane %v1980_v55, 1  ;;  %v3381_v6 = vshll.u32 %v5843_v63, 16  ;;  %v5660_v7 = vcombine.low %v1439_v2, %v1471_v4  ;;  %v1503_v19 = vld [vmem:[#allocation2 + $0xf0] sm:$0xe]  ;;  %v6516_v28 = vld [vmem:[%s9511_s4 + $0x88] sm:$0xff]  }
  0x51   : > { %6286 = vmatpush3.bf16.msra.mxu0 %v6469_v15  ;;  %6408 = vmatpush3.bf16.msra.mxu1 %v6469_v15  ;;  %v3327_v0 = vrot.slane %v3325_v61, 1  ;;  %v2265_v8 = vrot.slane %v5684_v3, 1  ;;  %v3379_v9 = vshrl.u32 %v5843_v63, 16  ;;  %v5851_v18 = vcombine.low %v1632_v16, %v1664_v17 }
  0x52   : > { %6287 = vmatprep.subr.bf16.mxu0 %v6470_v26  ;;  %6401 = vmatprep.subr.bf16.mxu1 %v6470_v26  ;;  %v1927_v50 = vor.u32 %v1926_v49, %v1922_v48  ;;  %v1983_v59 = vor.u32 %v1982_v58, %v1978_v57  ;;  %v3383_v10 = vrot.slane %v3381_v6, 1  ;;  %v2036_v11 = vshll.u32 %v5660_v7, 16 }
  0x53   : > { %v3328_v5 = vor.u32 %v3327_v0, %v3323_v62  ;;  %v2034_v13 = vshrl.u32 %v5660_v7, 16  ;;  %v5692_v20 = vcombine.low %v1503_v19, %v1471_v4  ;;  %v5819_v21 = vcombine.low %v1632_v16, %v1632_v16 }
  0x54   : > { %2105 = vrot.lane.b32.xlu0 %v1927_v50, %s6925_s16  ;;  %v3384_v14 = vor.u32 %v3383_v10, %v3379_v9  ;;  %v2038_v12 = vrot.slane %v2036_v11, 1  ;;  %v3437_v22 = vshll.u32 %v5851_v18, 16  ;;  %v3435_v24 = vshrl.u32 %v5851_v18, 16 }
  0x55   : > { %6288 = vmatpush3.bf16.msra.mxu0 %v6470_v26  ;;  %6409 = vmatpush3.bf16.msra.mxu1 %v6470_v26  ;;  %v2273_v23 = vrot.slane %v5692_v20, 1 }
  0x56   : > { %6289 = vmatprep.subr.bf16.mxu0 %v6471_v29  ;;  %6402 = vmatprep.subr.bf16.mxu1 %v6471_v29  ;;  %v2039_v15 = vor.u32 %v2038_v12, %v2034_v13  ;;  %v3439_v25 = vrot.slane %v3437_v22, 1 }
  0x57   : > { %3511 = vrot.lane.b32.xlu1 %v3328_v5, %s6926_s10 }
  0x58   : > { %2121 = vrot.lane.b32.xlu0 %v1983_v59, %s6925_s16  ;;  %v3440_v26 = vor.u32 %v3439_v25, %v3435_v24 }
  0x59   : > { %6290 = vmatpush3.bf16.msra.mxu0 %v6471_v29  ;;  %6410 = vmatpush3.bf16.msra.mxu1 %v6471_v29  ;;  %v7195_v29 = vld [vmem:[%s9510_s3] ss:$0 sm:$0xff] }
  0x5a   : > { %6323 = vmatprep.subr.bf16.mxu0 %v6511_v27 }
  0x5b   : > { %3527 = vrot.lane.b32.xlu1 %v3384_v14, %s6926_s10 }
  0x5c   : > { %6292 = vmatmul.mubr.bf16.vlgmr.msra.gmra.mrb[0].mxu0 %v354_v31  ;;  %6308 = vmatmul.mubr.bf16.vlgmr.msra.gmra.mrb[0].mxu1 %v370_v32 }
  0x5d   : > { %6295 = vmatprep.mubr.bf16.mxu0 %v356_v33  ;;  %6311 = vmatprep.mubr.bf16.mxu1 %v372_v34 }
  0x5e   : > { %2313 = vrot.lane.b32.xlu0 %v2265_v8, %s6924_s13  ;;  %6324 = vmatpush3.bf16.msra.mxu0 %v6511_v27 }
  0x5f   : > { %3159 = vrot.lane.b32.xlu1 %v5819_v21, %s6924_s13  ;;  %6325 = vmatprep.subr.bf16.mxu0 %v6516_v28 }
  0x62   : > { %2137 = vrot.lane.b32.xlu0 %v2039_v15, %s6925_s16  ;;  %6326 = vmatpush3.bf16.msra.mxu0 %v6516_v28 }
  0x63   : > { %3543 = vrot.lane.b32.xlu1 %v3440_v26, %s6926_s10 }
  0x64   : > { %6296 = vmatmul.mubr.bf16.gmra.mrb[4].mxu0 %v358_v35  ;;  %6312 = vmatmul.mubr.bf16.gmra.mrb[4].mxu1 %v374_v36 }
  0x65   : > { %6299 = vmatprep.mubr.bf16.mxu0 %v360_v37  ;;  %6315 = vmatprep.mubr.bf16.mxu1 %v376_v38 }
  0x66   : > { %2329 = vrot.lane.b32.xlu0 %v2273_v23, %s6924_s13 }
  0x6c   : > { %6300 = vmatmul.mubr.bf16.gmra.mrb[8].mxu0 %v362_v39  ;;  %6316 = vmatmul.mubr.bf16.gmra.mrb[8].mxu1 %v378_v40 }
  0x6d   : > { %6303 = vmatprep.mubr.bf16.mxu0 %v364_v41  ;;  %6319 = vmatprep.mubr.bf16.mxu1 %v380_v42 }
  0x74   : > { %6304 = vmatmul.mubr.bf16.gmra.mrb[12].mxu0 %v366_v43  ;;  %6320 = vmatmul.mubr.bf16.gmra.mrb[12].mxu1 %v382_v44 }
 0x12f   : > { %v6293_v30 = vpop.f32.mrb[0].mxu0  ;;  %v6309_v31 = vpop.f32.mrb[0].mxu1 }
 0x130   : > { %v594_v32 = vadd.f32 %v6293_v30, %v7195_v29  ;;  %v658_v33 = vadd.f32 %v6309_v31, %v7195_v29  ;;  %v585_v34 = vpop.f32.mrb[1].mxu0  ;;  %v649_v35 = vpop.f32.mrb[1].mxu1 }
 0x131   : > { %v586_v36 = vadd.f32 %v7195_v29, %v585_v34  ;;  %v650_v37 = vadd.f32 %v7195_v29, %v649_v35  ;;  %v6294_v38 = vpop.f32.mrb[2].mxu0  ;;  %v6310_v39 = vpop.f32.mrb[2].mxu1 }
 0x132   : > { %v714_v40 = vmax.f32 %v594_v32, 0.0  ;;  %v730_v41 = vmax.f32 %v658_v33, 0.0  ;;  %v597_v42 = vadd.f32 %v6294_v38, %v7195_v29  ;;  %v661_v43 = vadd.f32 %v6310_v39, %v7195_v29  ;;  %v588_v44 = vpop.f32.mrb[3].mxu0  ;;  %v652_v45 = vpop.f32.mrb[3].mxu1 }
 0x133   : > { %v712_v46 = vmax.f32 %v586_v36, 0.0  ;;  %v728_v47 = vmax.f32 %v650_v37, 0.0  ;;  %v589_v48 = vadd.f32 %v7195_v29, %v588_v44  ;;  %v653_v49 = vadd.f32 %v7195_v29, %v652_v45 }
 0x134   : > { %v746_v50 = vpack.c.bf16 %v714_v40, %v714_v40  ;;  %v762_v51 = vpack.c.bf16 %v730_v41, %v730_v41  ;;  %v715_v52 = vmax.f32 %v597_v42, 0.0  ;;  %v731_v53 = vmax.f32 %v661_v43, 0.0 }
 0x135   : > { %v744_v55 = vpack.c.bf16 %v712_v46, %v712_v46  ;;  %v760_v56 = vpack.c.bf16 %v728_v47, %v728_v47  ;;  %v713_v57 = vmax.f32 %v589_v48, 0.0  ;;  %v729_v58 = vmax.f32 %v653_v49, 0.0 }
 0x136   : > { %v791_v59 = vshrl.u32 %v746_v50, 16  ;;  %v794_v61 = vshll.u32 %v746_v50, 16  ;;  %v903_v62 = vshrl.u32 %v762_v51, 16  ;;  %v906_v63 = vshll.u32 %v762_v51, 16 }
 0x137   : > { %v777_v0 = vshrl.u32 %v744_v55, 16  ;;  %v780_v1 = vshll.u32 %v744_v55, 16  ;;  %v889_v2 = vshrl.u32 %v760_v56, 16  ;;  %v892_v3 = vshll.u32 %v760_v56, 16  ;;  %v7205_v4 = vpop.f32.mrb[4].mxu0  ;;  %v7207_v5 = vpop.f32.mrb[4].mxu1 }
 0x138   : > { %v793_v6 = vrot.slane %v791_v59, 7  ;;  %v905_v7 = vrot.slane %v903_v62, 7  ;;  %v747_v8 = vpack.c.bf16 %v715_v52, %v715_v52  ;;  %v763_v9 = vpack.c.bf16 %v731_v53, %v731_v53  ;;  %v7209_v10 = vpop.f32.mrb[5].mxu0  ;;  %v7211_v11 = vpop.f32.mrb[5].mxu1 }
 0x139   : > { %v779_v14 = vrot.slane %v777_v0, 7  ;;  %v891_v12 = vrot.slane %v889_v2, 7  ;;  %v745_v15 = vpack.c.bf16 %v713_v57, %v713_v57  ;;  %v7219_v16 = vpack.c.bf16 %v729_v58, %v729_v58  ;;  %v7221_v17 = vpop.f32.mrb[6].mxu0  ;;  %v7223_v18 = vpop.f32.mrb[6].mxu1 }
 0x13a   : > { %v796_v19 = vor.u32 %v794_v61, %v793_v6  ;;  %v908_v21 = vor.u32 %v906_v63, %v905_v7  ;;  %v798_v22 = vshrl.u32 %v747_v8, 16  ;;  %v801_v23 = vshll.u32 %v747_v8, 16  ;;  %v7231_v24 = vpop.f32.mrb[7].mxu0  ;;  %v7233_v25 = vpop.f32.mrb[7].mxu1 }
 0x13b   : > { %v782_v26 = vor.u32 %v780_v1, %v779_v14  ;;  %v894_v27 = vor.u32 %v892_v3, %v891_v12  ;;  %v910_v28 = vshrl.u32 %v763_v9, 16  ;;  %v913_v30 = vshll.u32 %v763_v9, 16 }
 0x13c   : > { %v1037_v31 = vsel %vm7215_vm6, 0, %v796_v19  ;;  %v1053_v32 = vsel %vm7215_vm6, 0, %v908_v21  ;;  %v800_v33 = vrot.slane %v798_v22, 7  ;;  %v784_v34 = vshrl.u32 %v745_v15, 16 }
 0x13d   : > { %v1072_v35 = vsel %vm7227_vm7, %v1037_v31, 0  ;;  %v1088_v36 = vsel %vm7227_vm7, %v1053_v32, 0  ;;  %v1035_v37 = vsel %vm7215_vm6, 0, %v782_v26  ;;  %v1051_v38 = vsel %vm7215_vm6, 0, %v894_v27 }
 0x13e   : > { %v5576_v39 = vcombine.low %v1072_v35, %v1072_v35  ;;  %v5577_v40 = vcombine.high %v1072_v35, %v1072_v35  ;;  %v5608_v41 = vcombine.low %v1088_v36, %v1088_v36  ;;  %v5609_v42 = vcombine.high %v1088_v36, %v1088_v36 }
 0x13f   : > { %v1070_v43 = vsel %vm7227_vm7, %v1035_v37, 0  ;;  %v1086_v44 = vsel %vm7227_vm7, %v1051_v38, 0  ;;  %v803_v45 = vor.u32 %v801_v23, %v800_v33  ;;  %v912_v46 = vrot.slane %v910_v28, 7  ;;  %v7251_v47 = vpop.f32.mrb[8].mxu0 }
 0x140   : > { %1341 = vst.msk [vmem:[#allocation2 + $0x18] sm:$0xf] %vm1333_vm0, %v5576_v39  ;;  %1381 = vst.msk [vmem:[#allocation2 + $0xb8] sm:$0xf] %vm1333_vm0, %v5608_v41  ;;  %v5572_v48 = vcombine.low %v1070_v43, %v1070_v43  ;;  %v5573_v49 = vcombine.high %v1070_v43, %v1070_v43  ;;  %v5604_v50 = vcombine.low %v1086_v44, %v1086_v44  ;;  %v7257_v52 = vpop.f32.mrb[9].mxu0  ;;  %v786_v56 = vrot.slane %v784_v34, 7 }
 0x141   : > { %1342 = vst.msk [vmem:[#allocation2 + $0x1c] sm:$0x1] %vm1335_vm1, %v5577_v40  ;;  %1382 = vst.msk [vmem:[#allocation2 + $0xbc] sm:$0x1] %vm1335_vm1, %v5609_v42  ;;  %v5605_v51 = vcombine.high %v1086_v44, %v1086_v44  ;;  %v1038_v53 = vsel %vm7215_vm6, 0, %v803_v45  ;;  %v915_v55 = vor.u32 %v913_v30, %v912_v46  ;;  %v787_v57 = vshll.u32 %v745_v15, 16 }
 0x142   : > { %v7261_v58 = vpop.f32.mrb[10].mxu0  ;;  %1337 = vst.msk [vmem:[#allocation2 + $0x8] sm:$0xf] %vm1333_vm0, %v5572_v48  ;;  %1377 = vst.msk [vmem:[#allocation2 + $0xa8] sm:$0xf] %vm1333_vm0, %v5604_v50  ;;  %v1073_v59 = vsel %vm7227_vm7, %v1038_v53, 0  ;;  %v610_v63 = vadd.f32 %v7205_v4, %v7195_v29  ;;  %v674_v14 = vadd.f32 %v7207_v5, %v7195_v29  ;;  %v666_v28 = vadd.f32 %v7195_v29, %v7211_v11 }
 0x143   : > { %1338 = vst.msk [vmem:[#allocation2 + $0xc] sm:$0x1] %vm1335_vm1, %v5573_v49  ;;  %1378 = vst.msk [vmem:[#allocation2 + $0xac] sm:$0x1] %vm1335_vm1, %v5605_v51  ;;  %v896_v61 = vshrl.u32 %v7219_v16, 16  ;;  %v899_v62 = vshll.u32 %v7219_v16, 16  ;;  %v5578_v1 = vcombine.low %v1073_v59, %v1073_v59  ;;  %v5579_v2 = vcombine.high %v1073_v59, %v1073_v59 }
 0x144   : > { %v7273_v0 = vpop.f32.mrb[11].mxu0  ;;  %v1054_v3 = vsel %vm7215_vm6, 0, %v915_v55  ;;  %v789_v6 = vor.u32 %v787_v57, %v786_v56  ;;  %v718_v9 = vmax.f32 %v610_v63, 0.0  ;;  %v602_v16 = vadd.f32 %v7195_v29, %v7209_v10 }
 0x145   : > { %v1089_v7 = vsel %vm7227_vm7, %v1054_v3, 0  ;;  %v898_v8 = vrot.slane %v896_v61, 7  ;;  %1343 = vst.msk [vmem:[#allocation2 + $0x20] sm:$0xf] %vm1333_vm0, %v5578_v1  ;;  %v734_v23 = vmax.f32 %v674_v14, 0.0  ;;  %v732_v37 = vmax.f32 %v666_v28, 0.0 }
 0x146   : > { %1344 = vst.msk [vmem:[#allocation2 + $0x24] sm:$0x1] %vm1335_vm1, %v5579_v2  ;;  %v5610_v4 = vcombine.low %v1089_v7, %v1089_v7  ;;  %v5611_v12 = vcombine.high %v1089_v7, %v1089_v7  ;;  %v1036_v15 = vsel %vm7215_vm6, 0, %v789_v6  ;;  %v750_v22 = vpack.c.bf16 %v718_v9, %v718_v9 }
 0x147   : > { %v1071_v19 = vsel %vm7227_vm7, %v1036_v15, 0  ;;  %v901_v21 = vor.u32 %v899_v62, %v898_v8  ;;  %v716_v27 = vmax.f32 %v602_v16, 0.0  ;;  %v7293_v30 = vpop.f32.mrb[12].mxu0  ;;  %v766_v33 = vpack.c.bf16 %v734_v23, %v734_v23 }
 0x148   : > { %1383 = vst.msk [vmem:[#allocation2 + $0xc0] sm:$0xf] %vm1333_vm0, %v5610_v4  ;;  %v5574_v5 = vcombine.low %v1071_v19, %v1071_v19  ;;  %v5575_v26 = vcombine.high %v1071_v19, %v1071_v19  ;;  %v819_v31 = vshrl.u32 %v750_v22, 16  ;;  %v822_v32 = vshll.u32 %v750_v22, 16  ;;  %v7297_v34 = vpop.f32.mrb[13].mxu0 }
 0x149   : > { %1384 = vst.msk [vmem:[#allocation2 + $0xc4] sm:$0x1] %vm1335_vm1, %v5611_v12  ;;  %v1052_v10 = vsel %vm7215_vm6, 0, %v901_v21  ;;  %v748_v36 = vpack.c.bf16 %v716_v27, %v716_v27  ;;  %v613_v11 = vadd.f32 %v7221_v17, %v7195_v29  ;;  %v931_v41 = vshrl.u32 %v766_v33, 16  ;;  %v7305_v46 = vpop.f32.mrb[14].mxu0 }
 0x14a   : > { %1339 = vst.msk [vmem:[#allocation2 + $0x10] sm:$0xf] %vm1333_vm0, %v5574_v5  ;;  %v1087_v35 = vsel %vm7227_vm7, %v1052_v10, 0  ;;  %v821_v40 = vrot.slane %v819_v31, 7  ;;  %v934_v42 = vshll.u32 %v766_v33, 16  ;;  %v764_v45 = vpack.c.bf16 %v732_v37, %v732_v37  ;;  %v7311_v51 = vpop.f32.mrb[15].mxu0 }
 0x14b   : > { %1340 = vst.msk [vmem:[#allocation2 + $0x14] sm:$0x1] %vm1335_vm1, %v5575_v26  ;;  %v5606_v38 = vcombine.low %v1087_v35, %v1087_v35  ;;  %v5607_v39 = vcombine.high %v1087_v35, %v1087_v35  ;;  %v805_v43 = vshrl.u32 %v748_v36, 16  ;;  %v808_v44 = vshll.u32 %v748_v36, 16 }
 0x14c   : > { %v824_v48 = vor.u32 %v822_v32, %v821_v40  ;;  %v933_v49 = vrot.slane %v931_v41, 7  ;;  %v719_v50 = vmax.f32 %v613_v11, 0.0  ;;  %v605_v17 = vadd.f32 %v7195_v29, %v7231_v24 }
 0x14d   : > { %1379 = vst.msk [vmem:[#allocation2 + $0xb0] sm:$0xf] %vm1333_vm0, %v5606_v38  ;;  %v807_v53 = vrot.slane %v805_v43, 7  ;;  %v917_v55 = vshrl.u32 %v764_v45, 16  ;;  %v920_v56 = vshll.u32 %v764_v45, 16  ;;  %v626_v57 = vadd.f32 %v7251_v47, %v7195_v29 }
 0x14e   : > { %1380 = vst.msk [vmem:[#allocation2 + $0xb4] sm:$0x1] %vm1335_vm1, %v5607_v39  ;;  %v1041_v59 = vsel %vm7215_vm6, 0, %v824_v48  ;;  %v936_v61 = vor.u32 %v934_v42, %v933_v49  ;;  %v751_v62 = vpack.c.bf16 %v719_v50, %v719_v50  ;;  %v717_v63 = vmax.f32 %v605_v17, 0.0 }
 0x14f   : > { %v1076_v1 = vsel %vm7227_vm7, %v1041_v59, 0  ;;  %v810_v2 = vor.u32 %v808_v44, %v807_v53  ;;  %v919_v3 = vrot.slane %v917_v55, 7  ;;  %v722_v24 = vmax.f32 %v626_v57, 0.0 }
 0x150   : > { %v5584_v6 = vcombine.low %v1076_v1, %v1076_v1  ;;  %v5585_v7 = vcombine.high %v1076_v1, %v1076_v1  ;;  %v1057_v8 = vsel %vm7215_vm6, 0, %v936_v61  ;;  %v826_v9 = vshrl.u32 %v751_v62, 16 }
 0x151   : > { %v1092_v47 = vsel %vm7227_vm7, %v1057_v8, 0  ;;  %v1039_v14 = vsel %vm7215_vm6, 0, %v810_v2  ;;  %v922_v4 = vor.u32 %v920_v56, %v919_v3  ;;  %v829_v12 = vshll.u32 %v751_v62, 16 }
 0x152   : > { %1349 = vst.msk [vmem:[#allocation2 + $0x38] sm:$0xf] %vm1333_vm0, %v5584_v6  ;;  %v5616_v15 = vcombine.low %v1092_v47, %v1092_v47  ;;  %v5617_v16 = vcombine.high %v1092_v47, %v1092_v47  ;;  %v1074_v19 = vsel %vm7227_vm7, %v1039_v14, 0  ;;  %v828_v21 = vrot.slane %v826_v9, 7 }
 0x153   : > { %1350 = vst.msk [vmem:[#allocation2 + $0x3c] sm:$0x1] %vm1335_vm1, %v5585_v7  ;;  %v5580_v22 = vcombine.low %v1074_v19, %v1074_v19  ;;  %v5581_v23 = vcombine.high %v1074_v19, %v1074_v19  ;;  %v1055_v5 = vsel %vm7215_vm6, 0, %v922_v4  ;;  %v749_v26 = vpack.c.bf16 %v717_v63, %v717_v63  ;;  %v7363_v7 = vld [vmem:[#allocation2 + $0x18] sm:$0xf] }
 0x154   : > { %1389 = vst.msk [vmem:[#allocation2 + $0xd8] sm:$0xf] %vm1333_vm0, %v5616_v15  ;;  %v1090_v27 = vsel %vm7227_vm7, %v1055_v5, 0  ;;  %v831_v28 = vor.u32 %v829_v12, %v828_v21  ;;  %v754_v10 = vpack.c.bf16 %v722_v24, %v722_v24  ;;  %v618_v31 = vadd.f32 %v7195_v29, %v7257_v52 }
 0x155   : > { %1390 = vst.msk [vmem:[#allocation2 + $0xdc] sm:$0x1] %vm1335_vm1, %v5617_v16  ;;  %1346 = vst.msk [vmem:[#allocation2 + $0x2c] sm:$0x1] %vm1335_vm1, %v5581_v23  ;;  %v5612_v32 = vcombine.low %v1090_v27, %v1090_v27  ;;  %v5613_v33 = vcombine.high %v1090_v27, %v1090_v27  ;;  %v812_v35 = vshrl.u32 %v749_v26, 16  ;;  %v815_v36 = vshll.u32 %v749_v26, 16 }
 0x156   : > { %1345 = vst.msk [vmem:[#allocation2 + $0x28] sm:$0xf] %vm1333_vm0, %v5580_v22  ;;  %v1042_v37 = vsel %vm7215_vm6, 0, %v831_v28  ;;  %v847_v11 = vshrl.u32 %v754_v10, 16  ;;  %v850_v38 = vshll.u32 %v754_v10, 16  ;;  %v720_v39 = vmax.f32 %v618_v31, 0.0 }
 0x157   : > { %1385 = vst.msk [vmem:[#allocation2 + $0xc8] sm:$0xf] %vm1333_vm0, %v5612_v32  ;;  %v1077_v52 = vsel %vm7227_vm7, %v1042_v37, 0  ;;  %v814_v40 = vrot.slane %v812_v35, 7  ;;  %v629_v41 = vadd.f32 %v7261_v58, %v7195_v29  ;;  %v621_v42 = vadd.f32 %v7195_v29, %v7273_v0  ;;  %v7375_v28 = vld [vmem:[#allocation2 + $0x18] sm:$0xf] }
 0x158   : > { %1386 = vst.msk [vmem:[#allocation2 + $0xcc] sm:$0x1] %vm1335_vm1, %v5613_v33  ;;  %v5586_v43 = vcombine.low %v1077_v52, %v1077_v52  ;;  %v5587_v44 = vcombine.high %v1077_v52, %v1077_v52  ;;  %v849_v45 = vrot.slane %v847_v11, 7  ;;  %v752_v48 = vpack.c.bf16 %v720_v39, %v720_v39  ;;  %v7384_v52 = vld [vmem:[#allocation2 + $0x1c] sm:$0x1] }
 0x159   : > { %v817_v49 = vor.u32 %v815_v36, %v814_v40  ;;  %v723_v50 = vmax.f32 %v629_v41, 0.0  ;;  %v721_v17 = vmax.f32 %v621_v42, 0.0  ;;  %v642_v53 = vadd.f32 %v7293_v30, %v7195_v29 }
 0x15a   : > { %1351 = vst.msk [vmem:[#allocation2 + $0x40] sm:$0xf] %vm1333_vm0, %v5586_v43  ;;  %v852_v55 = vor.u32 %v850_v38, %v849_v45  ;;  %v833_v56 = vshrl.u32 %v752_v48, 16  ;;  %v836_v58 = vshll.u32 %v752_v48, 16  ;;  %v634_v0 = vadd.f32 %v7195_v29, %v7297_v34  ;;  %v1674_v45 = vld [vmem:[#allocation2 + $0x18] sm:$0xe] }
 0x15b   : > { %1352 = vst.msk [vmem:[#allocation2 + $0x44] sm:$0x1] %vm1335_vm1, %v5587_v44  ;;  %v1040_v57 = vsel %vm7215_vm6, 0, %v817_v49  ;;  %v755_v59 = vpack.c.bf16 %v723_v50, %v723_v50  ;;  %v753_v61 = vpack.c.bf16 %v721_v17, %v721_v17  ;;  %v726_v62 = vmax.f32 %v642_v53, 0.0  ;;  %v7390_v48 = vld [vmem:[#allocation2 + $0xb8] sm:$0xf] }
 0x15c   : > { %v1075_v63 = vsel %vm7227_vm7, %v1040_v57, 0  ;;  %v1045_v30 = vsel %vm7215_vm6, 0, %v852_v55  ;;  %v835_v1 = vrot.slane %v833_v56, 7  ;;  %v724_v2 = vmax.f32 %v634_v0, 0.0  ;;  %v7397_v53 = vld [vmem:[#allocation2 + $0xb8] sm:$0xf] }
 0x15d   : > { %v5582_v3 = vcombine.low %v1075_v63, %v1075_v63  ;;  %v5583_v24 = vcombine.high %v1075_v63, %v1075_v63  ;;  %v1080_v6 = vsel %vm7227_vm7, %v1045_v30, 0  ;;  %v854_v34 = vshrl.u32 %v755_v59, 16  ;;  %v7403_v0 = vld [vmem:[#allocation2 + $0x1c] sm:$0x1]  ;;  %v1482_v57 = vld [vmem:[#allocation2 + $0x18] sm:$0xe] }
 0x15e   : > { %v5592_v8 = vcombine.low %v1080_v6, %v1080_v6  ;;  %v5593_v9 = vcombine.high %v1080_v6, %v1080_v6  ;;  %v838_v47 = vor.u32 %v836_v58, %v835_v1  ;;  %v857_v14 = vshll.u32 %v755_v59, 16  ;;  %v7413_v30 = vld [vmem:[#allocation2 + $0x14] sm:$0x1]  ;;  %v1673_v1 = vld [vmem:[#allocation2 + $0x10] sm:$0xe] }
 0x15f   : > { %1347 = vst.msk [vmem:[#allocation2 + $0x30] sm:$0xf] %vm1333_vm0, %v5582_v3  ;;  %v856_v4 = vrot.slane %v854_v34, 7  ;;  %v840_v12 = vshrl.u32 %v753_v61, 16  ;;  %v843_v15 = vshll.u32 %v753_v61, 16  ;;  %v758_v16 = vpack.c.bf16 %v726_v62, %v726_v62 }
 0x160   : > { %1348 = vst.msk [vmem:[#allocation2 + $0x34] sm:$0x1] %vm1335_vm1, %v5583_v24  ;;  %1362 = vst.msk [vmem:[#allocation2 + $0x6c] sm:$0x1] %vm1335_vm1, %v5593_v9  ;;  %v1043_v19 = vsel %vm7215_vm6, 0, %v838_v47  ;;  %v756_v21 = vpack.c.bf16 %v724_v2, %v724_v2  ;;  %v5797_v22 = vcombine.low %v7363_v7, %v7363_v7  ;;  %v5702_v40 = vcombine.low %v7375_v28, %v7375_v28 }
 0x161   : > { %1361 = vst.msk [vmem:[#allocation2 + $0x68] sm:$0xf] %vm1333_vm0, %v5592_v8  ;;  %v1078_v23 = vsel %vm7227_vm7, %v1043_v19, 0  ;;  %v859_v5 = vor.u32 %v857_v14, %v856_v4  ;;  %v842_v26 = vrot.slane %v840_v12, 7  ;;  %v875_v27 = vshrl.u32 %v758_v16, 16 }
 0x162   : > { %v5588_v10 = vcombine.low %v1078_v23, %v1078_v23  ;;  %v5589_v31 = vcombine.high %v1078_v23, %v1078_v23  ;;  %v878_v32 = vshll.u32 %v758_v16, 16  ;;  %v861_v33 = vshrl.u32 %v756_v21, 16  ;;  %3115 = vrot.lane.b32.xlu1 %v5797_v22, %s6924_s13  ;;  %2445 = vrot.lane.b32.xlu0 %v5702_v40, %s6926_s10  ;;  %v7415_v2 = vld [vmem:[#allocation2 + $0x48] sm:$0xe]  ;;  %v7428_v4 = vld [vmem:[#allocation2 + $0x20] sm:$0xf] }
 0x163   : > { %v1046_v35 = vsel %vm7215_vm6, 0, %v859_v5  ;;  %v845_v36 = vor.u32 %v843_v15, %v842_v26  ;;  %v877_v37 = vrot.slane %v875_v27, 7  ;;  %v864_v11 = vshll.u32 %v756_v21, 16  ;;  %v7423_v8 = vld [vmem:[#allocation2 + $0x8] sm:$0xf] }
 0x164   : > { %1357 = vst.msk [vmem:[#allocation2 + $0x58] sm:$0xf] %vm1333_vm0, %v5588_v10  ;;  %v1081_v38 = vsel %vm7227_vm7, %v1046_v35, 0  ;;  %v863_v39 = vrot.slane %v861_v33, 7  ;;  %v5813_v17 = vcombine.low %v7390_v48, %v7390_v48  ;;  %v5861_v62 = vcombine.low %v1674_v45, %v7384_v52  ;;  %v7430_v12 = vld [vmem:[#allocation2 + $0x24] sm:$0x1] }
 0x165   : > { %1358 = vst.msk [vmem:[#allocation2 + $0x5c] sm:$0x1] %vm1335_vm1, %v5589_v31  ;;  %v5594_v41 = vcombine.low %v1081_v38, %v1081_v38  ;;  %v5595_v42 = vcombine.high %v1081_v38, %v1081_v38  ;;  %v1044_v43 = vsel %vm7215_vm6, 0, %v845_v36  ;;  %v880_v44 = vor.u32 %v878_v32, %v877_v37  ;;  %v1675_v15 = vld [vmem:[#allocation2 + $0x20] sm:$0xe] }
 0x166   : > { %v1079_v49 = vsel %vm7227_vm7, %v1044_v43, 0  ;;  %v866_v50 = vor.u32 %v864_v11, %v863_v39  ;;  %3147 = vrot.lane.b32.xlu1 %v5813_v17, %s6924_s13  ;;  %v5718_v63 = vcombine.low %v7397_v53, %v7397_v53  ;;  %v645_v34 = vadd.f32 %v7305_v46, %v7195_v29  ;;  %v7436_v21 = vld [vmem:[#allocation2 + $0x2c] sm:$0x1]  ;;  %v1676_v22 = vld [vmem:[#allocation2 + $0x28] sm:$0xe] }
 0x167   : > { %1363 = vst.msk [vmem:[#allocation2 + $0x70] sm:$0xf] %vm1333_vm0, %v5594_v41  ;;  %v5590_v55 = vcombine.low %v1079_v49, %v1079_v49  ;;  %v5591_v56 = vcombine.high %v1079_v49, %v1079_v49  ;;  %v1049_v58 = vsel %vm7215_vm6, 0, %v880_v44  ;;  %v637_v14 = vadd.f32 %v7195_v29, %v7311_v51  ;;  %v7442_v26 = vld [vmem:[#allocation2 + $0xa8] sm:$0xf] }
 0x168   : > { %1364 = vst.msk [vmem:[#allocation2 + $0x74] sm:$0x1] %vm1335_vm1, %v5595_v42  ;;  %v1084_v59 = vsel %vm7227_vm7, %v1049_v58, 0  ;;  %v1047_v61 = vsel %vm7215_vm6, 0, %v866_v50  ;;  %2477 = vrot.lane.b32.xlu0 %v5718_v63, %s6926_s10  ;;  %v727_v16 = vmax.f32 %v645_v34, 0.0  ;;  %v5860_v46 = vcombine.low %v1673_v1, %v7413_v30  ;;  %v7463_v1 = vpop.f32.mrb[8].mxu1 }
 0x169   : > { %1359 = vst.msk [vmem:[#allocation2 + $0x60] sm:$0xf] %vm1333_vm0, %v5590_v55  ;;  %v5600_v3 = vcombine.low %v1084_v59, %v1084_v59  ;;  %v5601_v24 = vcombine.high %v1084_v59, %v1084_v59  ;;  %v1082_v6 = vsel %vm7227_vm7, %v1047_v61, 0  ;;  %v5671_v19 = vcombine.low %v1482_v57, %v7403_v0  ;;  %v1498_v33 = vld [vmem:[#allocation2 + $0xb8] sm:$0xe] }
 0x16a   : > { %1360 = vst.msk [vmem:[#allocation2 + $0x64] sm:$0x1] %vm1335_vm1, %v5591_v56  ;;  %v5596_v9 = vcombine.low %v1082_v6, %v1082_v6  ;;  %v5597_v47 = vcombine.high %v1082_v6, %v1082_v6  ;;  %v3658_v51 = vrot.slane %v5861_v62, 1  ;;  %v725_v23 = vmax.f32 %v637_v14, 0.0  ;;  %v1546_v35 = vld [vmem:[#allocation2 + $0x1c] sm:$0x1] }
 0x16b   : > { %1369 = vst.msk [vmem:[#allocation2 + $0x88] sm:$0xf] %vm1333_vm0, %v5600_v3  ;;  %v5700_v5 = vcombine.low %v7423_v8, %v7423_v8  ;;  %v759_v27 = vpack.c.bf16 %v727_v16, %v727_v16  ;;  %v3657_v10 = vrot.slane %v5860_v46, 1  ;;  %v2252_v31 = vrot.slane %v5671_v19, 1  ;;  %v1578_v39 = vld [vmem:[#allocation2 + $0x18] sm:$0xe] }
 0x16c   : > { %1370 = vst.msk [vmem:[#allocation2 + $0x8c] sm:$0x1] %vm1335_vm1, %v5601_v24  ;;  %1366 = vst.msk [vmem:[#allocation2 + $0x7c] sm:$0x1] %vm1335_vm1, %v5597_v47  ;;  %v5862_v32 = vcombine.low %v1675_v15, %v7430_v12  ;;  %v5867_v36 = vcombine.low %v7415_v2, %v7170_v54  ;;  %v757_v37 = vpack.c.bf16 %v725_v23, %v725_v23  ;;  %v1646_v40 = vld [vmem:[#allocation2 + $0x3c] sm:$0x1] }
 0x16d   : > { %1365 = vst.msk [vmem:[#allocation2 + $0x78] sm:$0xf] %vm1333_vm0, %v5596_v9  ;;  %2441 = vrot.lane.b32.xlu0 %v5700_v5, %s6926_s10  ;;  %v5703_v11 = vcombine.low %v7428_v4, %v7428_v4  ;;  %v5863_v38 = vcombine.low %v1676_v22, %v7436_v21  ;;  %v1678_v41 = vld [vmem:[#allocation2 + $0x38] sm:$0xe]  ;;  %v882_v42 = vshrl.u32 %v759_v27, 16  ;;  %v885_v43 = vshll.u32 %v759_v27, 16  ;;  %2287 = vrot.lane.b32.xlu1 %v2252_v31, %s6924_s13 }
 0x16e   : > { %v5894_v44 = vcombine.low %v3657_v10, %v3658_v51  ;;  %v5716_v45 = vcombine.low %v7442_v26, %v7442_v26  ;;  %v1645_v54 = vld [vmem:[#allocation2 + $0x34] sm:$0x1]  ;;  %v1677_v49 = vld [vmem:[#allocation2 + $0x30] sm:$0xe]  ;;  %v868_v50 = vshrl.u32 %v757_v37, 16  ;;  %v871_v17 = vshll.u32 %v757_v37, 16 }
 0x16f   : > { %v3659_v55 = vrot.slane %v5862_v32, 1  ;;  %v3660_v56 = vrot.slane %v5863_v38, 1  ;;  %v7454_v58 = vld [vmem:[#allocation2 + $0xbc] sm:$0x1]  ;;  %v884_v57 = vrot.slane %v882_v42, 7  ;;  %v7459_v61 = vcombine.low %v7375_v28, %v1546_v35  ;;  %v7466_v47 = vpop.f32.mrb[9].mxu1 }
 0x170   : > { %6327 = vmatprep.mubr.msk.bf16.mxu0 %vm3689_vm8, %v5894_v44  ;;  %v5687_v59 = vcombine.low %v1498_v33, %v7454_v58  ;;  %v5766_v62 = vcombine.low %v1578_v39, %v1546_v35  ;;  %v7461_v63 = vld [vmem:[#allocation2 + $0xbc] sm:$0x1]  ;;  %v870_v2 = vrot.slane %v868_v50, 7  ;;  %v5864_v24 = vcombine.low %v1677_v49, %v1645_v54  ;;  %v1647_v34 = vld [vmem:[#allocation2 + $0x44] sm:$0x1] }
 0x171   : > { %9565 = vst [vmem:[#allocation9_spill] sm:$0xff] %v7459_v61  ;;  %2473 = vrot.lane.b32.xlu0 %v5716_v45, %s6926_s10  ;;  %v5897_v3 = vcombine.low %v3659_v55, %v3660_v56  ;;  %v5865_v6 = vcombine.low %v1678_v41, %v1646_v40  ;;  %v1679_v9 = vld [vmem:[#allocation2 + $0x40] sm:$0xe]  ;;  %v3664_v14 = vrot.slane %v5867_v36, 1  ;;  %v887_v15 = vor.u32 %v885_v43, %v884_v57  ;;  %v1594_v16 = vld [vmem:[#allocation2 + $0xb8] sm:$0xe] }
 0x172   : > { %2447 = vrot.lane.b32.xlu1 %v5703_v11, %s6926_s10  ;;  %v7469_v28 = vld [vmem:[#allocation2 + $0x20] sm:$0xf]  ;;  %v873_v46 = vor.u32 %v871_v17, %v870_v2  ;;  %v2923_v19 = vrot.slane %v5766_v62, 1  ;;  %v3661_v51 = vrot.slane %v5864_v24, 1  ;;  %v7474_v5 = vld [vmem:[#allocation2 + $0xc] sm:$0x1]  ;;  %v5866_v32 = vcombine.low %v1679_v9, %v1647_v34 }
 0x173   : > { %6328 = vmatmul.mubr.msk.bf16.vlgmr.msra.gmra.mrb[16].mxu0 %vm3689_vm8, %v5897_v3  ;;  %v7472_v22 = vld [vmem:[#allocation2 + $0xc0] sm:$0xf]  ;;  %v3662_v23 = vrot.slane %v5865_v6, 1  ;;  %v1480_v27 = vld [vmem:[#allocation2 + $0x8] sm:$0xe]  ;;  %v1050_v10 = vsel %vm7215_vm6, 0, %v887_v15  ;;  %v7480_v33 = vcombine.low %v7397_v53, %v7461_v63  ;;  %v5798_v50 = vcombine.low %v7469_v28, %v7469_v28 }
 0x174   : > { %v2268_v31 = vrot.slane %v5687_v59, 1  ;;  %v1650_v35 = vld [vmem:[#allocation2 + $0x6c] sm:$0x1]  ;;  %v7482_v36 = vpop.f32.mrb[10].mxu1  ;;  %v1085_v37 = vsel %vm7227_vm7, %v1050_v10, 0  ;;  %v1048_v11 = vsel %vm7215_vm6, 0, %v873_v46  ;;  %v5782_v17 = vcombine.low %v1594_v16, %v7461_v63 }
 0x175   : > { %9566 = vst [vmem:[#allocation10_spill] sm:$0xff] %v7480_v33  ;;  %2957 = vrot.lane.b32.xlu0 %v2923_v19, %s6925_s16  ;;  %v5900_v38 = vcombine.low %v3661_v51, %v3662_v23  ;;  %v1649_v39 = vld [vmem:[#allocation2 + $0x64] sm:$0x1]  ;;  %v1681_v40 = vld [vmem:[#allocation2 + $0x60] sm:$0xe]  ;;  %v5602_v41 = vcombine.low %v1085_v37, %v1085_v37  ;;  %v5603_v42 = vcombine.high %v1085_v37, %v1085_v37  ;;  %v1083_v53 = vsel %vm7227_vm7, %v1048_v11, 0 }
 0x176   : > { %2319 = vrot.lane.b32.xlu1 %v2268_v31, %s6924_s13  ;;  %v3663_v43 = vrot.slane %v5866_v32, 1  ;;  %v1682_v44 = vld [vmem:[#allocation2 + $0x68] sm:$0xe]  ;;  %v1651_v45 = vld [vmem:[#allocation2 + $0x74] sm:$0x1]  ;;  %v5598_v54 = vcombine.low %v1083_v53, %v1083_v53  ;;  %v5599_v49 = vcombine.high %v1083_v53, %v1083_v53  ;;  %v5719_v59 = vcombine.low %v7472_v22, %v7472_v22  ;;  %v7501_v6 = vpop.f32.mrb[11].mxu1 }
 0x177   : > { %6331 = vmatprep.mubr.msk.bf16.mxu0 %vm3689_vm8, %v5900_v38  ;;  %v1652_v55 = vld [vmem:[#allocation2 + $0x7c] sm:$0x1]  ;;  %v1683_v56 = vld [vmem:[#allocation2 + $0x70] sm:$0xe]  ;;  %v1684_v57 = vld [vmem:[#allocation2 + $0x78] sm:$0xe]  ;;  %v5669_v2 = vcombine.low %v1480_v27, %v7474_v5  ;;  %v5868_v3 = vcombine.low %v1681_v40, %v1649_v39  ;;  %v5869_v63 = vcombine.low %v1682_v44, %v1650_v35 }
 0x178   : > { %1371 = vst.msk [vmem:[#allocation2 + $0x90] sm:$0xf] %vm1333_vm0, %v5602_v41  ;;  %v5903_v62 = vcombine.low %v3663_v43, %v3664_v14  ;;  %v1544_v24 = vld [vmem:[#allocation2 + $0xc] sm:$0x1]  ;;  %v1688_v34 = vld [vmem:[#allocation2 + $0x98] sm:$0xe]  ;;  %v5870_v14 = vcombine.low %v1683_v56, %v1651_v45  ;;  %v5871_v16 = vcombine.low %v1684_v57, %v1652_v55 }
 0x179   : > { %1372 = vst.msk [vmem:[#allocation2 + $0x94] sm:$0x1] %vm1335_vm1, %v5603_v42  ;;  %1368 = vst.msk [vmem:[#allocation2 + $0x84] sm:$0x1] %vm1335_vm1, %v5599_v49  ;;  %3117 = vrot.lane.b32.xlu0 %v5798_v50, %s6924_s13  ;;  %v3665_v9 = vrot.slane %v5868_v3, 1  ;;  %v7509_v51 = vpop.f32.mrb[12].mxu1  ;;  %v7515_v32 = vcombine.low %v7423_v8, %v1544_v24  ;;  %v5875_v43 = vcombine.low %v1688_v34, %v7174_v60 }
 0x17a   : > { %1367 = vst.msk [vmem:[#allocation2 + $0x80] sm:$0xf] %vm1333_vm0, %v5598_v54  ;;  %2479 = vrot.lane.b32.xlu1 %v5719_v59, %s6926_s10  ;;  %v7507_v15 = vld [vmem:[#allocation2 + $0xc0] sm:$0xf]  ;;  %v1654_v46 = vld [vmem:[#allocation2 + $0x8c] sm:$0x1] }
 0x17b   : > { %v1686_v19 = vld [vmem:[#allocation2 + $0x88] sm:$0xe]  ;;  %6332 = vmatmul.mubr.msk.bf16.gmra.mrb[20].mxu0 %vm3689_vm8, %v5903_v62  ;;  %v2939_v23 = vrot.slane %v5782_v17, 1  ;;  %v3666_v27 = vrot.slane %v5869_v63, 1  ;;  %v7512_v10 = vld [vmem:[#allocation2 + $0x10] sm:$0xf]  ;;  %v5814_v49 = vcombine.low %v7507_v15, %v7507_v15 }
 0x17c   : > { %v1576_v31 = vld [vmem:[#allocation2 + $0x8] sm:$0xe]  ;;  %v2250_v35 = vrot.slane %v5669_v2, 1  ;;  %v3667_v37 = vrot.slane %v5870_v14, 1  ;;  %v3668_v11 = vrot.slane %v5871_v16, 1  ;;  %v5873_v42 = vcombine.low %v1686_v19, %v1654_v46  ;;  %v7530_v54 = vpop.f32.mrb[13].mxu1 }
 0x17d   : > { %v7517_v38 = vld [vmem:[#allocation2 + $0xac] sm:$0x1]  ;;  %2989 = vrot.lane.b32.xlu0 %v2939_v23, %s6925_s16  ;;  %v5906_v39 = vcombine.low %v3665_v9, %v3666_v27  ;;  %v1496_v41 = vld [vmem:[#allocation2 + $0xa8] sm:$0xe]  ;;  %v7522_v53 = vld [vmem:[#allocation2 + $0x24] sm:$0x1]  ;;  %v5764_v17 = vcombine.low %v1576_v31, %v1544_v24  ;;  %v5701_v59 = vcombine.low %v7512_v10, %v7512_v10 }
 0x17e   : > { %v7520_v40 = vld [vmem:[#allocation2 + $0xac] sm:$0x1]  ;;  %v7525_v44 = vld [vmem:[#allocation2 + $0xbc] sm:$0x1]  ;;  %v1690_v8 = vld [vmem:[#allocation2 + $0xb8] sm:$0xe]  ;;  %2283 = vrot.lane.b32.xlu1 %v2250_v35, %s6924_s13  ;;  %v5909_v50 = vcombine.low %v3667_v37, %v3668_v11  ;;  %v7537_v60 = vcombine.low %v7442_v26, %v7517_v38  ;;  %v7544_v63 = vcombine.low %v7428_v4, %v7522_v53 }
 0x17f   : > { %v7528_v45 = vld [vmem:[#allocation2 + $0xb4] sm:$0x1]  ;;  %6335 = vmatprep.mubr.msk.bf16.mxu0 %vm3689_vm8, %v5906_v39  ;;  %v1687_v56 = vld [vmem:[#allocation2 + $0x90] sm:$0xe]  ;;  %v5685_v62 = vcombine.low %v1496_v41, %v7520_v40  ;;  %v7546_v24 = vld [vmem:[#allocation2 + $0xc4] sm:$0x1]  ;;  %v5877_v9 = vcombine.low %v1690_v8, %v7525_v44  ;;  %v677_v39 = vadd.f32 %v7223_v18, %v7195_v29 }
 0x180   : > { %v1655_v55 = vld [vmem:[#allocation2 + $0x94] sm:$0x1]  ;;  %v1689_v57 = vld [vmem:[#allocation2 + $0xb0] sm:$0xe]  ;;  %v1653_v2 = vld [vmem:[#allocation2 + $0x84] sm:$0x1]  ;;  %v7557_v35 = vcombine.low %v7472_v22, %v7546_v24 }
 0x181   : > { %v1685_v3 = vld [vmem:[#allocation2 + $0x80] sm:$0xe]  ;;  %v5874_v34 = vcombine.low %v1687_v56, %v1655_v55  ;;  %9567 = vst [vmem:[#allocation11_spill] sm:$0xff] %v7544_v63  ;;  %3149 = vrot.lane.b32.xlu0 %v5814_v49, %s6924_s13  ;;  %v3670_v14 = vrot.slane %v5873_v42, 1  ;;  %v3672_v16 = vrot.slane %v5875_v43, 1  ;;  %v5876_v19 = vcombine.low %v1689_v57, %v7528_v45 }
 0x182   : > { %v5872_v26 = vcombine.low %v1685_v3, %v1653_v2  ;;  %2443 = vrot.lane.b32.xlu1 %v5701_v59, %s6926_s10  ;;  %v7551_v46 = vld [vmem:[#allocation2 + $0x10] sm:$0xf]  ;;  %v2921_v23 = vrot.slane %v5764_v17, 1  ;;  %9568 = vst [vmem:[#allocation12_spill] sm:$0xff] %v7557_v35  ;;  %v2266_v37 = vrot.slane %v5685_v62, 1  ;;  %v3674_v42 = vrot.slane %v5877_v9, 1 }
 0x183   : > { %6336 = vmatmul.mubr.msk.bf16.gmra.mrb[24].mxu0 %vm3689_vm8, %v5909_v50  ;;  %v1529_v27 = vld [vmem:[#allocation2 + $0xb0] sm:$0xf]  ;;  %v3671_v31 = vrot.slane %v5874_v34, 1  ;;  %v1592_v11 = vld [vmem:[#allocation2 + $0xa8] sm:$0xe]  ;;  %v669_v49 = vadd.f32 %v7195_v29, %v7233_v25  ;;  %v5796_v22 = vcombine.low %v7551_v46, %v7551_v46  ;;  %v3673_v50 = vrot.slane %v5876_v19, 1 }
 0x184   : > { %v3669_v4 = vrot.slane %v5872_v26, 1  ;;  %v7561_v41 = vld [vmem:[#allocation2 + $0xb4] sm:$0x1]  ;;  %v1579_v8 = vld [vmem:[#allocation2 + $0x20] sm:$0xe]  ;;  %v735_v18 = vmax.f32 %v677_v39, 0.0  ;;  %v5780_v62 = vcombine.low %v1592_v11, %v7517_v38  ;;  %v5717_v25 = vcombine.low %v1529_v27, %v1529_v27 }
 0x185   : > { %2953 = vrot.lane.b32.xlu0 %v2921_v23, %s6925_s16  ;;  %v7569_v17 = vld [vmem:[#allocation2 + $0xcc] sm:$0x1]  ;;  %v1692_v55 = vld [vmem:[#allocation2 + $0xc8] sm:$0xe]  ;;  %v7571_v56 = vld [vmem:[#allocation2 + $0xc4] sm:$0x1]  ;;  %v5915_v59 = vcombine.low %v3671_v31, %v3672_v16  ;;  %v7576_v29 = vcombine.low %v1529_v27, %v7561_v41  ;;  %v5767_v3 = vcombine.low %v1579_v8, %v7522_v53  ;;  %v5918_v38 = vcombine.low %v3673_v50, %v3674_v42 }
 0x186   : > { %v5912_v43 = vcombine.low %v3669_v4, %v3670_v14  ;;  %2315 = vrot.lane.b32.xlu1 %v2266_v37, %s6924_s13  ;;  %v1691_v57 = vld [vmem:[#allocation2 + $0xc0] sm:$0xe]  ;;  %v733_v2 = vmax.f32 %v669_v49, 0.0  ;;  %v767_v34 = vpack.c.bf16 %v735_v18, %v735_v18  ;;  %v7579_v9 = vld [vmem:[#allocation2 + $0x14] sm:$0x1]  ;;  %v5879_v14 = vcombine.low %v1692_v55, %v7569_v17 }
 0x187   : > { %v1595_v26 = vld [vmem:[#allocation2 + $0xc0] sm:$0xe]  ;;  %v1418_v23 = vld [vmem:[#allocation2 + $0x18] sm:$0xf]  ;;  %v5878_v16 = vcombine.low %v1691_v57, %v7571_v56  ;;  %v2937_v53 = vrot.slane %v5780_v62, 1  ;;  %v7590_v39 = vcombine.low %v7512_v10, %v7579_v9  ;;  %v2924_v8 = vrot.slane %v5767_v3, 1 }
 0x188   : > { %6339 = vmatprep.mubr.msk.bf16.mxu0 %vm3689_vm8, %v5912_v43  ;;  %v765_v19 = vpack.c.bf16 %v733_v2, %v733_v2  ;;  %v938_v4 = vshrl.u32 %v767_v34, 16  ;;  %v941_v31 = vshll.u32 %v767_v34, 16  ;;  %v7586_v27 = vld [vmem:[#allocation2 + $0xb0] sm:$0xf]  ;;  %v5829_v43 = vcombine.low %v7363_v7, %v7384_v52  ;;  %v1483_v50 = vld [vmem:[#allocation2 + $0x20] sm:$0xe] }
 0x189   : > { %3113 = vrot.lane.b32.xlu0 %v5796_v22, %s6924_s13  ;;  %v5783_v42 = vcombine.low %v1595_v26, %v7546_v24  ;;  %v7596_v22 = vld [vmem:[#allocation2 + $0x24] sm:$0x1]  ;;  %v3676_v55 = vrot.slane %v5879_v14, 1  ;;  %v1593_v57 = vld [vmem:[#allocation2 + $0xb0] sm:$0xe]  ;;  %v7600_v10 = vcombine.low %v1418_v23, %v7403_v0  ;;  %v3675_v52 = vrot.slane %v5878_v16, 1 }
 0x18a   : > { %2475 = vrot.lane.b32.xlu1 %v5717_v25, %s6926_s10  ;;  %v924_v37 = vshrl.u32 %v765_v19, 16  ;;  %v927_v11 = vshll.u32 %v765_v19, 16  ;;  %v940_v49 = vrot.slane %v938_v4, 7  ;;  %v5672_v62 = vcombine.low %v1483_v50, %v7596_v22  ;;  %v7606_v2 = vld [vmem:[#allocation2 + $0xc4] sm:$0x1] }
 0x18b   : > { %6340 = vmatmul.mubr.msk.bf16.gmra.mrb[28].mxu0 %vm3689_vm8, %v5915_v59  ;;  %v5812_v59 = vcombine.low %v7586_v27, %v7586_v27  ;;  %v2940_v25 = vrot.slane %v5783_v42, 1  ;;  %v5781_v34 = vcombine.low %v1593_v57, %v7561_v41  ;;  %v1499_v0 = vld [vmem:[#allocation2 + $0xc0] sm:$0xe]  ;;  %v3283_v26 = vshll.u32 %v5829_v43, 16  ;;  %v1577_v50 = vld [vmem:[#allocation2 + $0x10] sm:$0xe] }
 0x18c   : > { %6343 = vmatprep.mubr.msk.bf16.mxu0 %vm3689_vm8, %v5918_v38  ;;  %v926_v18 = vrot.slane %v924_v37, 7  ;;  %v943_v7 = vor.u32 %v941_v31, %v940_v49  ;;  %v5921_v14 = vcombine.low %v3675_v52, %v3676_v55  ;;  %v1696_v31 = vld [vmem:[#allocation2 + $0xe8] sm:$0xe]  ;;  %v2253_v37 = vrot.slane %v5672_v62, 1  ;;  %v6756_v57 = vld [vmem:[#allocation2 + $0xec] sm:$0x1] }
 0x18d   : > { %2985 = vrot.lane.b32.xlu0 %v2937_v53, %s6925_s16  ;;  %v2938_v42 = vrot.slane %v5781_v34, 1  ;;  %v3285_v49 = vrot.slane %v3283_v26, 1  ;;  %v1889_v55 = vshll.u32 %v7600_v10, 16  ;;  %v1694_v52 = vld [vmem:[#allocation2 + $0xd8] sm:$0xe] }
 0x18e   : > { %2959 = vrot.lane.b32.xlu1 %v2924_v8, %s6925_s16  ;;  %v929_v24 = vor.u32 %v927_v11, %v926_v18  ;;  %v1058_v3 = vsel %vm7215_vm6, 0, %v943_v7  ;;  %v5688_v11 = vcombine.low %v1499_v0, %v7606_v2  ;;  %v7623_v8 = vcombine.low %v7390_v48, %v7525_v44  ;;  %v1434_v18 = vld [vmem:[#allocation2 + $0xb8] sm:$0xf]  ;;  %v7632_v44 = vld [vmem:[#allocation2 + $0xdc] sm:$0x1] }
 0x18f   : > { %v1093_v19 = vsel %vm7227_vm7, %v1058_v3, 0  ;;  %v5883_v7 = vcombine.low %v1696_v31, %v6756_v57  ;;  %v3281_v48 = vshrl.u32 %v5829_v43, 16  ;;  %v7635_v62 = vld [vmem:[#allocation2 + $0x14] sm:$0x1]  ;;  %v5655_v3 = vcombine.low %v1434_v18, %v7454_v58  ;;  %v1416_v34 = vld [vmem:[#allocation2 + $0x8] sm:$0xf] }
 0x190   : > { %v1056_v23 = vsel %vm7215_vm6, 0, %v929_v24  ;;  %v5618_v16 = vcombine.low %v1093_v19, %v1093_v19  ;;  %v5619_v38 = vcombine.high %v1093_v19, %v1093_v19  ;;  %v5765_v24 = vcombine.low %v1577_v50, %v7579_v9  ;;  %v7639_v19 = vld [vmem:[#allocation2 + $0x28] sm:$0xf]  ;;  %v1419_v43 = vld [vmem:[#allocation2 + $0x20] sm:$0xf] }
 0x191   : > { %3145 = vrot.lane.b32.xlu0 %v5812_v59, %s6924_s13  ;;  %v1091_v4 = vsel %vm7227_vm7, %v1056_v23, 0  ;;  %v2269_v59 = vrot.slane %v5688_v11, 1  ;;  %v3286_v0 = vor.u32 %v3285_v49, %v3281_v48  ;;  %v1891_v26 = vrot.slane %v1889_v55, 1  ;;  %v1432_v23 = vld [vmem:[#allocation2 + $0xa8] sm:$0xf] }
 0x192   : > { %2991 = vrot.lane.b32.xlu1 %v2940_v25, %s6925_s16  ;;  %v5614_v41 = vcombine.low %v1091_v4, %v1091_v4  ;;  %v5615_v53 = vcombine.high %v1091_v4, %v1091_v4  ;;  %1391 = vst.msk [vmem:[#allocation2 + $0xe0] sm:$0xf] %vm1333_vm0, %v5618_v16  ;;  %v1481_v25 = vld [vmem:[#allocation2 + $0x10] sm:$0xe]  ;;  %v5881_v16 = vcombine.low %v1694_v52, %v7632_v44  ;;  %v1887_v58 = vshrl.u32 %v7600_v10, 16 }
 0x193   : > { %6344 = vmatmul.mubr.msk.bf16.gmra.mrb[32].mxu0 %vm3689_vm8, %v5921_v14  ;;  %1392 = vst.msk [vmem:[#allocation2 + $0xe4] sm:$0x1] %vm1335_vm1, %v5619_v38  ;;  %v3395_v14 = vshll.u32 %v7623_v8, 16  ;;  %v3680_v38 = vrot.slane %v5883_v7, 1  ;;  %v7645_v9 = vcombine.low %v7469_v28, %v7430_v12  ;;  %v5670_v4 = vcombine.low %v1481_v25, %v7635_v62  ;;  %v7650_v31 = vld [vmem:[#allocation2 + $0xb4] sm:$0x1] }
 0x194   : > { %1387 = vst.msk [vmem:[#allocation2 + $0xd0] sm:$0xf] %vm1333_vm0, %v5614_v41  ;;  %v1497_v41 = vld [vmem:[#allocation2 + $0xb0] sm:$0xe]  ;;  %v6630_v12 = vld [vmem:[%s9511_s4] sm:$0xff]   ;;  %v5637_v28 = vcombine.low %v1416_v34, %v7474_v5  ;;  %v2922_v11 = vrot.slane %v5765_v24, 1  ;;  %v7666_v50 = vcombine.low %v7639_v19, %v7436_v21  ;;  %v1892_v55 = vor.u32 %v1891_v26, %v1887_v58 }
 0x195   : > { %1388 = vst.msk [vmem:[#allocation2 + $0xd4] sm:$0x1] %vm1335_vm1, %v5615_v53  ;;  %2289 = vrot.lane.b32.xlu0 %v2253_v37, %s6924_s13  ;;  %v7652_v53 = vld [vmem:[#allocation2 + $0xc8] sm:$0xf]  ;;  %v6629_v37 = vld [vmem:[%s9511_s4 + $0x40] sm:$0xff]   ;;  %v3393_v10 = vshrl.u32 %v7623_v8, 16  ;;  %v7678_v21 = vcombine.low %v1432_v23, %v7520_v40  ;;  %v5640_v24 = vcombine.low %v1419_v43, %v7596_v22 }
 0x196   : > { %2987 = vrot.lane.b32.xlu1 %v2938_v42, %s6925_s16  ;;  %v3397_v18 = vrot.slane %v3395_v14, 1  ;;  %v2001_v57 = vshll.u32 %v5655_v3, 16  ;;  %6127 = vmatprep.subr.bf16.mxu1 %v6629_v37  ;;  %v3678_v8 = vrot.slane %v5881_v16, 1  ;;  %v2251_v25 = vrot.slane %v5670_v4, 1  ;;  %v6633_v22 = vld [vmem:[%s9511_s4 + $0x48] sm:$0xff]  }
 0x197   : > { %6128 = vmatpush3.bf16.msra.mxu1 %v6630_v12  ;;  %v1999_v26 = vshrl.u32 %v5655_v3, 16  ;;  %v3290_v14 = vshll.u32 %v7645_v9, 16  ;;  %v1896_v4 = vshll.u32 %v5640_v24, 16  ;;  %v7689_v3 = vld [vmem:[#allocation2 + $0x38] sm:$0xf] }
 0x198   : > { %v3398_v58 = vor.u32 %v3397_v18, %v3393_v10  ;;  %v2003_v37 = vrot.slane %v2001_v57, 1  ;;  %v1987_v10 = vshll.u32 %v7678_v21, 16  ;;  %6129 = vmatprep.subr.bf16.mxu1 %v6633_v22  ;;  %v3288_v18 = vshrl.u32 %v7645_v9, 16  ;;  %v6637_v57 = vld [vmem:[%s9511_s4 + $0x10] sm:$0xff]  }
 0x199   : > { %2321 = vrot.lane.b32.xlu0 %v2269_v59, %s6924_s13  ;;  %v1695_v49 = vld [vmem:[#allocation2 + $0xe0] sm:$0xe]  ;;  %v7675_v59 = vcombine.low %v7652_v53, %v7569_v17  ;;  %v1875_v17 = vshll.u32 %v5637_v28, 16  ;;  %v3292_v43 = vrot.slane %v3290_v14, 1  ;;  %v1898_v9 = vrot.slane %v1896_v4, 1 }
 0x19a   : > { %3499 = vrot.lane.b32.xlu1 %v3286_v0, %s6926_s10  ;;  %v7662_v42 = vld [vmem:[#allocation2 + $0xe4] sm:$0x1]  ;;  %v5686_v0 = vcombine.low %v1497_v41, %v7650_v31  ;;  %v2004_v41 = vor.u32 %v2003_v37, %v1999_v26  ;;  %v1985_v26 = vshrl.u32 %v7678_v21, 16  ;;  %v7720_v14 = vld [vmem:[#allocation2 + $0xd8] sm:$0xf] }
 0x19b   : > { %v1693_v48 = vld [vmem:[#allocation2 + $0xd0] sm:$0xe]  ;;  %v5882_v52 = vcombine.low %v1695_v49, %v7662_v42  ;;  %v1877_v12 = vrot.slane %v1875_v17, 1  ;;  %v7697_v49 = vld [vmem:[#allocation2 + $0x3c] sm:$0x1] }
 0x19c   : > { %v7668_v7 = vld [vmem:[#allocation2 + $0xd4] sm:$0x1]  ;;  %v2267_v23 = vrot.slane %v5686_v0, 1  ;;  %v6642_v37 = vld [vmem:[%s9511_s4 + $0x18] sm:$0xff]   ;;  %v7733_v21 = vld [vmem:[#allocation2 + $0xe0] sm:$0xf] }
 0x19d   : > { %2955 = vrot.lane.b32.xlu0 %v2922_v11, %s6925_s16  ;;  %v5880_v5 = vcombine.low %v1693_v48, %v7668_v7  ;;  %v3679_v34 = vrot.slane %v5882_v52, 1  ;;  %v1873_v48 = vshrl.u32 %v5637_v28, 16  ;;  %v6641_v52 = vld [vmem:[%s9511_s4 + $0x58] sm:$0xff]   ;;  %v1989_v28 = vrot.slane %v1987_v10, 1  ;;  %v7735_v17 = vld [vmem:[#allocation2 + $0xe4] sm:$0x1] }
 0x19e   : > { %2095 = vrot.lane.b32.xlu1 %v1892_v55, %s6925_s16  ;;  %v6636_v55 = vld [vmem:[%s9511_s4 + $0x50] sm:$0xff]   ;;  %v7756_v10 = vld [vmem:[#allocation2 + $0x2c] sm:$0x1] }
 0x19f   : > { %v3677_v16 = vrot.slane %v5880_v5, 1  ;;  %v5927_v11 = vcombine.low %v3679_v34, %v3680_v38  ;;  %v6634_v38 = vld [vmem:[%s9511_s4 + $0x8] sm:$0xff]   ;;  %v7713_v5 = vcombine.low %v7507_v15, %v7571_v56  ;;  %v7717_v34 = vcombine.low %v7689_v3, %v7697_v49  ;;  %v7725_v15 = vld [vmem:[#allocation2 + $0x40] sm:$0xf]  ;;  %v7727_v56 = vld [vmem:[#allocation2 + $0x44] sm:$0x1] }
 0x1a0   : > { %6130 = vmatpush3.bf16.msra.mxu1 %v6634_v38  ;;  %v1878_v0 = vor.u32 %v1877_v12, %v1873_v48  ;;  %v1990_v4 = vor.u32 %v1989_v28, %v1985_v26  ;;  %v7748_v38 = vpop.permute.xlu1 %3127  ;;  %v7754_v12 = vcombine.low %v7725_v15, %v7727_v56  ;;  %v7772_v48 = vcombine.low %v7551_v46, %v7413_v30  ;;  %v7783_v28 = vld [vmem:[#allocation2 + $0xd0] sm:$0xf]  ;;  %v7789_v46 = vld [vmem:[#allocation2 + $0xd4] sm:$0x1] }
 0x1a1   : > { %2285 = vrot.lane.b32.xlu0 %v2251_v25, %s6924_s13  ;;  %v5924_v40 = vcombine.low %v3677_v16, %v3678_v8  ;;  %6131 = vmatprep.subr.bf16.mxu1 %v6636_v55  ;;  %v1435_v8 = vld [vmem:[#allocation2 + $0xc0] sm:$0xf]  ;;  %v3293_v25 = vor.u32 %v3292_v43, %v3288_v18  ;;  %9569 = vst [vmem:[#allocation13_spill] sm:$0xff] %v7717_v34  ;;  %v7722_v16 = vld [vmem:[#allocation2 + $0xdc] sm:$0x1]  ;;  %v3402_v22 = vshll.u32 %v7713_v5, 16 }
 0x1a2   : > { %3531 = vrot.lane.b32.xlu1 %v3398_v58, %s6926_s10  ;;  %v1894_v58 = vshrl.u32 %v5640_v24, 16  ;;  %v6645_v24 = vld [vmem:[%s9511_s4 + $0x60] sm:$0xff]   ;;  %v1417_v43 = vld [vmem:[#allocation2 + $0x10] sm:$0xf]  ;;  %9571 = vst [vmem:[#allocation15_spill] sm:$0xff] %v7748_v38  ;;  %9572 = vst [vmem:[#allocation16_spill] sm:$0xff] %v7754_v12  ;;  %v7763_v55 = vcombine.low %v7733_v21, %v7735_v17 }
 0x1a3   : > { %6347 = vmatprep.mubr.msk.bf16.mxu0 %vm3689_vm8, %v5924_v40  ;;  %v7765_v18 = vld [vmem:[#allocation2 + $0x34] sm:$0x1]  ;;  %v6652_v38 = vld [vmem:[%s9511_s4 + $0x28] sm:$0xff]   ;;  %v6661_v12 = vld [vmem:[%s9511_s4 + $0x78] sm:$0xff]  }
 0x1a4   : > { %6348 = vmatmul.mubr.msk.bf16.gmra.mrb[36].mxu0 %vm3689_vm8, %v5927_v11  ;;  %6132 = vmatpush3.bf16.msra.mxu1 %v6637_v57  ;;  %v7741_v11 = vcombine.low %v1435_v8, %v7606_v2  ;;  %v1899_v40 = vor.u32 %v1898_v9, %v1894_v58  ;;  %v7759_v2 = vld [vmem:[#allocation2 + $0x30] sm:$0xf]  ;;  %9573 = vst [vmem:[#allocation17_spill] sm:$0xff] %v7763_v55  ;;  %v6646_v57 = vld [vmem:[%s9511_s4 + $0x20] sm:$0xff]   ;;  %v7775_v8 = vld [vmem:[#allocation2 + $0x38] sm:$0xf] }
 0x1a5   : > { %2317 = vrot.lane.b32.xlu0 %v2267_v23, %s6924_s13  ;;  %6133 = vmatprep.subr.bf16.mxu1 %v6641_v52  ;;  %v7746_v23 = vcombine.low %v7720_v14, %v7722_v16  ;;  %v1433_v52 = vld [vmem:[#allocation2 + $0xb0] sm:$0xf]  ;;  %v5706_v9 = vcombine.low %v7689_v3, %v7689_v3  ;;  %v5801_v58 = vcombine.low %v7775_v8, %v7775_v8 }
 0x1a6   : > { %2127 = vrot.lane.b32.xlu1 %v2004_v41, %s6925_s16  ;;  %v7750_v41 = vld [vmem:[#allocation2 + $0x28] sm:$0xf]  ;;  %v2008_v26 = vshll.u32 %v7741_v11, 16  ;;  %v7798_v3 = vcombine.low %v1417_v43, %v7635_v62  ;;  %v7814_v62 = vcombine.low %v1433_v52, %v7650_v31 }
 0x1a7   : > { %9570 = vst [vmem:[#allocation14_spill] sm:$0xff] %v7746_v23  ;;  %v7787_v30 = vcombine.low %v7750_v41, %v7756_v10  ;;  %v7819_v43 = vld [vmem:[#allocation2 + $0xc8] sm:$0xf] }
 0x1a8   : > { %6134 = vmatpush3.bf16.msra.mxu1 %v6642_v37  ;;  %v7795_v37 = vcombine.low %v7759_v2, %v7765_v18  ;;  %v2010_v52 = vrot.slane %v2008_v26, 1  ;;  %v1880_v34 = vshrl.u32 %v7798_v3, 16 }
 0x1a9   : > { %3501 = vrot.lane.b32.xlu0 %v3293_v25, %s6926_s10  ;;  %6135 = vmatprep.subr.bf16.mxu1 %v6645_v24  ;;  %v6651_v25 = vld [vmem:[%s9511_s4 + $0x68] sm:$0xff]   ;;  %9574 = vst [vmem:[#allocation18_spill] sm:$0xff] %v7787_v30  ;;  %v3400_v24 = vshrl.u32 %v7713_v5, 16  ;;  %v7817_v5 = vpop.permute.xlu1 %3143  ;;  %v5799_v30 = vcombine.low %v7639_v19, %v7639_v19 }
 0x1aa   : > { %2091 = vrot.lane.b32.xlu1 %v1878_v0, %s6925_s16  ;;  %v3404_v0 = vrot.slane %v3402_v22, 1  ;;  %9575 = vst [vmem:[#allocation19_spill] sm:$0xff] %v7795_v37  ;;  %v7804_v22 = vpop.permute.xlu0 %2281  ;;  %v7811_v37 = vcombine.low %v7586_v27, %v7528_v45  ;;  %9576 = vst [vmem:[#allocation20_spill] sm:$0xff] %v7817_v5  ;;  %v6656_v45 = vld [vmem:[%s9511_s4 + $0x70] sm:$0xff]   ;;  %v2006_v5 = vshrl.u32 %v7741_v11, 16  ;;  %v5722_v11 = vcombine.low %v7720_v14, %v7720_v14 }
 0x1ab   : > { %v3274_v14 = vshrl.u32 %v7772_v48, 16 }
 0x1ac   : > { %6136 = vmatpush3.bf16.msra.mxu1 %v6646_v57  ;;  %v7823_v57 = vcombine.low %v7783_v28, %v7789_v46  ;;  %v3405_v27 = vor.u32 %v3404_v0, %v3400_v24  ;;  %v1882_v24 = vshll.u32 %v7798_v3, 16 }
 0x1ad   : > { %2097 = vrot.lane.b32.xlu0 %v1899_v40, %s6925_s16  ;;  %v7802_v40 = vld [vmem:[#allocation2 + $0xd8] sm:$0xf]  ;;  %6137 = vmatprep.subr.bf16.mxu1 %v6651_v25  ;;  %v7841_v25 = vld [vmem:[%s9510_s3] ss:$0 sm:$0xff]  ;;  %v7871_v35 = vpop.permute.xlu1 %2089 }
 0x1ae   : > { %2123 = vrot.lane.b32.xlu1 %v1990_v4, %s6925_s16  ;;  %v1486_v4 = vld [vmem:[#allocation2 + $0x38] sm:$0xe]  ;;  %9577 = vst [vmem:[#allocation21_spill] sm:$0xff] %v7823_v57  ;;  %v5817_v31 = vcombine.low %v7802_v40, %v7802_v40  ;;  %v7836_v57 = vld [vmem:[#allocation2 + $0x3c] sm:$0x1]  ;;  %v690_v0 = vadd.f32 %v7841_v25, %v7463_v1  ;;  %v682_v26 = vadd.f32 %v7841_v25, %v7466_v47  ;;  %v6657_v1 = vld [vmem:[%s9511_s4 + $0x30] sm:$0xff]  }
 0x1af   : > { %v5675_v19 = vcombine.low %v1486_v4, %v7836_v57  ;;  %v5815_v47 = vcombine.low %v7652_v53, %v7652_v53  ;;  %v698_v3 = vadd.f32 %v7841_v25, %v7530_v54  ;;  %v3388_v54 = vshll.u32 %v7811_v37, 16 }
 0x1b0   : > { %6138 = vmatpush3.bf16.msra.mxu1 %v6652_v38  ;;  %v736_v4 = vmax.f32 %v682_v26, 0.0  ;;  %v7866_v38 = vpop.permute.xlu0 %2297 }
 0x1b1   : > { %2453 = vrot.lane.b32.xlu0 %v5706_v9, %s6926_s10  ;;  %v7825_v9 = vld [vmem:[#allocation2 + $0xcc] sm:$0x1]  ;;  %6139 = vmatprep.subr.bf16.mxu1 %v6656_v45  ;;  %9579 = vst [vmem:[#allocation23_spill] sm:$0xff] %v7866_v38  ;;  %v685_v45 = vadd.f32 %v7841_v25, %v7501_v6  ;;  %v740_v63 = vmax.f32 %v698_v3, 0.0 }
 0x1b2   : > { %3123 = vrot.lane.b32.xlu1 %v5801_v58, %s6924_s13  ;;  %v3276_v58 = vshll.u32 %v7772_v48, 16  ;;  %v7854_v55 = vcombine.low %v7819_v43, %v7825_v9  ;;  %v768_v48 = vpack.c.bf16 %v736_v4, %v736_v4 }
 0x1b4   : > { %9578 = vst [vmem:[#allocation22_spill] sm:$0xff] %v7854_v55  ;;  %v2011_v55 = vor.u32 %v2010_v52, %v2006_v5  ;;  %v3278_v23 = vrot.slane %v3276_v58, 1  ;;  %v2256_v5 = vrot.slane %v5675_v19, 1  ;;  %v1884_v52 = vrot.slane %v1882_v24, 1  ;;  %6140 = vmatpush3.bf16.msra.mxu1 %v6657_v1  ;;  %v7888_v33 = vpop.permute.xlu0 %2105 }
 0x1b5   : > { %3533 = vrot.lane.b32.xlu0 %v3405_v27, %s6926_s10  ;;  %v738_v27 = vmax.f32 %v690_v0, 0.0  ;;  %v706_v0 = vadd.f32 %v7841_v25, %v7509_v51  ;;  %v948_v4 = vshll.u32 %v768_v48, 16  ;;  %6141 = vmatprep.subr.bf16.mxu1 %v6661_v12  ;;  %v737_v19 = vmax.f32 %v685_v45, 0.0  ;;  %9581 = vst [vmem:[#allocation25_spill] sm:$0xff] %v7888_v33 }
 0x1b6   : > { %3155 = vrot.lane.b32.xlu1 %v5817_v31, %s6924_s13  ;;  %v693_v31 = vadd.f32 %v7841_v25, %v7482_v36  ;;  %v6662_v36 = vld [vmem:[%s9511_s4 + $0x38] sm:$0xff]   ;;  %v3279_v51 = vor.u32 %v3278_v23, %v3274_v14  ;;  %v1885_v23 = vor.u32 %v1884_v52, %v1880_v34  ;;  %v772_v45 = vpack.c.bf16 %v740_v63, %v740_v63 }
 0x1b7   : > { %v770_v53 = vpack.c.bf16 %v738_v27, %v738_v27  ;;  %v945_v27 = vshrl.u32 %v768_v48, 16  ;;  %v742_v24 = vmax.f32 %v706_v0, 0.0  ;;  %v769_v61 = vpack.c.bf16 %v737_v19, %v737_v19  ;;  %v1502_v34 = vld [vmem:[#allocation2 + $0xd8] sm:$0xe] }
 0x1b8   : > { %v739_v58 = vmax.f32 %v693_v31, 0.0  ;;  %v7884_v31 = vpop.permute.xlu1 %3511  ;;  %6142 = vmatpush3.bf16.msra.mxu1 %v6662_v36  ;;  %v973_v19 = vshrl.u32 %v772_v45, 16  ;;  %v7896_v36 = vpop.permute.xlu0 %2121 }
 0x1b9   : > { %2129 = vrot.lane.b32.xlu0 %v2011_v55, %s6925_s16  ;;  %v959_v26 = vshrl.u32 %v770_v53, 16  ;;  %v962_v6 = vshll.u32 %v770_v53, 16  ;;  %9580 = vst [vmem:[#allocation24_spill] sm:$0xff] %v7884_v31  ;;  %v947_v38 = vrot.slane %v945_v27, 7  ;;  %v774_v48 = vpack.c.bf16 %v742_v24, %v742_v24  ;;  %9582 = vst [vmem:[#allocation26_spill] sm:$0xff] %v7896_v36 }
 0x1ba   : > { %3119 = vrot.lane.b32.xlu1 %v5799_v30, %s6924_s13  ;;  %v771_v55 = vpack.c.bf16 %v739_v58, %v739_v58  ;;  %v952_v58 = vshrl.u32 %v769_v61, 16  ;;  %v3297_v31 = vshll.u32 %v7666_v50, 16 }
 0x1bb   : > { %v961_v1 = vrot.slane %v959_v26, 7  ;;  %v950_v14 = vor.u32 %v948_v4, %v947_v38  ;;  %v955_v26 = vshll.u32 %v769_v61, 16  ;;  %v987_v27 = vshrl.u32 %v774_v48, 16 }
 0x1bc   : > { %v966_v30 = vshrl.u32 %v771_v55, 16  ;;  %v969_v53 = vshll.u32 %v771_v55, 16  ;;  %v990_v55 = vshll.u32 %v774_v48, 16  ;;  %v954_v38 = vrot.slane %v952_v58, 7  ;;  %v7903_v52 = vpop.permute.xlu1 %3527 }
 0x1bd   : > { %2485 = vrot.lane.b32.xlu0 %v5722_v11, %s6926_s10  ;;  %v964_v12 = vor.u32 %v962_v6, %v961_v1  ;;  %v1059_v3 = vsel %vm7215_vm6, 0, %v950_v14  ;;  %9583 = vst [vmem:[#allocation27_spill] sm:$0xff] %v7903_v52  ;;  %v975_v14 = vrot.slane %v973_v19, 7  ;;  %v976_v58 = vshll.u32 %v772_v45, 16  ;;  %v7927_v45 = vpop.permute.xlu0 %2313 }
 0x1be   : > { %3151 = vrot.lane.b32.xlu1 %v5815_v47, %s6924_s13  ;;  %v968_v0 = vrot.slane %v966_v30, 7  ;;  %v1094_v61 = vsel %vm7227_vm7, %v1059_v3, 0  ;;  %v957_v48 = vor.u32 %v955_v26, %v954_v38  ;;  %v5704_v3 = vcombine.low %v7750_v41, %v7750_v41  ;;  %9584 = vst [vmem:[#allocation28_spill] sm:$0xff] %v7927_v45 }
 0x1bf   : > { %v1061_v11 = vsel %vm7215_vm6, 0, %v964_v12  ;;  %v5620_v24 = vcombine.low %v1094_v61, %v1094_v61  ;;  %v5621_v1 = vcombine.high %v1094_v61, %v1094_v61  ;;  %v989_v12 = vrot.slane %v987_v27, 7 }
 0x1c0   : > { %v1096_v63 = vsel %vm7227_vm7, %v1061_v11, 0  ;;  %v971_v47 = vor.u32 %v969_v53, %v968_v0  ;;  %v5707_v53 = vcombine.low %v7725_v15, %v7725_v15  ;;  %v1060_v15 = vsel %vm7215_vm6, 0, %v957_v48  ;;  %v7933_v41 = vpop.permute.xlu1 %3159 }
 0x1c1   : > { %3497 = vrot.lane.b32.xlu0 %v3279_v51, %s6926_s10  ;;  %v5624_v6 = vcombine.low %v1096_v63, %v1096_v63  ;;  %v5625_v4 = vcombine.high %v1096_v63, %v1096_v63  ;;  %v7905_v51 = vld [vmem:[#allocation2 + $0xdc] sm:$0x1]  ;;  %1397 = vst.msk [vmem:[#allocation2 + $0xf8] sm:$0xf] %vm1333_vm0, %v5620_v24  ;;  %v992_v11 = vor.u32 %v990_v55, %v989_v12  ;;  %v1994_v19 = vshll.u32 %v7814_v62, 16 }
 0x1c2   : > { %2295 = vrot.lane.b32.xlu1 %v2256_v5, %s6924_s13  ;;  %v1062_v30 = vsel %vm7215_vm6, 0, %v971_v47  ;;  %v5691_v0 = vcombine.low %v1502_v34, %v7905_v51  ;;  %1398 = vst.msk [vmem:[#allocation2 + $0xfc] sm:$0x1] %vm1335_vm1, %v5621_v1  ;;  %v1095_v34 = vsel %vm7227_vm7, %v1060_v15, 0  ;;  %v978_v63 = vor.u32 %v976_v58, %v975_v14  ;;  %9585 = vst [vmem:[#allocation29_spill] sm:$0xff] %v7933_v41 }
 0x1c3   : > { %1401 = vst.msk [vmem:[#allocation2 + $0x108] sm:$0xf] %vm1333_vm0, %v5624_v6  ;;  %v1097_v5 = vsel %vm7227_vm7, %v1062_v30, 0  ;;  %v5622_v61 = vcombine.low %v1095_v34, %v1095_v34  ;;  %v5623_v55 = vcombine.high %v1095_v34, %v1095_v34  ;;  %v1065_v47 = vsel %vm7215_vm6, 0, %v992_v11  ;;  %v1484_v24 = vld [vmem:[#allocation2 + $0x28] sm:$0xe] }
 0x1c4   : > { %1402 = vst.msk [vmem:[#allocation2 + $0x10c] sm:$0x1] %vm1335_vm1, %v5625_v4  ;;  %v5626_v26 = vcombine.low %v1097_v5, %v1097_v5  ;;  %v5627_v27 = vcombine.high %v1097_v5, %v1097_v5  ;;  %v2272_v38 = vrot.slane %v5691_v0, 1  ;;  %v1100_v6 = vsel %vm7227_vm7, %v1065_v47, 0  ;;  %v7946_v5 = vld [vmem:[#allocation2 + $0x2c] sm:$0x1]  ;;  %v7960_v15 = vpop.permute.xlu1 %3543 }
 0x1c5   : > { %2093 = vrot.lane.b32.xlu0 %v1885_v23, %s6925_s16  ;;  %v3390_v23 = vrot.slane %v3388_v54, 1  ;;  %v1063_v4 = vsel %vm7215_vm6, 0, %v978_v63  ;;  %v3386_v54 = vshrl.u32 %v7811_v37, 16  ;;  %1399 = vst.msk [vmem:[#allocation2 + $0x100] sm:$0xf] %vm1333_vm0, %v5622_v61  ;;  %v5632_v1 = vcombine.low %v1100_v6, %v1100_v6  ;;  %9587 = vst [vmem:[#allocation31_spill] sm:$0xff] %v7960_v15 }
 0x1c6   : > { %2455 = vrot.lane.b32.xlu1 %v5707_v53, %s6926_s10  ;;  %1403 = vst.msk [vmem:[#allocation2 + $0x110] sm:$0xf] %vm1333_vm0, %v5626_v26  ;;  %v5633_v30 = vcombine.high %v1100_v6, %v1100_v6  ;;  %v1098_v48 = vsel %vm7227_vm7, %v1063_v4, 0  ;;  %v1996_v0 = vrot.slane %v1994_v19, 1  ;;  %v5723_v37 = vcombine.low %v7733_v21, %v7733_v21  ;;  %v7955_v26 = vpop.permute.xlu0 %2137  ;;  %v1500_v19 = vld [vmem:[#allocation2 + $0xc8] sm:$0xe] }
 0x1c7   : > { %1404 = vst.msk [vmem:[#allocation2 + $0x114] sm:$0x1] %vm1335_vm1, %v5627_v27  ;;  %1400 = vst.msk [vmem:[#allocation2 + $0x104] sm:$0x1] %vm1335_vm1, %v5623_v55  ;;  %v5628_v12 = vcombine.low %v1098_v48, %v1098_v48  ;;  %v5629_v14 = vcombine.high %v1098_v48, %v1098_v48  ;;  %v3391_v53 = vor.u32 %v3390_v23, %v3386_v54  ;;  %v1992_v27 = vshrl.u32 %v7814_v62, 16 }
 0x1c8   : > { %1409 = vst.msk [vmem:[#allocation2 + $0x128] sm:$0xf] %vm1333_vm0, %v5632_v1  ;;  %v5673_v58 = vcombine.low %v1484_v24, %v7946_v5  ;;  %9586 = vst [vmem:[#allocation30_spill] sm:$0xff] %v7955_v26  ;;  %v7962_v34 = vld [vmem:[#allocation2 + $0x68] sm:$0xf]  ;;  %v5720_v47 = vcombine.low %v7819_v43, %v7819_v43  ;;  %v5705_v6 = vcombine.low %v7759_v2, %v7759_v2 }
 0x1c9   : > { %2449 = vrot.lane.b32.xlu0 %v5704_v3, %s6926_s10  ;;  %1410 = vst.msk [vmem:[#allocation2 + $0x12c] sm:$0x1] %vm1335_vm1, %v5633_v30  ;;  %1406 = vst.msk [vmem:[#allocation2 + $0x11c] sm:$0x1] %vm1335_vm1, %v5629_v14  ;;  %v1997_v11 = vor.u32 %v1996_v0, %v1992_v27  ;;  %v1582_v3 = vld [vmem:[#allocation2 + $0x38] sm:$0xe] }
 0x1ca   : > { %2327 = vrot.lane.b32.xlu1 %v2272_v38, %s6924_s13  ;;  %1405 = vst.msk [vmem:[#allocation2 + $0x118] sm:$0xf] %vm1333_vm0, %v5628_v12  ;;  %v2254_v21 = vrot.slane %v5673_v58, 1  ;;  %v7964_v63 = vld [vmem:[#allocation2 + $0x6c] sm:$0x1]  ;;  %v5770_v62 = vcombine.low %v1582_v3, %v7697_v49  ;;  %v7972_v55 = vpop.permute.xlu0 %2329 }
 0x1cb   : > { %v7967_v23 = vld [vmem:[#allocation2 + $0xcc] sm:$0x1]  ;;  %9588 = vst [vmem:[#allocation32_spill] sm:$0xff] %v7972_v55  ;;  %v7978_v38 = vcombine.low %v7962_v34, %v7964_v63  ;;  %v1598_v24 = vld [vmem:[#allocation2 + $0xd8] sm:$0xe] }
 0x1cc   : > { %v5689_v61 = vcombine.low %v1500_v19, %v7967_v23  ;;  %v2927_v49 = vrot.slane %v5770_v62, 1  ;;  %v1666_v1 = vld [vmem:[#allocation2 + $0x10c] sm:$0x1]  ;;  %v1698_v30 = vld [vmem:[#allocation2 + $0x108] sm:$0xe] }
 0x1cd   : > { %3529 = vrot.lane.b32.xlu0 %v3391_v53, %s6926_s10  ;;  %9589 = vst [vmem:[#allocation33_spill] sm:$0xff] %v7978_v38  ;;  %v1697_v12 = vld [vmem:[#allocation2 + $0x100] sm:$0xe]  ;;  %v1699_v0 = vld [vmem:[#allocation2 + $0x110] sm:$0xe] }
 0x1ce   : > { %2487 = vrot.lane.b32.xlu1 %v5723_v37, %s6926_s10  ;;  %v2270_v54 = vrot.slane %v5689_v61, 1  ;;  %v7988_v43 = vld [vmem:[#allocation2 + $0x104] sm:$0x1]  ;;  %v1667_v14 = vld [vmem:[#allocation2 + $0x114] sm:$0x1]  ;;  %v5721_v61 = vcombine.low %v7783_v28, %v7783_v28 }
 0x1cf   : > { %v7991_v37 = vld [vmem:[#allocation2 + $0x40] sm:$0xf]  ;;  %v7993_v27 = vld [vmem:[#allocation2 + $0x108] sm:$0xf]  ;;  %v5884_v19 = vcombine.low %v1697_v12, %v7988_v43  ;;  %v8012_v28 = vld [vmem:[#allocation2 + $0x58] sm:$0xf] }
 0x1d0   : > { %v1668_v53 = vld [vmem:[#allocation2 + $0x11c] sm:$0x1]  ;;  %v1583_v58 = vld [vmem:[#allocation2 + $0x40] sm:$0xe]  ;;  %v5802_v3 = vcombine.low %v7991_v37, %v7991_v37  ;;  %v8008_v45 = vcombine.low %v7993_v27, %v1666_v1  ;;  %v1485_v38 = vld [vmem:[#allocation2 + $0x30] sm:$0xe] }
 0x1d1   : > { %2125 = vrot.lane.b32.xlu0 %v1997_v11, %s6925_s16  ;;  %v1700_v2 = vld [vmem:[#allocation2 + $0x118] sm:$0xe]  ;;  %v5771_v55 = vcombine.low %v1583_v58, %v7727_v56  ;;  %v1599_v12 = vld [vmem:[#allocation2 + $0xe0] sm:$0xe]  ;;  %v8022_v58 = vld [vmem:[#allocation2 + $0x70] sm:$0xf] }
 0x1d2   : > { %2291 = vrot.lane.b32.xlu1 %v2254_v21, %s6924_s13  ;;  %v5885_v21 = vcombine.low %v1698_v30, %v1666_v1  ;;  %9592 = vst [vmem:[#allocation36_spill] sm:$0xff] %v8008_v45  ;;  %v8107_v41 = vld [vmem:[#allocation2 + $0x88] sm:$0xf] }
 0x1d3   : > { %v2928_v1 = vrot.slane %v5771_v55, 1  ;;  %v8034_v55 = vld [vmem:[#allocation2 + $0x64] sm:$0x1] }
 0x1d4   : > { %v7982_v4 = vpop.permute.xlu1 %3115  ;;  %v7986_v48 = vpop.permute.xlu0 %2445  ;;  %v3682_v26 = vrot.slane %v5885_v21, 1 }
 0x1d5   : > { %2481 = vrot.lane.b32.xlu0 %v5720_v47, %s6926_s10  ;;  %9590 = vst [vmem:[#allocation34_spill] sm:$0xff] %v7986_v48  ;;  %v5786_v47 = vcombine.low %v1598_v24, %v7722_v16  ;;  %v8014_v16 = vld [vmem:[#allocation2 + $0x5c] sm:$0x1] }
 0x1d6   : > { %2451 = vrot.lane.b32.xlu1 %v5705_v6, %s6926_s10  ;;  %v5886_v6 = vcombine.low %v1699_v0, %v1667_v14  ;;  %v1580_v14 = vld [vmem:[#allocation2 + $0x28] sm:$0xe] }
 0x1d7   : > { %v2943_v56 = vrot.slane %v5786_v47, 1 }
 0x1d8   : > { %v7996_v11 = vpop.permute.xlu1 %3147  ;;  %v3683_v30 = vrot.slane %v5886_v6, 1  ;;  %v6758_v6 = vld [vmem:[#allocation2 + $0x3c] sm:$0x1] }
 0x1d9   : > { %2965 = vrot.lane.b32.xlu0 %v2927_v49, %s6925_s16  ;;  %v5887_v49 = vcombine.low %v1700_v2, %v1668_v53  ;;  %v5787_v2 = vcombine.low %v1599_v12, %v7735_v17  ;;  %v8037_v17 = vld [vmem:[#allocation2 + $0xe0] sm:$0xf] }
 0x1da   : > { %2323 = vrot.lane.b32.xlu1 %v2270_v54, %s6924_s13  ;;  %v8001_v62 = vpop.permute.xlu0 %2477  ;;  %v3681_v54 = vrot.slane %v5884_v19, 1  ;;  %v8028_v19 = vld [vmem:[#allocation2 + $0x60] sm:$0xf] }
 0x1db   : > { %9591 = vst [vmem:[#allocation35_spill] sm:$0xff] %v8001_v62  ;;  %v3684_v36 = vrot.slane %v5887_v49, 1  ;;  %v5833_v49 = vcombine.low %v7775_v8, %v6758_v6  ;;  %v2944_v12 = vrot.slane %v5787_v2, 1  ;;  %v1596_v6 = vld [vmem:[#allocation2 + $0xc8] sm:$0xe] }
 0x1dc   : > { %v5930_v62 = vcombine.low %v3681_v54, %v3682_v26  ;;  %v1581_v26 = vld [vmem:[#allocation2 + $0x30] sm:$0xe] }
 0x1dd   : > { %3125 = vrot.lane.b32.xlu0 %v5802_v3, %s6924_s13  ;;  %v5933_v53 = vcombine.low %v3683_v30, %v3684_v36  ;;  %v8024_v3 = vld [vmem:[#allocation2 + $0x74] sm:$0x1]  ;;  %v8032_v36 = vcombine.low %v8012_v28, %v8014_v16  ;;  %v5769_v30 = vcombine.low %v1581_v26, %v7765_v18  ;;  %v3311_v52 = vshll.u32 %v5833_v49, 16 }
 0x1de   : > { %2483 = vrot.lane.b32.xlu1 %v5721_v61, %s6926_s10  ;;  %6351 = vmatprep.mubr.msk.bf16.mxu0 %vm3689_vm8, %v5930_v62  ;;  %v5818_v62 = vcombine.low %v8037_v17, %v8037_v17  ;;  %v5768_v61 = vcombine.low %v1580_v14, %v7756_v10  ;;  %v8046_v47 = vcombine.low %v8022_v58, %v8024_v3  ;;  %v1597_v10 = vld [vmem:[#allocation2 + $0xd0] sm:$0xe] }
 0x1df   : > { %v8016_v24 = vpop.permute.xlu0 %2441  ;;  %v8018_v0 = vpop.permute.xlu1 %2287  ;;  %6352 = vmatmul.mubr.msk.bf16.gmra.mrb[40].mxu0 %vm3689_vm8, %v5933_v53  ;;  %9594 = vst [vmem:[#allocation38_spill] sm:$0xff] %v8032_v36  ;;  %v1422_v53 = vld [vmem:[#allocation2 + $0x38] sm:$0xf]  ;;  %v2926_v18 = vrot.slane %v5769_v30, 1  ;;  %v5785_v26 = vcombine.low %v1597_v10, %v7789_v46  ;;  %v5784_v46 = vcombine.low %v1596_v6, %v7825_v9 }
 0x1e0   : > { %9593 = vst [vmem:[#allocation37_spill] sm:$0xff] %v8018_v0  ;;  %9596 = vst [vmem:[#allocation40_spill] sm:$0xff] %v8046_v47  ;;  %v5643_v8 = vcombine.low %v1422_v53, %v7836_v57  ;;  %v1438_v30 = vld [vmem:[#allocation2 + $0xd8] sm:$0xf] }
 0x1e1   : > { %2997 = vrot.lane.b32.xlu0 %v2943_v56, %s6925_s16  ;;  %v8054_v56 = vcombine.low %v8028_v19, %v8034_v55  ;;  %v2942_v10 = vrot.slane %v5785_v26, 1  ;;  %v8091_v26 = vld [vmem:[#allocation2 + $0xd0] sm:$0xf] }
 0x1e2   : > { %2967 = vrot.lane.b32.xlu1 %v2928_v1, %s6925_s16  ;;  %v2925_v1 = vrot.slane %v5768_v61, 1  ;;  %v5849_v61 = vcombine.low %v7802_v40, %v7632_v44  ;;  %v1917_v36 = vshll.u32 %v5643_v8, 16  ;;  %v5659_v44 = vcombine.low %v1438_v30, %v7905_v51  ;;  %v8093_v51 = vld [vmem:[#allocation2 + $0x34] sm:$0x1] }
 0x1e3   : > { %v8039_v21 = vpop.permute.xlu0 %2473  ;;  %9598 = vst [vmem:[#allocation42_spill] sm:$0xff] %v8054_v56  ;;  %v1915_v9 = vshrl.u32 %v5643_v8, 16  ;;  %v1501_v8 = vld [vmem:[#allocation2 + $0xd0] sm:$0xe] }
 0x1e4   : > { %9595 = vst [vmem:[#allocation39_spill] sm:$0xff] %v8039_v21  ;;  %v8049_v54 = vpop.permute.xlu1 %2447  ;;  %v8060_v21 = vpop.f32.mrb[14].mxu1  ;;  %v1919_v6 = vrot.slane %v1917_v36, 1  ;;  %v5674_v36 = vcombine.low %v1485_v38, %v8093_v51  ;;  %v8109_v38 = vld [vmem:[#allocation2 + $0x8c] sm:$0x1] }
 0x1e5   : > { %9597 = vst [vmem:[#allocation41_spill] sm:$0xff] %v8049_v54  ;;  %3157 = vrot.lane.b32.xlu0 %v5818_v62, %s6924_s13  ;;  %v8066_v33 = vpop.f32.mrb[15].mxu1  ;;  %v8070_v62 = vld [vmem:[#allocation2 + $0x30] sm:$0xf]  ;;  %v8122_v0 = vcombine.low %v8107_v41, %v8109_v38 }
 0x1e6   : > { %2999 = vrot.lane.b32.xlu1 %v2944_v12, %s6925_s16  ;;  %v5800_v57 = vcombine.low %v8070_v62, %v8070_v62  ;;  %v2255_v48 = vrot.slane %v5674_v36, 1 }
 0x1e7   : > { %v8058_v14 = vpop.permute.xlu0 %2957  ;;  %9606 = vst [vmem:[#allocation50_spill] sm:$0xff] %v8122_v0  ;;  %v8137_v0 = vld [vmem:[#allocation2 + $0x84] sm:$0x1] }
 0x1e8   : > { %9599 = vst [vmem:[#allocation43_spill] sm:$0xff] %v8058_v14  ;;  %v8063_v2 = vpop.permute.xlu1 %2319  ;;  %9607 = vst [vmem:[#allocation51_spill] sm:$0xff] %v8137_v0 }
 0x1e9   : > { %9600 = vst [vmem:[#allocation44_spill] sm:$0xff] %v8063_v2  ;;  %2961 = vrot.lane.b32.xlu0 %v2925_v1, %s6925_s16  ;;  %v3309_v2 = vshrl.u32 %v5833_v49, 16  ;;  %v3313_v1 = vrot.slane %v3311_v52, 1  ;;  %v6759_v52 = vld [vmem:[#allocation2 + $0x44] sm:$0x1] }
 0x1ea   : > { %2963 = vrot.lane.b32.xlu1 %v2926_v18, %s6925_s16  ;;  %v2941_v18 = vrot.slane %v5784_v46, 1  ;;  %v5834_v49 = vcombine.low %v7991_v37, %v6759_v52  ;;  %v2029_v46 = vshll.u32 %v5659_v44, 16 }
 0x1eb   : > { %v8074_v12 = vpop.permute.xlu0 %3117  ;;  %v3314_v47 = vor.u32 %v3313_v1, %v3309_v2  ;;  %v5816_v2 = vcombine.low %v8091_v26, %v8091_v26  ;;  %v3421_v1 = vshrl.u32 %v5849_v61, 16 }
 0x1ec   : > { %9601 = vst [vmem:[#allocation45_spill] sm:$0xff] %v8074_v12  ;;  %v8079_v53 = vpop.permute.xlu1 %2479  ;;  %v3318_v15 = vshll.u32 %v5834_v49, 16 }
 0x1ed   : > { %9602 = vst [vmem:[#allocation46_spill] sm:$0xff] %v8079_v53  ;;  %3121 = vrot.lane.b32.xlu0 %v5800_v57, %s6924_s13  ;;  %v3423_v53 = vshll.u32 %v5849_v61, 16  ;;  %v2031_v61 = vrot.slane %v2029_v46, 1  ;;  %v8127_v46 = vld [vmem:[#allocation2 + $0x78] sm:$0xf] }
 0x1ee   : > { %2995 = vrot.lane.b32.xlu1 %v2942_v10, %s6925_s16  ;;  %v1920_v10 = vor.u32 %v1919_v6, %v1915_v9  ;;  %v2027_v9 = vshrl.u32 %v5659_v44, 16  ;;  %v3320_v36 = vrot.slane %v3318_v15, 1 }
 0x1ef   : > { %v8084_v40 = vpop.permute.xlu0 %2989  ;;  %v3425_v37 = vrot.slane %v3423_v53, 1 }
 0x1f0   : > { %9603 = vst [vmem:[#allocation47_spill] sm:$0xff] %v8084_v40  ;;  %v8086_v56 = vpop.permute.xlu1 %2283  ;;  %v3409_v40 = vshll.u32 %v7675_v59, 16 }
 0x1f1   : > { %2993 = vrot.lane.b32.xlu0 %v2941_v18, %s6925_s16  ;;  %v1420_v18 = vld [vmem:[#allocation2 + $0x28] sm:$0xf] }
 0x1f2   : > { %3507 = vrot.lane.b32.xlu1 %v3314_v47, %s6926_s10  ;;  %v8103_v47 = vld [vmem:[#allocation2 + $0xd4] sm:$0x1]  ;;  %v5641_v53 = vcombine.low %v1420_v18, %v7946_v5  ;;  %v3316_v5 = vshrl.u32 %v5834_v49, 16  ;;  %v8133_v18 = vld [vmem:[#allocation2 + $0x80] sm:$0xf]  ;;  %v3299_v49 = vrot.slane %v3297_v31, 1 }
 0x1f3   : > { %v8095_v57 = vpop.permute.xlu0 %3149  ;;  %v5690_v52 = vcombine.low %v1501_v8, %v8103_v47  ;;  %v8118_v8 = vld [vmem:[#allocation2 + $0x90] sm:$0xf] }
 0x1f4   : > { %9604 = vst [vmem:[#allocation48_spill] sm:$0xff] %v8095_v57  ;;  %v8100_v30 = vpop.permute.xlu1 %2443  ;;  %v8124_v57 = vld [vmem:[#allocation2 + $0x94] sm:$0x1]  ;;  %v1903_v15 = vshll.u32 %v5641_v53, 16  ;;  %v1421_v31 = vld [vmem:[#allocation2 + $0x30] sm:$0xf] }
 0x1f5   : > { %3153 = vrot.lane.b32.xlu0 %v5816_v2, %s6924_s13  ;;  %v3426_v2 = vor.u32 %v3425_v37, %v3421_v1  ;;  %v2271_v44 = vrot.slane %v5690_v52, 1  ;;  %v5850_v1 = vcombine.low %v8037_v17, %v7662_v42  ;;  %v3295_v52 = vshrl.u32 %v7666_v50, 16  ;;  %v6760_v17 = vld [vmem:[#allocation2 + $0x34] sm:$0x1] }
 0x1f6   : > { %2103 = vrot.lane.b32.xlu1 %v1920_v10, %s6925_s16  ;;  %v1436_v10 = vld [vmem:[#allocation2 + $0xc8] sm:$0xf]  ;;  %v8158_v50 = vcombine.low %v8133_v18, %v8137_v0 }
 0x1f7   : > { %v8111_v54 = vpop.permute.xlu0 %2953  ;;  %v8148_v42 = vcombine.low %v1436_v10, %v7967_v23  ;;  %v709_v23 = vadd.f32 %v7841_v25, %v8060_v21  ;;  %v5710_v21 = vcombine.low %v7962_v34, %v7962_v34 }
 0x1f8   : > { %v8114_v6 = vpop.permute.xlu1 %2315  ;;  %9611 = vst [vmem:[#allocation55_spill] sm:$0xff] %v8158_v50 }
 0x1f9   : > { %9605 = vst [vmem:[#allocation49_spill] sm:$0xff] %v8114_v6  ;;  %2293 = vrot.lane.b32.xlu0 %v2255_v48, %s6924_s13  ;;  %v2032_v48 = vor.u32 %v2031_v61, %v2027_v9  ;;  %v8135_v6 = vld [vmem:[#allocation2 + $0x7c] sm:$0x1]  ;;  %v5832_v9 = vcombine.low %v8070_v62, %v6760_v17  ;;  %v701_v62 = vadd.f32 %v7841_v25, %v8066_v33  ;;  %v1901_v17 = vshrl.u32 %v5641_v53, 16 }
 0x1fa   : > { %3539 = vrot.lane.b32.xlu1 %v3426_v2, %s6926_s10  ;;  %v8144_v2 = vcombine.low %v8118_v8, %v8124_v57  ;;  %v8154_v61 = vcombine.low %v8127_v46, %v8135_v6  ;;  %v743_v50 = vmax.f32 %v709_v23, 0.0  ;;  %v3428_v25 = vshrl.u32 %v5850_v1, 16  ;;  %v8176_v53 = vld [vmem:[#allocation2 + $0xfc] sm:$0x1] }
 0x1fb   : > { %v8131_v37 = vpop.permute.xlu0 %3113  ;;  %v741_v12 = vmax.f32 %v701_v62, 0.0  ;;  %v3304_v14 = vshll.u32 %v5832_v9, 16  ;;  %v3411_v62 = vrot.slane %v3409_v40, 1 }
 0x1fc   : > { %v8139_v45 = vpop.permute.xlu1 %2475  ;;  %9609 = vst [vmem:[#allocation53_spill] sm:$0xff] %v8144_v2  ;;  %9610 = vst [vmem:[#allocation54_spill] sm:$0xff] %v8154_v61  ;;  %v3430_v2 = vshll.u32 %v5850_v1, 16  ;;  %v1905_v61 = vrot.slane %v1903_v15, 1  ;;  %v8178_v15 = vld [vmem:[#allocation2 + $0xf8] sm:$0xf] }
 0x1fd   : > { %9608 = vst [vmem:[#allocation52_spill] sm:$0xff] %v8139_v45  ;;  %2325 = vrot.lane.b32.xlu0 %v2271_v44, %s6924_s13  ;;  %v3321_v44 = vor.u32 %v3320_v36, %v3316_v5  ;;  %v5642_v5 = vcombine.low %v1421_v31, %v8093_v51  ;;  %v3407_v31 = vshrl.u32 %v7675_v59, 16 }
 0x1fe   : > { %2135 = vrot.lane.b32.xlu1 %v2032_v48, %s6925_s16  ;;  %v3300_v48 = vor.u32 %v3299_v49, %v3295_v52  ;;  %v3432_v36 = vrot.slane %v3430_v2, 1  ;;  %v775_v52 = vpack.c.bf16 %v743_v50, %v743_v50  ;;  %v773_v49 = vpack.c.bf16 %v741_v12, %v741_v12 }
 0x1ff   : > { %v8160_v45 = vpop.permute.xlu0 %2985  ;;  %v1906_v51 = vor.u32 %v1905_v61, %v1901_v17  ;;  %v3302_v2 = vshrl.u32 %v5832_v9, 16  ;;  %v8188_v50 = vcombine.low %v8178_v15, %v8176_v53  ;;  %v1910_v0 = vshll.u32 %v5642_v5, 16 }
 0x200   : > { %v8166_v10 = vpop.permute.xlu1 %2959  ;;  %v994_v34 = vshrl.u32 %v775_v52, 16  ;;  %v980_v1 = vshrl.u32 %v773_v49, 16  ;;  %v983_v12 = vshll.u32 %v773_v49, 16  ;;  %v3433_v61 = vor.u32 %v3432_v36, %v3428_v25  ;;  %v1437_v25 = vld [vmem:[#allocation2 + $0xd0] sm:$0xf] }
 0x201   : > { %9612 = vst [vmem:[#allocation56_spill] sm:$0xff] %v8166_v10  ;;  %3509 = vrot.lane.b32.xlu0 %v3321_v44, %s6926_s10  ;;  %v2015_v44 = vshll.u32 %v8148_v42, 16  ;;  %v3306_v10 = vrot.slane %v3304_v14, 1  ;;  %9614 = vst [vmem:[#allocation58_spill] sm:$0xff] %v8188_v50  ;;  %v2013_v17 = vshrl.u32 %v8148_v42, 16  ;;  %v3412_v9 = vor.u32 %v3411_v62, %v3407_v31 }
 0x202   : > { %3503 = vrot.lane.b32.xlu1 %v3300_v48, %s6926_s10  ;;  %v997_v48 = vshll.u32 %v775_v52, 16  ;;  %v996_v59 = vrot.slane %v994_v34, 7  ;;  %v982_v40 = vrot.slane %v980_v1, 7  ;;  %v1908_v50 = vshrl.u32 %v5642_v5, 16 }
 0x203   : > { %v8174_v33 = vpop.permute.xlu0 %3145  ;;  %v3307_v34 = vor.u32 %v3306_v10, %v3302_v2 }
 0x204   : > { %v8181_v23 = vpop.permute.xlu1 %2991  ;;  %v999_v14 = vor.u32 %v997_v48, %v996_v59  ;;  %v985_v49 = vor.u32 %v983_v12, %v982_v40  ;;  %v8207_v48 = vld [vmem:[#allocation2 + $0x104] sm:$0x1]  ;;  %v5658_v12 = vcombine.low %v1437_v25, %v8103_v47  ;;  %v8220_v40 = vld [vmem:[#allocation2 + $0x68] sm:$0xf] }
 0x205   : > { %9613 = vst [vmem:[#allocation57_spill] sm:$0xff] %v8181_v23  ;;  %2461 = vrot.lane.b32.xlu0 %v5710_v21, %s6926_s10  ;;  %v2017_v21 = vrot.slane %v2015_v44, 1  ;;  %v5805_v47 = vcombine.low %v8220_v40, %v8220_v40 }
 0x206   : > { %2099 = vrot.lane.b32.xlu1 %v1906_v51, %s6925_s16  ;;  %v5848_v51 = vcombine.low %v8091_v26, %v7668_v7  ;;  %v1066_v42 = vsel %vm7215_vm6, 0, %v999_v14  ;;  %v1064_v44 = vsel %vm7215_vm6, 0, %v985_v49  ;;  %v8213_v26 = vld [vmem:[#allocation2 + $0x100] sm:$0xf]  ;;  %v1704_v14 = vld [vmem:[#allocation2 + $0x138] sm:$0xe] }
 0x207   : > { %v8190_v23 = vpop.permute.xlu0 %2289  ;;  %v2018_v62 = vor.u32 %v2017_v21, %v2013_v17  ;;  %v1101_v7 = vsel %vm7227_vm7, %v1066_v42, 0  ;;  %9617 = vst [vmem:[#allocation61_spill] sm:$0xff] %v8213_v26  ;;  %v8228_v20 = vcombine.low %v8213_v26, %v8207_v48  ;;  %v1702_v21 = vld [vmem:[#allocation2 + $0x128] sm:$0xe] }
 0x208   : > { %9615 = vst [vmem:[#allocation59_spill] sm:$0xff] %v8190_v23  ;;  %v8193_v52 = vpop.permute.xlu1 %2987  ;;  %v1912_v23 = vrot.slane %v1910_v0, 1  ;;  %v1099_v0 = vsel %vm7227_vm7, %v1064_v44, 0  ;;  %v5634_v10 = vcombine.low %v1101_v7, %v1101_v7  ;;  %v5635_v5 = vcombine.high %v1101_v7, %v1101_v7 }
 0x209   : > { %3541 = vrot.lane.b32.xlu0 %v3433_v61, %s6926_s10  ;;  %v5630_v1 = vcombine.low %v1099_v0, %v1099_v0  ;;  %v5631_v13 = vcombine.high %v1099_v0, %v1099_v0  ;;  %v3416_v2 = vshll.u32 %v5848_v51, 16  ;;  %9618 = vst [vmem:[#allocation62_spill] sm:$0xff] %v8228_v20  ;;  %v3414_v49 = vshrl.u32 %v5848_v51, 16 }
 0x20a   : > { %3535 = vrot.lane.b32.xlu1 %v3412_v9, %s6926_s10  ;;  %v1913_v59 = vor.u32 %v1912_v23, %v1908_v50  ;;  %1411 = vst.msk [vmem:[#allocation2 + $0x130] sm:$0xf] %vm1333_vm0, %v5634_v10  ;;  %v1490_v23 = vld [vmem:[#allocation2 + $0x68] sm:$0xe]  ;;  %v1670_v50 = vld [vmem:[#allocation2 + $0x12c] sm:$0x1]  ;;  %v5708_v44 = vcombine.low %v8012_v28, %v8012_v28  ;;  %v5821_v0 = vcombine.low %v7993_v27, %v7993_v27 }
 0x20b   : > { %v8199_v36 = vpop.permute.xlu0 %2321  ;;  %1412 = vst.msk [vmem:[#allocation2 + $0x134] sm:$0x1] %vm1335_vm1, %v5635_v5  ;;  %1408 = vst.msk [vmem:[#allocation2 + $0x124] sm:$0x1] %vm1335_vm1, %v5631_v13  ;;  %v1672_v9 = vld [vmem:[#allocation2 + $0x13c] sm:$0x1]  ;;  %v5889_v5 = vcombine.low %v1702_v21, %v1670_v50 }
 0x20c   : > { %9616 = vst [vmem:[#allocation60_spill] sm:$0xff] %v8199_v36  ;;  %v8205_v31 = vpop.permute.xlu1 %3499  ;;  %1407 = vst.msk [vmem:[#allocation2 + $0x120] sm:$0xf] %vm1333_vm0, %v5630_v1  ;;  %v3418_v25 = vrot.slane %v3416_v2, 1  ;;  %v5891_v1 = vcombine.low %v1704_v14, %v1672_v9  ;;  %v2020_v51 = vshrl.u32 %v5658_v12, 16 }
 0x20d   : > { %3505 = vrot.lane.b32.xlu0 %v3307_v34, %s6926_s10  ;;  %v2022_v34 = vshll.u32 %v5658_v12, 16  ;;  %v3686_v20 = vrot.slane %v5889_v5, 1  ;;  %v1586_v50 = vld [vmem:[#allocation2 + $0x68] sm:$0xe]  ;;  %v1488_v12 = vld [vmem:[#allocation2 + $0x58] sm:$0xe] }
 0x20e   : > { %2131 = vrot.lane.b32.xlu1 %v2018_v62, %s6925_s16  ;;  %v8240_v62 = vld [vmem:[#allocation2 + $0x6c] sm:$0x1]  ;;  %v3688_v9 = vrot.slane %v5891_v1, 1  ;;  %v8267_v1 = vld [vmem:[#allocation2 + $0x114] sm:$0x1] }
 0x20f   : > { %v8218_v61 = vpop.permute.xlu0 %2955  ;;  %v5679_v10 = vcombine.low %v1490_v23, %v8240_v62  ;;  %v8260_v5 = vld [vmem:[#allocation2 + $0x10c] sm:$0x1] }
 0x210   : > { %v8230_v17 = vpop.permute.xlu1 %2095 }
 0x211   : > { %2101 = vrot.lane.b32.xlu0 %v1913_v59, %s6925_s16  ;;  %v2024_v59 = vrot.slane %v2022_v34, 1  ;;  %v2260_v23 = vrot.slane %v5679_v10, 1 }
 0x212   : > { %3131 = vrot.lane.b32.xlu1 %v5805_v47, %s6924_s13  ;;  %v1669_v13 = vld [vmem:[#allocation2 + $0x124] sm:$0x1]  ;;  %v3419_v47 = vor.u32 %v3418_v25, %v3414_v49  ;;  %v1671_v26 = vld [vmem:[#allocation2 + $0x134] sm:$0x1]  ;;  %v5774_v25 = vcombine.low %v1586_v50, %v7964_v63  ;;  %v1584_v50 = vld [vmem:[#allocation2 + $0x58] sm:$0xe] }
 0x213   : > { %v8236_v42 = vpop.permute.xlu0 %2285  ;;  %v1701_v2 = vld [vmem:[#allocation2 + $0x120] sm:$0xe]  ;;  %v2025_v49 = vor.u32 %v2024_v59, %v2020_v51 }
 0x214   : > { %9619 = vst [vmem:[#allocation63_spill] sm:$0xff] %v8236_v42  ;;  %v8242_v7 = vpop.permute.xlu1 %3531  ;;  %v5888_v36 = vcombine.low %v1701_v2, %v1669_v13  ;;  %v1703_v42 = vld [vmem:[#allocation2 + $0x130] sm:$0xe]  ;;  %v1538_v13 = vld [vmem:[#allocation2 + $0x108] sm:$0xf] }
 0x215   : > { %2457 = vrot.lane.b32.xlu0 %v5708_v44, %s6926_s10  ;;  %v5890_v21 = vcombine.low %v1703_v42, %v1671_v26  ;;  %v5711_v42 = vcombine.low %v8022_v58, %v8022_v58  ;;  %v8274_v63 = vcombine.low %v1538_v13, %v8260_v5  ;;  %v2931_v58 = vrot.slane %v5774_v25, 1 }
 0x216   : > { %3163 = vrot.lane.b32.xlu1 %v5821_v0, %s6924_s13  ;;  %v3685_v14 = vrot.slane %v5888_v36, 1  ;;  %v8258_v0 = vld [vmem:[#allocation2 + $0x5c] sm:$0x1]  ;;  %v2611_v25 = vshll.u32 %v7590_v39, 16  ;;  %v5709_v13 = vcombine.low %v8028_v19, %v8028_v19  ;;  %v1585_v19 = vld [vmem:[#allocation2 + $0x60] sm:$0xe] }
 0x217   : > { %v8249_v28 = vpop.permute.xlu0 %2317  ;;  %v3687_v34 = vrot.slane %v5890_v21, 1  ;;  %v5677_v36 = vcombine.low %v1488_v12, %v8258_v0  ;;  %9622 = vst [vmem:[#allocation66_spill] sm:$0xff] %v8274_v63  ;;  %v1504_v21 = vld [vmem:[#allocation2 + $0xf8] sm:$0xe]  ;;  %v6761_v63 = vld [vmem:[#allocation2 + $0x6c] sm:$0x1] }
 0x218   : > { %9620 = vst [vmem:[#allocation64_spill] sm:$0xff] %v8249_v28  ;;  %v8251_v27 = vpop.permute.xlu1 %2127  ;;  %v5936_v10 = vcombine.low %v3685_v14, %v3686_v20 }
 0x219   : > { %9621 = vst [vmem:[#allocation65_spill] sm:$0xff] %v8251_v27  ;;  %3537 = vrot.lane.b32.xlu0 %v3419_v47, %s6926_s10  ;;  %v5939_v2 = vcombine.low %v3687_v34, %v3688_v9  ;;  %v1539_v47 = vld [vmem:[#allocation2 + $0x110] sm:$0xf]  ;;  %v5772_v34 = vcombine.low %v1584_v50, %v8014_v16  ;;  %v1600_v27 = vld [vmem:[#allocation2 + $0xf8] sm:$0xe] }
 0x21a   : > { %2303 = vrot.lane.b32.xlu1 %v2260_v23, %s6924_s13  ;;  %6355 = vmatprep.mubr.msk.bf16.mxu0 %vm3689_vm8, %v5936_v10  ;;  %v8279_v51 = vcombine.low %v1539_v47, %v8267_v1  ;;  %v2258_v23 = vrot.slane %v5677_v36, 1  ;;  %v8285_v9 = vld [vmem:[#allocation2 + $0x70] sm:$0xf] }
 0x21b   : > { %v8255_v44 = vpop.permute.xlu0 %3501  ;;  %6356 = vmatmul.mubr.msk.bf16.gmra.mrb[44].mxu0 %vm3689_vm8, %v5939_v2  ;;  %v5806_v14 = vcombine.low %v8285_v9, %v8285_v9  ;;  %v1587_v36 = vld [vmem:[#allocation2 + $0x70] sm:$0xe]  ;;  %v2604_v2 = vshll.u32 %v7515_v32, 16  ;;  %v2929_v16 = vrot.slane %v5772_v34, 1  ;;  %v1426_v34 = vld [vmem:[#allocation2 + $0x68] sm:$0xf] }
 0x21c   : > { %v8262_v26 = vpop.permute.xlu1 %2091  ;;  %9623 = vst [vmem:[#allocation67_spill] sm:$0xff] %v8279_v51  ;;  %v5775_v28 = vcombine.low %v1587_v36, %v8024_v3  ;;  %v5788_v3 = vcombine.low %v1600_v27, %v8176_v53  ;;  %v8319_v36 = vld [vmem:[#allocation2 + $0x11c] sm:$0x1]  ;;  %v6762_v53 = vld [vmem:[#allocation2 + $0x8] sm:$0xf] }
 0x21d   : > { %2133 = vrot.lane.b32.xlu0 %v2025_v49, %s6925_s16  ;;  %v8292_v49 = vld [vmem:[#allocation2 + $0xfc] sm:$0x1]  ;;  %v2606_v51 = vrot.slane %v2604_v2, 1  ;;  %9630 = vst [vmem:[#allocation74_spill] sm:$0xff] %v8319_v36  ;;  %v5773_v2 = vcombine.low %v1585_v19, %v8034_v55  ;;  %v3695_v27 = vsel %vm3689_vm8, %v6762_v53, %v8262_v26  ;;  %v1424_v19 = vld [vmem:[#allocation2 + $0x58] sm:$0xf] }
 0x21e   : > { %2463 = vrot.lane.b32.xlu1 %v5711_v42, %s6926_s10  ;;  %v5693_v42 = vcombine.low %v1504_v21, %v8292_v49  ;;  %v2609_v21 = vshrl.u32 %v7590_v39, 16  ;;  %v8322_v39 = vcombine.low %v8220_v40, %v6761_v63  ;;  %v1540_v40 = vld [vmem:[#allocation2 + $0x118] sm:$0xf]  ;;  %v1541_v63 = vld [vmem:[#allocation2 + $0x120] sm:$0xf] }
 0x21f   : > { %v8276_v20 = vpop.permute.xlu0 %2097 }
 0x220   : > { %v8281_v59 = vpop.permute.xlu1 %2123  ;;  %v2274_v50 = vrot.slane %v5693_v42, 1 }
 0x221   : > { %9624 = vst [vmem:[#allocation68_spill] sm:$0xff] %v8281_v59  ;;  %2973 = vrot.lane.b32.xlu0 %v2931_v58, %s6925_s16  ;;  %v2613_v58 = vrot.slane %v2611_v25, 1  ;;  %v2932_v59 = vrot.slane %v5775_v28, 1 }
 0x222   : > { %2299 = vrot.lane.b32.xlu1 %v2258_v23, %s6924_s13 }
 0x223   : > { %v8287_v12 = vpop.permute.xlu0 %2453 }
 0x224   : > { %9625 = vst [vmem:[#allocation69_spill] sm:$0xff] %v8287_v12  ;;  %v8295_v10 = vpop.permute.xlu1 %3123  ;;  %v2602_v12 = vshrl.u32 %v7515_v32, 16  ;;  %v8340_v32 = vcombine.low %v1540_v40, %v8319_v36  ;;  %v1440_v40 = vld [vmem:[#allocation2 + $0xf8] sm:$0xf] }
 0x225   : > { %9626 = vst [vmem:[#allocation70_spill] sm:$0xff] %v8295_v10  ;;  %3133 = vrot.lane.b32.xlu0 %v5806_v14, %s6924_s13  ;;  %v8311_v14 = vld [vmem:[#allocation2 + $0x60] sm:$0xf]  ;;  %v1491_v10 = vld [vmem:[#allocation2 + $0x70] sm:$0xe] }
 0x226   : > { %2459 = vrot.lane.b32.xlu1 %v5709_v13, %s6926_s10  ;;  %v5804_v42 = vcombine.low %v8311_v14, %v8311_v14  ;;  %v1601_v13 = vld [vmem:[#allocation2 + $0x100] sm:$0xe]  ;;  %9632 = vst [vmem:[#allocation76_spill] sm:$0xff] %v8340_v32  ;;  %v1430_v32 = vld [vmem:[#allocation2 + $0x88] sm:$0xf] }
 0x227   : > { %v8303_v47 = vpop.permute.xlu0 %3533  ;;  %v5789_v53 = vcombine.low %v1601_v13, %v8207_v48  ;;  %v8361_v13 = vcombine.low %v1424_v19, %v8258_v0  ;;  %v1427_v19 = vld [vmem:[#allocation2 + $0x70] sm:$0xf] }
 0x228   : > { %9627 = vst [vmem:[#allocation71_spill] sm:$0xff] %v8303_v47  ;;  %v8305_v23 = vpop.permute.xlu1 %3155 }
 0x229   : > { %9628 = vst [vmem:[#allocation72_spill] sm:$0xff] %v8305_v23  ;;  %2969 = vrot.lane.b32.xlu0 %v2929_v16, %s6925_s16  ;;  %v2614_v16 = vor.u32 %v2613_v58, %v2609_v21  ;;  %v8327_v23 = vld [vmem:[#allocation2 + $0x124] sm:$0x1]  ;;  %v6763_v58 = vld [vmem:[#allocation2] sm:$0xf]  ;;  %v2607_v21 = vor.u32 %v2606_v51, %v2602_v12  ;;  %v3339_v51 = vshll.u32 %v8322_v39, 16 }
 0x22a   : > { %2331 = vrot.lane.b32.xlu1 %v2274_v50, %s6924_s13  ;;  %9631 = vst [vmem:[#allocation75_spill] sm:$0xff] %v8327_v23  ;;  %v3692_v28 = vsel %vm3689_vm8, %v6763_v58, %v7871_v35  ;;  %v8346_v47 = vcombine.low %v1541_v63, %v8327_v23  ;;  %v8349_v35 = vcombine.low %v1426_v34, %v8240_v62  ;;  %v8364_v62 = vld [vmem:[#allocation2 + $0x100] sm:$0xf]  ;;  %v2946_v58 = vrot.slane %v5789_v53, 1 }
 0x22b   : > { %v8314_v25 = vpop.permute.xlu0 %2129  ;;  %v3921_v55 = vsel %vm3689_vm8, %v2614_v16, %v8218_v61  ;;  %v3790_v61 = vsel %vm3786_vm9, %v3695_v27, %v8086_v56  ;;  %v2930_v16 = vrot.slane %v5773_v2, 1  ;;  %v3788_v12 = vsel %vm3786_vm9, %v3692_v28, %v7804_v22  ;;  %v1459_v56 = vld [vmem:[#allocation2 + $0x74] sm:$0x1] }
 0x22c   : > { %9629 = vst [vmem:[#allocation73_spill] sm:$0xff] %v8314_v25  ;;  %v8324_v50 = vpop.permute.xlu1 %3119  ;;  %v2723_v25 = vshll.u32 %v7576_v29, 16  ;;  %9634 = vst [vmem:[#allocation78_spill] sm:$0xff] %v8346_v47  ;;  %v4015_v48 = vsel %vm3786_vm9, %v3921_v55, %v7982_v4  ;;  %v3918_v34 = vsel %vm3689_vm8, %v2607_v21, %v8111_v54  ;;  %v5820_v22 = vcombine.low %v8364_v62, %v8364_v62  ;;  %v1489_v21 = vld [vmem:[#allocation2 + $0x60] sm:$0xe] }
 0x22d   : > { %3129 = vrot.lane.b32.xlu0 %v5804_v42, %s6924_s13  ;;  %v2945_v42 = vrot.slane %v5788_v3, 1  ;;  %v6764_v3 = vld [vmem:[#allocation2 + $0x74] sm:$0x1]  ;;  %v5680_v4 = vcombine.low %v1491_v10, %v1459_v56  ;;  %v4013_v0 = vsel %vm3786_vm9, %v3918_v34, %v8131_v37  ;;  %v3855_v27 = vsel %vm3851_vm10, %v3790_v61, %v8100_v30  ;;  %v1457_v34 = vld [vmem:[#allocation2 + $0x64] sm:$0x1] }
 0x22e   : > { %2975 = vrot.lane.b32.xlu1 %v2932_v59, %s6925_s16  ;;  %v8369_v2 = vcombine.low %v8285_v9, %v6764_v3  ;;  %v3337_v54 = vshrl.u32 %v8322_v39, 16  ;;  %v4079_v28 = vsel %vm3851_vm10, %v4015_v48, %v8205_v31  ;;  %v3341_v10 = vrot.slane %v3339_v51, 1  ;;  %v1588_v47 = vld [vmem:[#allocation2 + $0x78] sm:$0xe] }
 0x22f   : > { %v8342_v26 = vpop.permute.xlu0 %2485  ;;  %v1945_v37 = vshll.u32 %v8349_v35, 16  ;;  %v3853_v30 = vsel %vm3851_vm10, %v3788_v12, %v8016_v24  ;;  %v9635_v53 = vshll.u32 %v7537_v60, 16  ;;  %v2721_v31 = vshrl.u32 %v7576_v29, 16 }
 0x230   : > { %9633 = vst [vmem:[#allocation77_spill] sm:$0xff] %v8342_v26  ;;  %v8353_v59 = vpop.permute.xlu1 %3151  ;;  %v5892_v48 = vcombine.low %v3853_v30, %v3855_v27  ;;  %v5661_v51 = vcombine.low %v1440_v40, %v8292_v49  ;;  %v5648_v24 = vcombine.low %v1427_v19, %v1459_v56  ;;  %v2261_v12 = vrot.slane %v5680_v4, 1  ;;  %v6765_v30 = vld [vmem:[#allocation2 + $0x64] sm:$0x1] }
 0x231   : > { %3001 = vrot.lane.b32.xlu0 %v2945_v42, %s6925_s16  ;;  %v2714_v42 = vshrl.u32 %v7537_v60, 16  ;;  %v2718_v39 = vrot.slane %v9635_v53, 1  ;;  %v3346_v60 = vshll.u32 %v8369_v2, 16  ;;  %v1943_v29 = vshrl.u32 %v8349_v35, 16 }
 0x232   : > { %2971 = vrot.lane.b32.xlu1 %v2930_v16, %s6925_s16  ;;  %v2725_v16 = vrot.slane %v2723_v25, 1  ;;  %v1947_v25 = vrot.slane %v1945_v37, 1  ;;  %v1931_v49 = vshll.u32 %v8361_v13, 16  ;;  %v3344_v56 = vshrl.u32 %v8369_v2, 16 }
 0x233   : > { %v3498_v63 = vpop.permute.xlu0 %3497  ;;  %v2719_v27 = vor.u32 %v2718_v39, %v2714_v42  ;;  %v2043_v37 = vshll.u32 %v5661_v51, 16  ;;  %v5836_v42 = vcombine.low %v8311_v14, %v6765_v30  ;;  %v2041_v53 = vshrl.u32 %v5661_v51, 16 }
 0x234   : > { %v4077_v9 = vsel %vm3851_vm10, %v4013_v0, %v3498_v63  ;;  %v8382_v55 = vpop.permute.xlu1 %2295  ;;  %v5678_v0 = vcombine.low %v1489_v21, %v1457_v34  ;;  %v2726_v40 = vor.u32 %v2725_v16, %v2721_v31  ;;  %v1933_v21 = vrot.slane %v1931_v49, 1  ;;  %v8439_v49 = vld [vmem:[#allocation2 + $0x134] sm:$0x1] }
 0x235   : > { %v5893_v61 = vcombine.low %v4077_v9, %v4079_v28  ;;  %3161 = vrot.lane.b32.xlu0 %v5820_v22, %s6924_s13  ;;  %v3342_v22 = vor.u32 %v3341_v10, %v3337_v54  ;;  %v3348_v9 = vrot.slane %v3346_v60, 1  ;;  %v1929_v28 = vshrl.u32 %v8361_v13, 16  ;;  %9643 = vst [vmem:[#allocation86_spill] sm:$0xff] %v8439_v49 }
 0x236   : > { %3003 = vrot.lane.b32.xlu1 %v2946_v58, %s6925_s16  ;;  %v2259_v58 = vrot.slane %v5678_v0, 1  ;;  %v1952_v54 = vshll.u32 %v5648_v24, 16  ;;  %v3969_v35 = vsel %vm3689_vm8, %v2726_v40, %v8193_v52  ;;  %v1948_v10 = vor.u32 %v1947_v25, %v1943_v29  ;;  %v1543_v40 = vld [vmem:[#allocation2 + $0x130] sm:$0xf] }
 0x237   : > { %v8394_v3 = vpop.permute.xlu0 %2093  ;;  %4604 = vmatprep.mubr.bf16.mxu1 %v5893_v61  ;;  %v3966_v2 = vsel %vm3689_vm8, %v2719_v27, %v8160_v45  ;;  %v1950_v13 = vshrl.u32 %v5648_v24, 16  ;;  %v4047_v39 = vsel %vm3786_vm9, %v3969_v35, %v7996_v11  ;;  %v3349_v31 = vor.u32 %v3348_v9, %v3344_v56  ;;  %v1425_v45 = vld [vmem:[#allocation2 + $0x60] sm:$0xf]  ;;  %v1542_v27 = vld [vmem:[#allocation2 + $0x128] sm:$0xf] }
 0x238   : > { %v8397_v63 = vpop.permute.xlu1 %2455  ;;  %4605 = vmatmul.mubr.bf16.vlgmr.msra.gmra.mrb[16].mxu1 %v5892_v48  ;;  %v4045_v52 = vsel %vm3786_vm9, %v3966_v2, %v8174_v33  ;;  %v1954_v16 = vrot.slane %v1952_v54, 1  ;;  %v8422_v48 = vsel %vm3851_vm10, %v4047_v39, %v8242_v7  ;;  %v1934_v51 = vor.u32 %v1933_v21, %v1929_v28  ;;  %v8454_v54 = vld [vmem:[#allocation2 + $0x88] sm:$0xf] }
 0x239   : > { %9636 = vst [vmem:[#allocation79_spill] sm:$0xff] %v8397_v63  ;;  %2305 = vrot.lane.b32.xlu0 %v2261_v12, %s6924_s13  ;;  %9638 = vst [vmem:[#allocation81_spill] sm:$0xff] %v8422_v48  ;;  %v2045_v24 = vrot.slane %v2043_v37, 1  ;;  %v5646_v11 = vcombine.low %v1425_v45, %v1457_v34  ;;  %v3332_v60 = vshll.u32 %v5836_v42, 16  ;;  %v5714_v34 = vcombine.low %v8107_v41, %v8107_v41  ;;  %v8475_v45 = vld [vmem:[#allocation2 + $0x8c] sm:$0x1] }
 0x23a   : > { %3515 = vrot.lane.b32.xlu1 %v3342_v22, %s6926_s10  ;;  %v1955_v7 = vor.u32 %v1954_v16, %v1950_v13  ;;  %v8435_v22 = vld [vmem:[#allocation2 + $0x12c] sm:$0x1]  ;;  %v3330_v35 = vshrl.u32 %v5836_v42, 16  ;;  %v8457_v37 = vcombine.low %v1543_v40, %v8439_v49  ;;  %v5809_v41 = vcombine.low %v8454_v54, %v8454_v54  ;;  %v9674_v48 = vld [vmem:[#allocation18_spill] sm:$0xff] }
 0x23b   : > { %v8404_v4 = vpop.permute.xlu0 %2449  ;;  %9642 = vst [vmem:[#allocation85_spill] sm:$0xff] %v8435_v22  ;;  %v2046_v25 = vor.u32 %v2045_v24, %v2041_v53  ;;  %v1938_v21 = vshll.u32 %v5646_v11, 16  ;;  %v1494_v53 = vld [vmem:[#allocation2 + $0x88] sm:$0xe]  ;;  %v5852_v42 = vcombine.low %v8364_v62, %v7988_v43  ;;  %v6768_v49 = vld [vmem:[#allocation2 + $0x94] sm:$0x1] }
 0x23c   : > { %v8409_v19 = vpop.permute.xlu1 %2327  ;;  %9648 = vst [vmem:[#allocation91_spill] sm:$0xff] %v8457_v37 }
 0x23d   : > { %9637 = vst [vmem:[#allocation80_spill] sm:$0xff] %v8409_v19  ;;  %2301 = vrot.lane.b32.xlu0 %v2259_v58, %s6924_s13  ;;  %v8448_v58 = vcombine.low %v1542_v27, %v8435_v22  ;;  %v1940_v16 = vrot.slane %v1938_v21, 1 }
 0x23e   : > { %2111 = vrot.lane.b32.xlu1 %v1948_v10, %s6925_s16  ;;  %v3334_v10 = vrot.slane %v3332_v60, 1 }
 0x23f   : > { %v3530_v61 = vpop.permute.xlu0 %3529  ;;  %9645 = vst [vmem:[#allocation88_spill] sm:$0xff] %v8448_v58 }
 0x240   : > { %v8425_v14 = vsel %vm3851_vm10, %v4045_v52, %v3530_v61  ;;  %v8427_v12 = vpop.permute.xlu1 %2487  ;;  %v3335_v39 = vor.u32 %v3334_v10, %v3330_v35  ;;  %v8473_v61 = vld [vmem:[#allocation2 + $0x78] sm:$0xf] }
 0x241   : > { %9639 = vst [vmem:[#allocation82_spill] sm:$0xff] %v8425_v14  ;;  %9640 = vst [vmem:[#allocation83_spill] sm:$0xff] %v8427_v12  ;;  %3517 = vrot.lane.b32.xlu0 %v3349_v31, %s6926_s10  ;;  %v1936_v31 = vshrl.u32 %v5646_v11, 16  ;;  %v5807_v24 = vcombine.low %v8473_v61, %v8473_v61  ;;  %v3444_v11 = vshll.u32 %v5852_v42, 16  ;;  %v1492_v35 = vld [vmem:[#allocation2 + $0x78] sm:$0xe] }
 0x242   : > { %2107 = vrot.lane.b32.xlu1 %v1934_v51, %s6925_s16  ;;  %v6766_v12 = vld [vmem:[#allocation2 + $0x8c] sm:$0x1] }
 0x243   : > { %v8433_v0 = vpop.permute.xlu0 %2125  ;;  %v1941_v60 = vor.u32 %v1940_v16, %v1936_v31  ;;  %v8502_v31 = vld [vmem:[#allocation2 + $0x7c] sm:$0x1]  ;;  %v8537_v26 = vcombine.low %v8454_v54, %v6766_v12  ;;  %v1623_v54 = vld [vmem:[#allocation2 + $0x90] sm:$0xf] }
 0x244   : > { %9641 = vst [vmem:[#allocation84_spill] sm:$0xff] %v8433_v0  ;;  %v8437_v29 = vpop.permute.xlu1 %2291 }
 0x245   : > { %2113 = vrot.lane.b32.xlu0 %v1955_v7, %s6925_s16  ;;  %v5683_v7 = vcombine.low %v1494_v53, %v8475_v45  ;;  %v3442_v53 = vshrl.u32 %v5852_v42, 16 }
 0x246   : > { %v8442_v56 = vpop.f32.mrb[16].mxu0  ;;  %2139 = vrot.lane.b32.xlu1 %v2046_v25, %s6925_s16 }
 0x247   : > { %9644 = vst [vmem:[#allocation87_spill] sm:$0xff] %v8442_v56  ;;  %v8450_v9 = vpop.f32.mrb[17].mxu0  ;;  %v8452_v28 = vpop.permute.xlu0 %2481  ;;  %v2264_v40 = vrot.slane %v5683_v7, 1  ;;  %v5681_v7 = vcombine.low %v1492_v35, %v8502_v31  ;;  %v9660_v35 = vld [vmem:[#allocation9_spill] sm:$0xff] }
 0x248   : > { %9646 = vst [vmem:[#allocation89_spill] sm:$0xff] %v8450_v9  ;;  %9647 = vst [vmem:[#allocation90_spill] sm:$0xff] %v8452_v28  ;;  %v8459_v2 = vpop.f32.mrb[18].mxu0  ;;  %v8461_v30 = vpop.permute.xlu1 %2451 }
 0x249   : > { %9649 = vst [vmem:[#allocation92_spill] sm:$0xff] %v8459_v2  ;;  %v8465_v13 = vpop.f32.mrb[19].mxu0  ;;  %2469 = vrot.lane.b32.xlu0 %v5714_v34, %s6926_s10  ;;  %v9663_v2 = vld [vmem:[#allocation11_spill] sm:$0xff] }
 0x24a   : > { %9650 = vst [vmem:[#allocation93_spill] sm:$0xff] %v8465_v13  ;;  %3139 = vrot.lane.b32.xlu1 %v5809_v41, %s6924_s13  ;;  %v5712_v41 = vcombine.low %v8127_v46, %v8127_v46 }
 0x24b   : > { %v8471_v52 = vpop.permute.xlu0 %2965 }
 0x24c   : > { %v8477_v51 = vpop.permute.xlu1 %2323 }
 0x24d   : > { %9651 = vst [vmem:[#allocation94_spill] sm:$0xff] %v8477_v51  ;;  %3513 = vrot.lane.b32.xlu0 %v3335_v39, %s6926_s10  ;;  %v3446_v39 = vrot.slane %v3444_v11, 1 }
 0x24e   : > { %3135 = vrot.lane.b32.xlu1 %v5807_v24, %s6924_s13  ;;  %v8484_v43 = vpop.f32.mrb[20].mxu0  ;;  %v5715_v24 = vcombine.low %v8118_v8, %v8118_v8 }
 0x24f   : > { %9652 = vst [vmem:[#allocation95_spill] sm:$0xff] %v8484_v43  ;;  %v8486_v62 = vpop.permute.xlu0 %3125  ;;  %v8488_v25 = vpop.f32.mrb[21].mxu0  ;;  %v3447_v46 = vor.u32 %v3446_v39, %v3442_v53  ;;  %v2262_v43 = vrot.slane %v5681_v7, 1  ;;  %v2625_v53 = vshll.u32 %v9663_v2, 16  ;;  %v9664_v39 = vld [vmem:[#allocation12_spill] sm:$0xff]  ;;  %v9666_v7 = vld [vmem:[#allocation14_spill] sm:$0xff] }
 0x250   : > { %9653 = vst [vmem:[#allocation96_spill] sm:$0xff] %v8488_v25  ;;  %v8490_v27 = vpop.permute.xlu1 %2483  ;;  %v8492_v34 = vpop.f32.mrb[22].mxu0 }
 0x251   : > { %9654 = vst [vmem:[#allocation97_spill] sm:$0xff] %v8490_v27  ;;  %9655 = vst [vmem:[#allocation98_spill] sm:$0xff] %v8492_v34  ;;  %2109 = vrot.lane.b32.xlu0 %v1941_v60, %s6925_s16  ;;  %v8495_v10 = vpop.f32.mrb[23].mxu0  ;;  %v1590_v60 = vld [vmem:[#allocation2 + $0x88] sm:$0xe]  ;;  %v2627_v9 = vrot.slane %v2625_v53, 1 }
 0x252   : > { %9656 = vst [vmem:[#allocation99_spill] sm:$0xff] %v8495_v10  ;;  %2311 = vrot.lane.b32.xlu1 %v2264_v40, %s6924_s13  ;;  %v5778_v42 = vcombine.low %v1590_v60, %v8109_v38  ;;  %v2618_v10 = vshll.u32 %v9660_v35, 16  ;;  %v2737_v38 = vshll.u32 %v9664_v39, 16  ;;  %v9665_v60 = vld [vmem:[#allocation13_spill] sm:$0xff] }
 0x253   : > { %v8498_v21 = vpop.permute.xlu0 %2997 }
 0x254   : > { %v8504_v16 = vpop.permute.xlu1 %2967  ;;  %v2620_v56 = vrot.slane %v2618_v10, 1  ;;  %v2739_v28 = vrot.slane %v2737_v38, 1  ;;  %v5810_v10 = vcombine.low %v1623_v54, %v1623_v54 }
 0x255   : > { %2465 = vrot.lane.b32.xlu0 %v5712_v41, %s6926_s10 }
 0x256   : > { %2471 = vrot.lane.b32.xlu1 %v5715_v24, %s6926_s10  ;;  %v8511_v40 = vpop.f32.mrb[24].mxu0  ;;  %v1591_v24 = vld [vmem:[#allocation2 + $0x90] sm:$0xe] }
 0x257   : > { %9657 = vst [vmem:[#allocation100_spill] sm:$0xff] %v8511_v40  ;;  %v8513_v33 = vpop.permute.xlu0 %3157  ;;  %v8516_v11 = vpop.f32.mrb[25].mxu0  ;;  %v9662_v40 = vld [vmem:[#allocation10_spill] sm:$0xff]  ;;  %v5779_v13 = vcombine.low %v1591_v24, %v8124_v57  ;;  %v2735_v57 = vshrl.u32 %v9664_v39, 16  ;;  %v9673_v39 = vld [vmem:[#allocation17_spill] sm:$0xff] }
 0x258   : > { %9658 = vst [vmem:[#allocation101_spill] sm:$0xff] %v8516_v11  ;;  %v8518_v34 = vpop.permute.xlu1 %2999  ;;  %v8520_v8 = vpop.f32.mrb[26].mxu0  ;;  %v2730_v25 = vshll.u32 %v9662_v40, 16  ;;  %v2646_v11 = vshll.u32 %v9665_v60, 16  ;;  %v2728_v37 = vshrl.u32 %v9662_v40, 16  ;;  %v2765_v51 = vshll.u32 %v9673_v39, 16 }
 0x259   : > { %9659 = vst [vmem:[#allocation102_spill] sm:$0xff] %v8520_v8  ;;  %3545 = vrot.lane.b32.xlu0 %v3447_v46, %s6926_s10  ;;  %v8524_v41 = vpop.f32.mrb[27].mxu0  ;;  %v9667_v8 = vld [vmem:[#allocation16_spill] sm:$0xff]  ;;  %v2935_v46 = vrot.slane %v5778_v42, 1  ;;  %v2936_v38 = vrot.slane %v5779_v13, 1  ;;  %v2763_v22 = vshrl.u32 %v9673_v39, 16 }
 0x25a   : > { %9661 = vst [vmem:[#allocation9_spill] sm:$0xff] %v8524_v41  ;;  %2307 = vrot.lane.b32.xlu1 %v2262_v43, %s6924_s13  ;;  %v2616_v41 = vshrl.u32 %v9660_v35, 16  ;;  %v5713_v43 = vcombine.low %v8133_v18, %v8133_v18  ;;  %v1589_v42 = vld [vmem:[#allocation2 + $0x80] sm:$0xe]  ;;  %v2732_v35 = vrot.slane %v2730_v25, 1  ;;  %v2623_v18 = vshrl.u32 %v9663_v2, 16 }
 0x25b   : > { %v8533_v58 = vpop.permute.xlu0 %2961  ;;  %v8557_v25 = vcombine.low %v1430_v32, %v8475_v45  ;;  %v3367_v2 = vshll.u32 %v8537_v26, 16 }
 0x25c   : > { %v8539_v19 = vpop.permute.xlu1 %2963  ;;  %v2621_v0 = vor.u32 %v2620_v56, %v2616_v41  ;;  %v2733_v13 = vor.u32 %v2732_v35, %v2728_v37  ;;  %v8572_v45 = vor.u32 %v2627_v9, %v2623_v18  ;;  %v6767_v41 = vld [vmem:[#allocation2 + $0x7c] sm:$0x1]  ;;  %v3365_v35 = vshrl.u32 %v8537_v26, 16 }
 0x25d   : > { %2981 = vrot.lane.b32.xlu0 %v2935_v46, %s6925_s16  ;;  %v5776_v46 = vcombine.low %v1588_v47, %v8135_v6  ;;  %v9677_v47 = vld [vmem:[#allocation21_spill] sm:$0xff]  ;;  %v3369_v18 = vrot.slane %v3367_v2, 1  ;;  %v2651_v26 = vshrl.u32 %v9667_v8, 16  ;;  %v9682_v2 = vshll.u32 %v9667_v8, 16 }
 0x25e   : > { %2467 = vrot.lane.b32.xlu1 %v5713_v43, %s6926_s10  ;;  %v8547_v12 = vpop.f32.mrb[28].mxu0  ;;  %v1971_v23 = vshrl.u32 %v8557_v25, 16 }
 0x25f   : > { %9668 = vst [vmem:[#allocation10_spill] sm:$0xff] %v8547_v12  ;;  %v8551_v24 = vpop.permute.xlu0 %3121  ;;  %v8553_v40 = vpop.f32.mrb[29].mxu0  ;;  %v9672_v12 = vld [vmem:[#allocation51_spill] sm:$0xff]  ;;  %v2933_v32 = vrot.slane %v5776_v46, 1  ;;  %v1461_v46 = vld [vmem:[#allocation2 + $0x84] sm:$0x1]  ;;  %v3370_v39 = vor.u32 %v3369_v18, %v3365_v35 }
 0x260   : > { %9669 = vst [vmem:[#allocation11_spill] sm:$0xff] %v8553_v40  ;;  %v8559_v53 = vpop.permute.xlu1 %2995  ;;  %v8561_v43 = vpop.f32.mrb[30].mxu0  ;;  %v5777_v27 = vcombine.low %v1589_v42, %v9672_v12  ;;  %v9675_v40 = vld [vmem:[#allocation19_spill] sm:$0xff]  ;;  %v8580_v12 = vcombine.low %v8473_v61, %v6767_v41 }
 0x261   : > { %9670 = vst [vmem:[#allocation12_spill] sm:$0xff] %v8559_v53  ;;  %9671 = vst [vmem:[#allocation13_spill] sm:$0xff] %v8561_v43  ;;  %3141 = vrot.lane.b32.xlu0 %v5810_v10, %s6924_s13  ;;  %v8569_v6 = vpop.f32.mrb[31].mxu0  ;;  %v8574_v43 = vor.u32 %v2739_v28, %v2735_v57  ;;  %v9678_v42 = vld [vmem:[#allocation43_spill] sm:$0xff]  ;;  %v8582_v10 = vcombine.low %v1623_v54, %v6768_v49  ;;  %v1621_v28 = vld [vmem:[#allocation2 + $0x80] sm:$0xf] }
 0x262   : > { %9676 = vst [vmem:[#allocation14_spill] sm:$0xff] %v8569_v6  ;;  %2983 = vrot.lane.b32.xlu1 %v2936_v38, %s6925_s16  ;;  %v3924_v56 = vsel %vm3689_vm8, %v2621_v0, %v9678_v42  ;;  %v2934_v9 = vrot.slane %v5777_v27, 1  ;;  %v1493_v57 = vld [vmem:[#allocation2 + $0x80] sm:$0xe]  ;;  %v1973_v0 = vshll.u32 %v8557_v25, 16  ;;  %v9680_v38 = vld [vmem:[#allocation45_spill] sm:$0xff] }
 0x263   : > { %v8584_v14 = vpop.permute.xlu0 %2993  ;;  %v8592_v61 = vsel %vm3786_vm9, %v3924_v56, %v9680_v38  ;;  %v2644_v49 = vshrl.u32 %v9665_v60, 16  ;;  %v2648_v54 = vrot.slane %v2646_v11, 1  ;;  %v2756_v42 = vshrl.u32 %v9666_v7, 16  ;;  %v8606_v60 = vld [vmem:[#allocation2 + $0x78] sm:$0xf]  ;;  %v9689_v25 = vld [vmem:[#allocation36_spill] sm:$0xff] }
 0x264   : > { %9679 = vst [vmem:[#allocation16_spill] sm:$0xff] %v8584_v14  ;;  %v8586_v37 = vpop.permute.xlu1 %3507  ;;  %v9681_v27 = vshll.u32 %v9666_v7, 16  ;;  %v2655_v6 = vrot.slane %v9682_v2, 1  ;;  %v2767_v11 = vrot.slane %v2765_v51, 1  ;;  %v5808_v7 = vcombine.low %v1621_v28, %v1621_v28  ;;  %v9690_v53 = vld [vmem:[#allocation48_spill] sm:$0xff] }
 0x265   : > { %2977 = vrot.lane.b32.xlu0 %v2933_v32, %s6925_s16  ;;  %v1975_v2 = vrot.slane %v1973_v0, 1  ;;  %v3374_v51 = vshll.u32 %v8582_v10, 16 }
 0x266   : > { %v2760_v41 = vrot.slane %v9681_v27, 1  ;;  %v8603_v56 = vpop.f32.mrb[32].mxu0  ;;  %2979 = vrot.lane.b32.xlu1 %v2934_v9, %s6925_s16  ;;  %v5682_v27 = vcombine.low %v1493_v57, %v1461_v46  ;;  %v9687_v9 = vld [vmem:[#allocation47_spill] sm:$0xff]  ;;  %v2656_v0 = vor.u32 %v2655_v6, %v2651_v26  ;;  %v9692_v26 = vshll.u32 %v9674_v48, 16 }
 0x267   : > { %9683 = vst [vmem:[#allocation51_spill] sm:$0xff] %v8603_v56  ;;  %v8608_v38 = vpop.f32.mrb[33].mxu0  ;;  %v8610_v32 = vpop.permute.xlu0 %3153  ;;  %v3353_v56 = vshll.u32 %v8580_v12, 16  ;;  %v3972_v14 = vsel %vm3689_vm8, %v2733_v13, %v9687_v9  ;;  %v8635_v13 = vcombine.low %v8606_v60, %v8502_v31  ;;  %v1976_v6 = vor.u32 %v1975_v2, %v1971_v23  ;;  %v6770_v9 = vld [vmem:[#allocation2 + $0x10] sm:$0xf]  ;;  %v9693_v2 = vld [vmem:[#allocation56_spill] sm:$0xff] }
 0x268   : > { %9684 = vst [vmem:[#allocation17_spill] sm:$0xff] %v8608_v38  ;;  %9685 = vst [vmem:[#allocation18_spill] sm:$0xff] %v8610_v32  ;;  %v8613_v36 = vpop.f32.mrb[34].mxu0  ;;  %v8615_v8 = vpop.permute.xlu1 %2103  ;;  %v2649_v38 = vor.u32 %v2648_v54, %v2644_v49  ;;  %v6769_v32 = vld [vmem:[#allocation2 + $0x84] sm:$0x1]  ;;  %v8629_v35 = vsel %vm3786_vm9, %v3972_v14, %v9690_v53  ;;  %v8631_v18 = vor.u32 %v2760_v41, %v2756_v42  ;;  %v3351_v14 = vshrl.u32 %v8580_v12, 16 }
 0x269   : > { %9686 = vst [vmem:[#allocation19_spill] sm:$0xff] %v8613_v36  ;;  %v8621_v63 = vpop.f32.mrb[35].mxu0  ;;  %v8623_v57 = vcombine.low %v1621_v28, %v6769_v32  ;;  %3137 = vrot.lane.b32.xlu0 %v5808_v7, %s6924_s13  ;;  %v3451_v36 = vshll.u32 %v9689_v25, 16  ;;  %v8638_v49 = vor.u32 %v2767_v11, %v2763_v22  ;;  %v8643_v32 = vld [vmem:[#allocation2 + $0x80] sm:$0xf]  ;;  %v2263_v7 = vrot.slane %v5682_v27, 1 }
 0x26a   : > { %9688 = vst [vmem:[#allocation21_spill] sm:$0xff] %v8621_v63  ;;  %3523 = vrot.lane.b32.xlu1 %v3370_v39, %s6926_s10  ;;  %9691 = vst [vmem:[#allocation43_spill] sm:$0xff] %v8643_v32  ;;  %v3355_v42 = vrot.slane %v3353_v56, 1  ;;  %v3372_v31 = vshrl.u32 %v8582_v10, 16  ;;  %v3376_v41 = vrot.slane %v3374_v51, 1  ;;  %v8651_v22 = vrot.slane %v9692_v26, 1 }
 0x26b   : > { %v8641_v54 = vpop.permute.xlu0 %2293  ;;  %v3449_v11 = vshrl.u32 %v9689_v25, 16  ;;  %v3453_v39 = vrot.slane %v3451_v36, 1  ;;  %v3360_v27 = vshll.u32 %v8623_v57, 16  ;;  %v3698_v12 = vsel %vm3689_vm8, %v6770_v9, %v8394_v3  ;;  %v9697_v28 = vld [vmem:[#allocation15_spill] sm:$0xff] }
 0x26c   : > { %v8646_v53 = vpop.permute.xlu1 %3539  ;;  %v3939_v23 = vsel %vm3689_vm8, %v2656_v0, %v8504_v16  ;;  %v2637_v10 = vshrl.u32 %v9675_v40, 16  ;;  %v8662_v56 = vcombine.low %v8643_v32, %v1461_v46  ;;  %v3927_v36 = vsel %vm3689_vm8, %v8572_v45, %v9693_v2  ;;  %v8675_v0 = vld [vmem:[#allocation2 + $0x108] sm:$0xe]  ;;  %v6771_v46 = vld [vmem:[#allocation2 + $0x18] sm:$0xf] }
 0x26d   : > { %2309 = vrot.lane.b32.xlu0 %v2263_v7, %s6924_s13  ;;  %v9694_v51 = vshll.u32 %v9675_v40, 16  ;;  %v5724_v3 = vcombine.low %v8178_v15, %v8178_v15  ;;  %v1959_v16 = vshll.u32 %v8635_v13, 16  ;;  %v3356_v9 = vor.u32 %v3355_v42, %v3351_v14  ;;  %v9696_v2 = vld [vmem:[#allocation63_spill] sm:$0xff]  ;;  %v1603_v42 = vld [vmem:[#allocation2 + $0x110] sm:$0xe] }
 0x26e   : > { %2119 = vrot.lane.b32.xlu1 %v1976_v6, %s6925_s16  ;;  %v3701_v6 = vsel %vm3689_vm8, %v6771_v46, %v8230_v17  ;;  %v3377_v45 = vor.u32 %v3376_v41, %v3372_v31  ;;  %v3358_v40 = vshrl.u32 %v8623_v57, 16  ;;  %v4027_v15 = vsel %vm3786_vm9, %v3939_v23, %v9697_v28  ;;  %v9698_v31 = vld [vmem:[#allocation37_spill] sm:$0xff] }
 0x26f   : > { %v2641_v25 = vrot.slane %v9694_v51, 1  ;;  %v8670_v7 = vpop.permute.xlu0 %2325  ;;  %v3792_v51 = vsel %vm3786_vm9, %v3698_v12, %v9696_v2  ;;  %v3454_v63 = vor.u32 %v3453_v39, %v3449_v11  ;;  %v3936_v32 = vsel %vm3689_vm8, %v2649_v38, %v8471_v52  ;;  %v1441_v38 = vld [vmem:[#allocation2 + $0x100] sm:$0xf]  ;;  %v9701_v2 = vld [vmem:[#allocation41_spill] sm:$0xff] }
 0x270   : > { %9695 = vst [vmem:[#allocation45_spill] sm:$0xff] %v8670_v7  ;;  %v8679_v26 = vpop.permute.xlu1 %2135  ;;  %v3362_v7 = vrot.slane %v3360_v27, 1  ;;  %v1957_v17 = vshrl.u32 %v8635_v13, 16  ;;  %v5790_v57 = vcombine.low %v8675_v0, %v8260_v5  ;;  %v1966_v14 = vshll.u32 %v8662_v56, 16  ;;  %v9699_v5 = vld [vmem:[#allocation24_spill] sm:$0xff] }
 0x271   : > { %2489 = vrot.lane.b32.xlu0 %v5724_v3, %s6926_s10  ;;  %v3794_v28 = vsel %vm3786_vm9, %v3701_v6, %v9698_v31  ;;  %v4025_v41 = vsel %vm3786_vm9, %v3936_v32, %v8486_v62  ;;  %v1961_v39 = vrot.slane %v1959_v16, 1  ;;  %v1964_v52 = vshrl.u32 %v8662_v56, 16  ;;  %v9700_v3 = vld [vmem:[#allocation34_spill] sm:$0xff]  ;;  %v8710_v62 = vld [vmem:[#allocation2 + $0x104] sm:$0x1] }
 0x272   : > { %3519 = vrot.lane.b32.xlu1 %v3356_v9, %s6926_s10  ;;  %v4019_v13 = vsel %vm3786_vm9, %v3927_v36, %v8324_v50  ;;  %v8706_v12 = vsel %vm3851_vm10, %v4027_v15, %v9699_v5  ;;  %v3857_v0 = vsel %vm3851_vm10, %v3792_v51, %v9700_v3  ;;  %v1442_v32 = vld [vmem:[#allocation2 + $0x108] sm:$0xf]  ;;  %v8712_v16 = vld [vmem:[#allocation2 + $0x10c] sm:$0x1]  ;;  %v4081_v50 = vsel %vm3851_vm10, %v8592_v61, %v8255_v44 }
 0x273   : > { %v3510_v11 = vpop.permute.xlu0 %3509  ;;  %v5791_v46 = vcombine.low %v1603_v42, %v8267_v1  ;;  %v3987_v6 = vsel %vm3689_vm8, %v8638_v49, %v8518_v34  ;;  %v3859_v51 = vsel %vm3851_vm10, %v3794_v28, %v9701_v2  ;;  %v1968_v44 = vrot.slane %v1966_v14, 1  ;;  %v9703_v34 = vld [vmem:[#allocation57_spill] sm:$0xff] }
 0x274   : > { %v8702_v27 = vsel %vm3851_vm10, %v4025_v41, %v3510_v11  ;;  %v3504_v23 = vpop.permute.xlu1 %3503  ;;  %v5895_v15 = vcombine.low %v3857_v0, %v3859_v51  ;;  %v3363_v31 = vor.u32 %v3362_v7, %v3358_v40  ;;  %v8731_v41 = vcombine.low %v1441_v38, %v8710_v62  ;;  %v9705_v11 = vld [vmem:[#allocation22_spill] sm:$0xff]  ;;  %v9710_v51 = vld [vmem:[#allocation71_spill] sm:$0xff] }
 0x275   : > { %v5902_v56 = vcombine.low %v8702_v27, %v8706_v12  ;;  %v4083_v36 = vsel %vm3851_vm10, %v4019_v13, %v3504_v23  ;;  %3525 = vrot.lane.b32.xlu0 %v3377_v45, %s6926_s10  ;;  %v8734_v1 = vcombine.low %v1442_v32, %v8712_v16  ;;  %v9704_v49 = vshrl.u32 %v9674_v48, 16  ;;  %v9706_v13 = vld [vmem:[#allocation29_spill] sm:$0xff] }
 0x276   : > { %v5896_v9 = vcombine.low %v4081_v50, %v4083_v36  ;;  %3547 = vrot.lane.b32.xlu1 %v3454_v63, %s6926_s10  ;;  %v3975_v63 = vsel %vm3689_vm8, %v8574_v43, %v9703_v34  ;;  %v2642_v42 = vor.u32 %v2641_v25, %v2637_v10  ;;  %v1962_v7 = vor.u32 %v1961_v39, %v1957_v17  ;;  %v6772_v23 = vld [vmem:[#allocation2 + $0x28] sm:$0xf] }
 0x277   : > { %v8728_v61 = vpop.permute.xlu0 %2461  ;;  %v8736_v45 = vpop.f32.mrb[36].mxu0  ;;  %v2635_v14 = vor.u32 %v8651_v22, %v9704_v49  ;;  %v2744_v38 = vshll.u32 %v9705_v11, 16  ;;  %v4059_v5 = vsel %vm3786_vm9, %v3987_v6, %v9706_v13  ;;  %v9707_v48 = vld [vmem:[#allocation61_spill] sm:$0xff]  ;;  %v3984_v10 = vsel %vm3689_vm8, %v8631_v18, %v8498_v21 }
 0x278   : > { %9702 = vst [vmem:[#allocation47_spill] sm:$0xff] %v8736_v45  ;;  %4612 = vmatprep.mubr.bf16.mxu1 %v5896_v9  ;;  %v2100_v28 = vpop.permute.xlu1 %2099  ;;  %v8744_v40 = vpop.f32.mrb[37].mxu0  ;;  %v5725_v43 = vcombine.low %v9707_v48, %v9707_v48  ;;  %v2947_v25 = vrot.slane %v5790_v57, 1  ;;  %v1969_v17 = vor.u32 %v1968_v44, %v1964_v52  ;;  %v2948_v39 = vrot.slane %v5791_v46, 1  ;;  %v9709_v52 = vld [vmem:[#allocation31_spill] sm:$0xff] }
 0x279   : > { %v3707_v3 = vsel %vm3689_vm8, %v6772_v23, %v2100_v28  ;;  %4613 = vmatmul.mubr.bf16.gmra.mrb[20].mxu1 %v5895_v15  ;;  %3521 = vrot.lane.b32.xlu0 %v3363_v31, %s6926_s10  ;;  %v8753_v22 = vpop.f32.mrb[38].mxu0  ;;  %v4051_v32 = vsel %vm3786_vm9, %v3975_v63, %v8353_v59  ;;  %v4057_v50 = vsel %vm3786_vm9, %v3984_v10, %v8513_v33  ;;  %v2050_v6 = vshll.u32 %v8731_v41, 16  ;;  %v6773_v33 = vld [vmem:[#allocation2 + $0x20] sm:$0xf]  ;;  %v9711_v63 = vld [vmem:[#allocation70_spill] sm:$0xff] }
 0x27a   : > { %9708 = vst [vmem:[#allocation36_spill] sm:$0xff] %v8753_v22  ;;  %2115 = vrot.lane.b32.xlu1 %v1962_v7, %s6925_s16  ;;  %v8759_v0 = vpop.f32.mrb[39].mxu0  ;;  %v2057_v9 = vshll.u32 %v8734_v1, 16  ;;  %v3933_v21 = vsel %vm3689_vm8, %v2642_v42, %v8539_v19  ;;  %v3798_v18 = vsel %vm3786_vm9, %v3707_v3, %v8437_v29  ;;  %v8776_v59 = vsel %vm3851_vm10, %v4059_v5, %v9709_v52 }
 0x27b   : > { %v3542_v36 = vpop.permute.xlu0 %3541  ;;  %v3704_v2 = vsel %vm3689_vm8, %v6773_v33, %v8276_v20  ;;  %v8783_v44 = vsel %vm3851_vm10, %v8629_v35, %v9710_v51  ;;  %v3930_v15 = vsel %vm3689_vm8, %v2635_v14, %v8533_v58  ;;  %v2048_v20 = vshrl.u32 %v8731_v41, 16  ;;  %v9712_v14 = vld [vmem:[#allocation59_spill] sm:$0xff] }
 0x27c   : > { %v8772_v57 = vsel %vm3851_vm10, %v4057_v50, %v3542_v36  ;;  %v3536_v46 = vpop.permute.xlu1 %3535  ;;  %v2055_v35 = vshrl.u32 %v8734_v1, 16  ;;  %v4021_v34 = vsel %vm3786_vm9, %v3930_v15, %v8551_v24  ;;  %v4023_v49 = vsel %vm3786_vm9, %v3933_v21, %v9711_v63  ;;  %v1635_v24 = vld [vmem:[#allocation2 + $0x110] sm:$0xf]  ;;  %v1506_v21 = vld [vmem:[#allocation2 + $0x108] sm:$0xe] }
 0x27d   : > { %v8788_v29 = vsel %vm3851_vm10, %v4051_v32, %v3536_v46  ;;  %3005 = vrot.lane.b32.xlu0 %v2947_v25, %s6925_s16  ;;  %v3863_v28 = vsel %vm3851_vm10, %v3798_v18, %v8461_v30  ;;  %v2052_v58 = vrot.slane %v2050_v6, 1  ;;  %v3796_v7 = vsel %vm3786_vm9, %v3704_v2, %v9712_v14  ;;  %v1636_v30 = vld [vmem:[#allocation2 + $0x118] sm:$0xf]  ;;  %v6775_v6 = vld [vmem:[#allocation2 + $0x114] sm:$0x1]  ;;  %v9718_v14 = vld [vmem:[#allocation16_spill] sm:$0xff] }
 0x27e   : > { %2491 = vrot.lane.b32.xlu1 %v5725_v43, %s6926_s10  ;;  %v4087_v13 = vsel %vm3851_vm10, %v4023_v49, %v8586_v37  ;;  %v2059_v5 = vrot.slane %v2057_v9, 1  ;;  %v3861_v23 = vsel %vm3851_vm10, %v3796_v7, %v8404_v4  ;;  %v2749_v48 = vshrl.u32 %v9677_v47, 16  ;;  %v6774_v32 = vld [vmem:[#allocation2 + $0x38] sm:$0xf]  ;;  %v1505_v9 = vld [vmem:[#allocation2 + $0x100] sm:$0xe] }
 0x27f   : > { %v3506_v42 = vpop.permute.xlu0 %3505  ;;  %v9713_v43 = vshll.u32 %v9677_v47, 16  ;;  %v5898_v37 = vcombine.low %v3861_v23, %v3863_v28  ;;  %v2742_v25 = vshrl.u32 %v9705_v11, 16  ;;  %v3713_v50 = vsel %vm3689_vm8, %v6774_v32, %v8615_v8  ;;  %v6776_v18 = vld [vmem:[#allocation2 + $0x30] sm:$0xf]  ;;  %v6777_v33 = vld [vmem:[#allocation2 + $0x11c] sm:$0x1] }
 0x280   : > { %v4085_v41 = vsel %vm3851_vm10, %v4021_v34, %v3506_v42  ;;  %v8809_v1 = vpop.permute.xlu1 %2131  ;;  %v2053_v4 = vor.u32 %v2052_v58, %v2048_v20  ;;  %v2746_v47 = vrot.slane %v2744_v38, 1  ;;  %v2060_v46 = vor.u32 %v2059_v5, %v2055_v35  ;;  %v9715_v49 = vld [vmem:[#allocation12_spill] sm:$0xff]  ;;  %v9716_v28 = vld [vmem:[#allocation33_spill] sm:$0xff] }
 0x281   : > { %v5899_v3 = vcombine.low %v4085_v41, %v4087_v13  ;;  %2117 = vrot.lane.b32.xlu0 %v1969_v17, %s6925_s16  ;;  %v2753_v10 = vrot.slane %v9713_v43, 1  ;;  %v5854_v17 = vcombine.low %v1635_v24, %v6775_v6  ;;  %v5855_v2 = vcombine.low %v1636_v30, %v6777_v33  ;;  %v8867_v6 = vld [vmem:[#allocation2 + $0x114] sm:$0x1] }
 0x282   : > { %3007 = vrot.lane.b32.xlu1 %v2948_v39, %s6925_s16  ;;  %v3802_v38 = vsel %vm3786_vm9, %v3713_v50, %v8382_v55  ;;  %v5694_v51 = vcombine.low %v1505_v9, %v8710_v62  ;;  %v5695_v15 = vcombine.low %v1506_v21, %v8712_v16  ;;  %v5822_v35 = vcombine.low %v1635_v24, %v1635_v24  ;;  %v9717_v62 = vld [vmem:[#allocation79_spill] sm:$0xff]  ;;  %v9719_v24 = vld [vmem:[#allocation18_spill] sm:$0xff] }
 0x283   : > { %v2102_v36 = vpop.permute.xlu0 %2101  ;;  %4620 = vmatprep.mubr.bf16.mxu1 %v5899_v3  ;;  %v2754_v11 = vor.u32 %v2753_v10, %v2749_v48  ;;  %v3458_v63 = vshll.u32 %v5854_v17, 16  ;;  %v2747_v12 = vor.u32 %v2746_v47, %v2742_v25  ;;  %v5823_v55 = vcombine.low %v1636_v30, %v1636_v30  ;;  %v9720_v3 = vld [vmem:[#allocation72_spill] sm:$0xff]  ;;  %v8872_v9 = vld [vmem:[#allocation2 + $0x118] sm:$0xf] }
 0x284   : > { %v3710_v39 = vsel %vm3689_vm8, %v6776_v18, %v2102_v36  ;;  %v8824_v52 = vpop.permute.xlu1 %3131  ;;  %4621 = vmatmul.mubr.bf16.gmra.mrb[24].mxu1 %v5898_v37  ;;  %v3465_v42 = vshll.u32 %v5855_v2, 16  ;;  %v2674_v58 = vshll.u32 %v9716_v28, 16  ;;  %v3867_v16 = vsel %vm3851_vm10, %v3802_v38, %v9717_v62  ;;  %v1605_v38 = vld [vmem:[#allocation2 + $0x120] sm:$0xe] }
 0x285   : > { %v3800_v8 = vsel %vm3786_vm9, %v3710_v39, %v8641_v54  ;;  %2141 = vrot.lane.b32.xlu0 %v2053_v4, %s6925_s16  ;;  %4628 = vmatprep.mubr.bf16.mxu1 %v5902_v56  ;;  %v9714_v54 = vld [vmem:[#allocation69_spill] sm:$0xff]  ;;  %v3981_v27 = vsel %vm3689_vm8, %v2754_v11, %v9715_v49  ;;  %v3978_v7 = vsel %vm3689_vm8, %v2747_v12, %v9718_v14  ;;  %v2275_v41 = vrot.slane %v5694_v51, 1  ;;  %v8865_v4 = vld [vmem:[#allocation2 + $0x110] sm:$0xf] }
 0x286   : > { %2143 = vrot.lane.b32.xlu1 %v2060_v46, %s6925_s16  ;;  %v3865_v34 = vsel %vm3851_vm10, %v3800_v8, %v9714_v54  ;;  %v2276_v5 = vrot.slane %v5695_v15, 1  ;;  %v4053_v23 = vsel %vm3786_vm9, %v3978_v7, %v9719_v24  ;;  %v4055_v30 = vsel %vm3786_vm9, %v3981_v27, %v9720_v3  ;;  %v1604_v8 = vld [vmem:[#allocation2 + $0x118] sm:$0xe] }
 0x287   : > { %v8837_v20 = vpop.permute.xlu0 %2457  ;;  %v5901_v13 = vcombine.low %v3865_v34, %v3867_v16  ;;  %v3456_v43 = vshrl.u32 %v5854_v17, 16  ;;  %v3460_v10 = vrot.slane %v3458_v63, 1  ;;  %v8858_v37 = vsel %vm3851_vm10, %v4055_v30, %v8646_v53  ;;  %v8874_v53 = vld [vmem:[#allocation2 + $0x11c] sm:$0x1]  ;;  %v9721_v34 = vld [vmem:[#allocation74_spill] sm:$0xff]  ;;  %v9723_v16 = vld [vmem:[#allocation40_spill] sm:$0xff] }
 0x288   : > { %v8843_v56 = vpop.permute.xlu1 %3163  ;;  %v3463_v50 = vshrl.u32 %v5855_v2, 16  ;;  %v3467_v36 = vrot.slane %v3465_v42, 1  ;;  %v2672_v21 = vshrl.u32 %v9716_v28, 16  ;;  %v2676_v47 = vrot.slane %v2674_v58, 1  ;;  %v9722_v28 = vld [vmem:[#allocation75_spill] sm:$0xff] }
 0x289   : > { %3165 = vrot.lane.b32.xlu0 %v5822_v35, %s6924_s13  ;;  %v3461_v39 = vor.u32 %v3460_v10, %v3456_v43  ;;  %v5664_v46 = vcombine.low %v8865_v4, %v8867_v6  ;;  %v5665_v11 = vcombine.low %v8872_v9, %v8874_v53  ;;  %v6778_v35 = vld [vmem:[#allocation2 + $0x108] sm:$0xf]  ;;  %v5792_v63 = vcombine.low %v1604_v8, %v9721_v34  ;;  %v1637_v43 = vld [vmem:[#allocation2 + $0x120] sm:$0xf] }
 0x28a   : > { %3167 = vrot.lane.b32.xlu1 %v5823_v55, %s6924_s13  ;;  %v3468_v2 = vor.u32 %v3467_v36, %v3463_v50  ;;  %v2677_v51 = vor.u32 %v2676_v47, %v2672_v21  ;;  %v5726_v54 = vcombine.low %v6778_v35, %v6778_v35  ;;  %v6779_v55 = vld [vmem:[#allocation2 + $0x110] sm:$0xf]  ;;  %v5793_v58 = vcombine.low %v1605_v38, %v9722_v28  ;;  %v1638_v10 = vld [vmem:[#allocation2 + $0x128] sm:$0xf] }
 0x28b   : > { %v3538_v48 = vpop.permute.xlu0 %3537  ;;  %v2064_v49 = vshll.u32 %v5664_v46, 16  ;;  %v5727_v42 = vcombine.low %v6779_v55, %v6779_v55  ;;  %v2071_v62 = vshll.u32 %v5665_v11, 16  ;;  %v2681_v14 = vshll.u32 %v9723_v16, 16  ;;  %v9724_v21 = vld [vmem:[#allocation58_spill] sm:$0xff] }
 0x28c   : > { %v8861_v25 = vsel %vm3851_vm10, %v4053_v23, %v3538_v48  ;;  %v8863_v32 = vpop.permute.xlu1 %2303  ;;  %4629 = vmatmul.mubr.bf16.gmra.mrb[28].mxu1 %v5901_v13  ;;  %v2949_v13 = vrot.slane %v5792_v63, 1  ;;  %v2950_v3 = vrot.slane %v5793_v58, 1  ;;  %v2069_v30 = vshrl.u32 %v5665_v11, 16  ;;  %v1507_v35 = vld [vmem:[#allocation2 + $0x110] sm:$0xe] }
 0x28d   : > { %2333 = vrot.lane.b32.xlu0 %v2275_v41, %s6924_s13  ;;  %v2062_v41 = vshrl.u32 %v5664_v46, 16  ;;  %v2073_v48 = vrot.slane %v2071_v62, 1  ;;  %v2679_v50 = vshrl.u32 %v9723_v16, 16  ;;  %v2683_v36 = vrot.slane %v2681_v14, 1  ;;  %v9725_v58 = vld [vmem:[#allocation62_spill] sm:$0xff] }
 0x28e   : > { %2335 = vrot.lane.b32.xlu1 %v2276_v5, %s6924_s13  ;;  %v2066_v5 = vrot.slane %v2064_v49, 1  ;;  %v2772_v47 = vshll.u32 %v9724_v21, 16  ;;  %v5824_v63 = vcombine.low %v1637_v43, %v1637_v43  ;;  %v2770_v49 = vshrl.u32 %v9724_v21, 16 }
 0x28f   : > { %v8878_v18 = vpop.permute.xlu0 %2133  ;;  %v2074_v11 = vor.u32 %v2073_v48, %v2069_v30  ;;  %v2684_v34 = vor.u32 %v2683_v36, %v2679_v50  ;;  %v2779_v62 = vshll.u32 %v9725_v58, 16 }
 0x290   : > { %v8882_v33 = vpop.permute.xlu1 %2463  ;;  %v2067_v46 = vor.u32 %v2066_v5, %v2062_v41 }
 0x291   : > { %3549 = vrot.lane.b32.xlu0 %v3461_v39, %s6926_s10 }
 0x292   : > { %3551 = vrot.lane.b32.xlu1 %v3468_v2, %s6926_s10  ;;  %v6780_v2 = vld [vmem:[#allocation2 + $0x124] sm:$0x1] }
 0x293   : > { %v2974_v15 = vpop.permute.xlu0 %2973  ;;  %v5856_v8 = vcombine.low %v1637_v43, %v6780_v2  ;;  %v2781_v43 = vrot.slane %v2779_v62, 1  ;;  %v8928_v2 = vld [vmem:[#allocation2 + $0x124] sm:$0x1] }
 0x294   : > { %v3948_v27 = vsel %vm3689_vm8, %v2677_v51, %v2974_v15  ;;  %v8890_v12 = vpop.permute.xlu1 %2299  ;;  %v6781_v51 = vld [vmem:[#allocation2 + $0x12c] sm:$0x1] }
 0x295   : > { %2493 = vrot.lane.b32.xlu0 %v5726_v54, %s6926_s10  ;;  %v5857_v15 = vcombine.low %v1638_v10, %v6781_v51  ;;  %v1508_v54 = vld [vmem:[#allocation2 + $0x118] sm:$0xe]  ;;  %v3472_v16 = vshll.u32 %v5856_v8, 16  ;;  %v3470_v30 = vshrl.u32 %v5856_v8, 16  ;;  %v8933_v8 = vld [vmem:[#allocation2 + $0x12c] sm:$0x1] }
 0x296   : > { %2495 = vrot.lane.b32.xlu1 %v5727_v42, %s6926_s10  ;;  %v5696_v42 = vcombine.low %v1507_v35, %v8867_v6  ;;  %v5697_v28 = vcombine.low %v1508_v54, %v8874_v53 }
 0x297   : > { %v3134_v7 = vpop.permute.xlu0 %3133  ;;  %v3474_v50 = vrot.slane %v3472_v16, 1  ;;  %v3477_v21 = vshrl.u32 %v5857_v15, 16 }
 0x298   : > { %v8897_v24 = vsel %vm3786_vm9, %v3948_v27, %v3134_v7  ;;  %v8899_v23 = vpop.permute.xlu1 %2459  ;;  %v2774_v27 = vrot.slane %v2772_v47, 1  ;;  %v5825_v7 = vcombine.low %v1638_v10, %v1638_v10  ;;  %v2277_v48 = vrot.slane %v5696_v42, 1 }
 0x299   : > { %3009 = vrot.lane.b32.xlu0 %v2949_v13, %s6925_s16  ;;  %v3479_v13 = vshll.u32 %v5857_v15, 16  ;;  %v2278_v53 = vrot.slane %v5697_v28, 1  ;;  %v3475_v54 = vor.u32 %v3474_v50, %v3470_v30 }
 0x29a   : > { %3011 = vrot.lane.b32.xlu1 %v2950_v3, %s6925_s16  ;;  %v2775_v5 = vor.u32 %v2774_v27, %v2770_v49  ;;  %v2777_v3 = vshrl.u32 %v9725_v58, 16  ;;  %v1606_v27 = vld [vmem:[#allocation2 + $0x128] sm:$0xe]  ;;  %v1607_v58 = vld [vmem:[#allocation2 + $0x130] sm:$0xe] }
 0x29b   : > { %v8905_v39 = vpop.permute.xlu0 %2969  ;;  %v3481_v47 = vrot.slane %v3479_v13, 1  ;;  %v9726_v13 = vld [vmem:[#allocation85_spill] sm:$0xff] }
 0x29c   : > { %v8907_v38 = vpop.permute.xlu1 %2331  ;;  %v2782_v35 = vor.u32 %v2781_v43, %v2777_v3 }
 0x29d   : > { %2145 = vrot.lane.b32.xlu0 %v2067_v46, %s6925_s16  ;;  %v8926_v46 = vld [vmem:[#allocation2 + $0x120] sm:$0xf]  ;;  %v3482_v49 = vor.u32 %v3481_v47, %v3477_v21 }
 0x29e   : > { %2147 = vrot.lane.b32.xlu1 %v2074_v11, %s6925_s16  ;;  %v8931_v11 = vld [vmem:[#allocation2 + $0x128] sm:$0xf] }
 0x29f   : > { %v8912_v55 = vpop.permute.xlu0 %3129  ;;  %v5667_v42 = vcombine.low %v8931_v11, %v8933_v8 }
 0x2a0   : > { %v2976_v14 = vpop.permute.xlu1 %2975 }
 0x2a1   : > { %v8918_v41 = vsel %vm3689_vm8, %v2684_v34, %v2976_v14  ;;  %3169 = vrot.lane.b32.xlu0 %v5824_v63, %s6924_s13  ;;  %v5666_v34 = vcombine.low %v8926_v46, %v8928_v2  ;;  %v6782_v14 = vld [vmem:[#allocation2 + $0x118] sm:$0xf]  ;;  %v2085_v50 = vshll.u32 %v5667_v42, 16 }
 0x2a2   : > { %3171 = vrot.lane.b32.xlu1 %v5825_v7, %s6924_s13  ;;  %v5728_v7 = vcombine.low %v6782_v14, %v6782_v14  ;;  %v9728_v14 = vld [vmem:[#allocation42_spill] sm:$0xff] }
 0x2a3   : > { %v3002_v6 = vpop.permute.xlu0 %3001  ;;  %v2078_v3 = vshll.u32 %v5666_v34, 16  ;;  %v2076_v21 = vshrl.u32 %v5666_v34, 16  ;;  %v6785_v34 = vld [vmem:[#allocation2 + $0x13c] sm:$0x1] }
 0x2a4   : > { %v3990_v36 = vsel %vm3689_vm8, %v2775_v5, %v3002_v6  ;;  %v8924_v10 = vpop.permute.xlu1 %2971  ;;  %v5794_v5 = vcombine.low %v1606_v27, %v9726_v13  ;;  %v6783_v6 = vld [vmem:[#allocation2 + $0x120] sm:$0xf]  ;;  %v6784_v27 = vld [vmem:[#allocation2 + $0x68] sm:$0xf] }
 0x2a5   : > { %2337 = vrot.lane.b32.xlu0 %v2277_v48, %s6924_s13  ;;  %v5729_v48 = vcombine.low %v6783_v6, %v6783_v6  ;;  %v2080_v47 = vrot.slane %v2078_v3, 1  ;;  %v6786_v6 = vld [vmem:[#allocation2 + $0x134] sm:$0x1] }
 0x2a6   : > { %2339 = vrot.lane.b32.xlu1 %v2278_v53, %s6924_s13  ;;  %v9727_v53 = vld [vmem:[#allocation86_spill] sm:$0xff] }
 0x2a7   : > { %v3162_v51 = vpop.permute.xlu0 %3161  ;;  %v5795_v43 = vcombine.low %v1607_v58, %v9727_v53  ;;  %v1640_v58 = vld [vmem:[#allocation2 + $0x138] sm:$0xf] }
 0x2a8   : > { %v8939_v15 = vsel %vm3786_vm9, %v3990_v36, %v3162_v51  ;;  %v3004_v63 = vpop.permute.xlu1 %3003  ;;  %v2951_v36 = vrot.slane %v5794_v5, 1  ;;  %v5859_v5 = vcombine.low %v1640_v58, %v6785_v34 }
 0x2a9   : > { %v3993_v28 = vsel %vm3689_vm8, %v2782_v35, %v3004_v63  ;;  %3553 = vrot.lane.b32.xlu0 %v3475_v54, %s6926_s10  ;;  %v2952_v35 = vrot.slane %v5795_v43, 1  ;;  %v2083_v54 = vshrl.u32 %v5667_v42, 16  ;;  %v2087_v63 = vrot.slane %v2085_v50, 1  ;;  %v9729_v43 = vld [vmem:[#allocation38_spill] sm:$0xff] }
 0x2aa   : > { %3555 = vrot.lane.b32.xlu1 %v3482_v49, %s6926_s10  ;;  %v8948_v62 = vsel %vm3786_vm9, %v3993_v28, %v8843_v56  ;;  %v1639_v49 = vld [vmem:[#allocation2 + $0x130] sm:$0xf]  ;;  %v2081_v42 = vor.u32 %v2080_v47, %v2076_v21  ;;  %v2660_v50 = vshll.u32 %v9729_v43, 16  ;;  %v2665_v21 = vshrl.u32 %v9728_v14, 16 }
 0x2ab   : > { %v8950_v16 = vpop.permute.xlu0 %2305 }
 0x2ac   : > { %v8953_v30 = vpop.permute.xlu1 %3515  ;;  %v2662_v31 = vrot.slane %v2660_v50, 1 }
 0x2ad   : > { %2497 = vrot.lane.b32.xlu0 %v5728_v7, %s6926_s10  ;;  %v2667_v7 = vshll.u32 %v9728_v14, 16 }
 0x2ae   : > { %2499 = vrot.lane.b32.xlu1 %v5729_v48, %s6926_s10  ;;  %v5858_v48 = vcombine.low %v1639_v49, %v6786_v6 }
 0x2af   : > { %v8958_v56 = vpop.permute.xlu0 %2301  ;;  %v2669_v47 = vrot.slane %v2667_v7, 1  ;;  %v6787_v7 = vld [vmem:[#allocation2 + $0x58] sm:$0xf] }
 0x2b0   : > { %v2112_v51 = vpop.permute.xlu1 %2111  ;;  %v3486_v6 = vshll.u32 %v5858_v48, 16 }
 0x2b1   : > { %v3725_v28 = vsel %vm3689_vm8, %v6784_v27, %v2112_v51  ;;  %3013 = vrot.lane.b32.xlu0 %v2951_v36, %s6925_s16  ;;  %v2088_v51 = vor.u32 %v2087_v63, %v2083_v54  ;;  %v1509_v27 = vld [vmem:[#allocation2 + $0x120] sm:$0xe]  ;;  %v5826_v54 = vcombine.low %v1639_v49, %v1639_v49  ;;  %v2670_v49 = vor.u32 %v2669_v47, %v2665_v21 }
 0x2b2   : > { %v3810_v13 = vsel %vm3786_vm9, %v3725_v28, %v8863_v32  ;;  %3015 = vrot.lane.b32.xlu1 %v2952_v35, %s6925_s16  ;;  %v8973_v19 = vpop.f32.mrb[40].mxu0  ;;  %v1510_v32 = vld [vmem:[#allocation2 + $0x128] sm:$0xe]  ;;  %v5827_v28 = vcombine.low %v1640_v58, %v1640_v58  ;;  %v5698_v63 = vcombine.low %v1509_v27, %v8928_v2  ;;  %v3491_v2 = vshrl.u32 %v5859_v5, 16 }
 0x2b3   : > { %v8966_v3 = vpop.permute.xlu0 %3517  ;;  %v8970_v53 = vsel %vm3851_vm10, %v3810_v13, %v8882_v33  ;;  %9730 = vst [vmem:[#allocation48_spill] sm:$0xff] %v8973_v19  ;;  %v8976_v35 = vpop.f32.mrb[41].mxu0  ;;  %v3493_v33 = vshll.u32 %v5859_v5, 16  ;;  %v5699_v14 = vcombine.low %v1510_v32, %v8933_v8  ;;  %v3484_v32 = vshrl.u32 %v5858_v48, 16 }
 0x2b4   : > { %v2108_v36 = vpop.permute.xlu1 %2107  ;;  %9731 = vst [vmem:[#allocation56_spill] sm:$0xff] %v8976_v35  ;;  %v8980_v13 = vpop.f32.mrb[42].mxu0  ;;  %v2279_v8 = vrot.slane %v5698_v63, 1 }
 0x2b5   : > { %2149 = vrot.lane.b32.xlu0 %v2081_v42, %s6925_s16  ;;  %9732 = vst [vmem:[#allocation63_spill] sm:$0xff] %v8980_v13  ;;  %v8985_v17 = vpop.f32.mrb[43].mxu0  ;;  %v2658_v42 = vshrl.u32 %v9729_v43, 16  ;;  %v3719_v58 = vsel %vm3689_vm8, %v6787_v7, %v2108_v36  ;;  %v3495_v27 = vrot.slane %v3493_v33, 1  ;;  %v2280_v5 = vrot.slane %v5699_v14, 1  ;;  %v9734_v33 = vld [vmem:[#allocation25_spill] sm:$0xff] }
 0x2b6   : > { %2151 = vrot.lane.b32.xlu1 %v2088_v51, %s6925_s16  ;;  %9733 = vst [vmem:[#allocation15_spill] sm:$0xff] %v8985_v17  ;;  %v6788_v51 = vld [vmem:[#allocation2 + $0xf8] sm:$0xf]  ;;  %v3488_v17 = vrot.slane %v3486_v6, 1  ;;  %v3806_v21 = vsel %vm3786_vm9, %v3719_v58, %v8890_v12  ;;  %s5448_s16 = sshll.u32 %s9394_s23, 4  ;;  %s9459_s16 = int_to_ptr.vmem [resolvable:$true] %s5448_s16 }
 0x2b7   : > { %v8982_v34 = vpop.permute.xlu0 %2113  ;;  %v2663_v36 = vor.u32 %v2662_v31, %v2658_v42  ;;  %v3496_v31 = vor.u32 %v3495_v27, %v3491_v2  ;;  %v3871_v63 = vsel %vm3851_vm10, %v3806_v21, %v8899_v23  ;;  %v9735_v6 = vld [vmem:[#allocation23_spill] sm:$0xff]  ;;  %v6790_v23 = vld [vmem:[#allocation2 + $0x128] sm:$0xf]  ;;  %s6852_s12 = scalar_lea.vmem %s9459_s16, 2048 }
 0x2b8   : > { %v2140_v19 = vpop.permute.xlu1 %2139  ;;  %p6853_p6 = scmp.ne.s32.totalorder %s9459_s16, %s6852_s12 }
 0x2b9   : > { %v3767_v13 = vsel %vm3689_vm8, %v6788_v51, %v2140_v19  ;;  %3173 = vrot.lane.b32.xlu0 %v5826_v54, %s6924_s13  ;;  %v3945_v19 = vsel %vm3689_vm8, %v2670_v49, %v8924_v10  ;;  %v3942_v48 = vsel %vm3689_vm8, %v2663_v36, %v8905_v39  ;;  %v3489_v54 = vor.u32 %v3488_v17, %v3484_v32 }
 0x2ba   : > { %3175 = vrot.lane.b32.xlu1 %v5827_v28, %s6924_s13  ;;  %v8995_v43 = vsel %vm3786_vm9, %v3767_v13, %v8907_v38  ;;  %v6789_v28 = vld [vmem:[#allocation2 + $0x50] sm:$0xf]  ;;  %v4029_v10 = vsel %vm3786_vm9, %v3942_v48, %v8912_v55  ;;  %v4031_v12 = vsel %vm3786_vm9, %v3945_v19, %v8824_v52  ;;  %v5730_v51 = vcombine.low %v6790_v23, %v6790_v23  ;;  %p6854_p13 = pnand %p6853_p6, %p9804_p12 }
 0x2bb   : > { %v8997_v50 = vpop.permute.xlu0 %2469  ;;  %v3716_v38 = vsel %vm3689_vm8, %v6789_v28, %v9734_v33  ;;  %v4095_v39 = vsel %vm3851_vm10, %v4031_v12, %v8953_v30  ;;  %v6791_v30 = vld [vmem:[#allocation2 + $0x130] sm:$0xf] }
 0x2bc   : > { %v9003_v47 = vpop.permute.xlu1 %3139  ;;  %v3804_v42 = vsel %vm3786_vm9, %v3716_v38, %v9735_v6  ;;  %v5731_v2 = vcombine.low %v6791_v30, %v6791_v30  ;;  %v9736_v38 = vld [vmem:[#allocation53_spill] sm:$0xff]  ;;  %v9737_v12 = vld [vmem:[#allocation50_spill] sm:$0xff]  ;;  %p6855_p8 = pneg %p6854_p13 }
 0x2bd   : > { %2341 = vrot.lane.b32.xlu0 %v2279_v8, %s6924_s13  ;;  %v3869_v55 = vsel %vm3851_vm10, %v3804_v42, %v8837_v20  ;;  %v2709_v48 = vshll.u32 %v9736_v38, 16 }
 0x2be   : > { %2343 = vrot.lane.b32.xlu1 %v2280_v5, %s6924_s13  ;;  %v5904_v52 = vcombine.low %v3869_v55, %v3871_v63  ;;  %v2707_v63 = vshrl.u32 %v9736_v38, 16  ;;  %v9738_v55 = vld [vmem:[#allocation55_spill] sm:$0xff] }
 0x2bf   : > { %v3514_v13 = vpop.permute.xlu0 %3513  ;;  %v2711_v6 = vrot.slane %v2709_v48, 1 }
 0x2c0   : > { %v4093_v14 = vsel %vm3851_vm10, %v4029_v10, %v3514_v13  ;;  %v3136_v7 = vpop.permute.xlu1 %3135  ;;  %v6738_v10 = vld [vmem:[%s9513_s6] sm:$0xff]   ;;  %v2702_v13 = vshll.u32 %v9737_v12, 16 }
 0x2c1   : > { %v5905_v58 = vcombine.low %v4093_v14, %v4095_v39  ;;  %3557 = vrot.lane.b32.xlu0 %v3489_v54, %s6926_s10  ;;  %6359 = vmatprep.subr.bf16.mxu0 %v6738_v10  ;;  %v6792_v39 = vld [vmem:[#allocation2 + $0x60] sm:$0xf]  ;;  %v2712_v30 = vor.u32 %v2711_v6, %v2707_v63 }
 0x2c2   : > { %3559 = vrot.lane.b32.xlu1 %v3496_v31, %s6926_s10  ;;  %6360 = vmatpush3.bf16.msra.mxu0 %v6738_v10  ;;  %v2704_v23 = vrot.slane %v2702_v13, 1 }
 0x2c3   : > { %v2110_v17 = vpop.permute.xlu0 %2109  ;;  %4636 = vmatprep.mubr.bf16.mxu1 %v5905_v58  ;;  %v2695_v58 = vshll.u32 %v9738_v55, 16 }
 0x2c4   : > { %v9026_v49 = vpop.permute.xlu1 %2311  ;;  %4637 = vmatmul.mubr.bf16.gmra.mrb[32].mxu1 %v5904_v52  ;;  %v3722_v14 = vsel %vm3689_vm8, %v6792_v39, %v2110_v17  ;;  %v2700_v52 = vshrl.u32 %v9737_v12, 16  ;;  %v2693_v17 = vshrl.u32 %v9738_v55, 16  ;;  %v4035_v12 = vsel %vm3786_vm9, %v8918_v41, %v3136_v7 }
 0x2c5   : > { %2501 = vrot.lane.b32.xlu0 %v5730_v51, %s6926_s10  ;;  %v3808_v38 = vsel %vm3786_vm9, %v3722_v14, %v8958_v56  ;;  %v2697_v10 = vrot.slane %v2695_v58, 1  ;;  %v4097_v56 = vsel %vm3851_vm10, %v8897_v24, %v8966_v3  ;;  %v9741_v24 = vld [vmem:[#allocation27_spill] sm:$0xff] }
 0x2c6   : > { %2503 = vrot.lane.b32.xlu1 %v5731_v2, %s6926_s10  ;;  %v9739_v2 = vld [vmem:[#allocation54_spill] sm:$0xff]  ;;  %v2705_v39 = vor.u32 %v2704_v23, %v2700_v52  ;;  %v3873_v45 = vsel %vm3851_vm10, %v3808_v38, %v8728_v61 }
 0x2c7   : > { %v9030_v20 = vpop.permute.xlu0 %2465  ;;  %v2686_v13 = vshrl.u32 %v9739_v2, 16  ;;  %v2698_v58 = vor.u32 %v2697_v10, %v2693_v17  ;;  %v5907_v23 = vcombine.low %v3873_v45, %v8970_v53  ;;  %v6793_v53 = vld [vmem:[#allocation2 + $0x70] sm:$0xf] }
 0x2c8   : > { %v9032_v27 = vpop.permute.xlu1 %2471 }
 0x2cb   : > { %v3546_v8 = vpop.permute.xlu0 %3545 }
 0x2cc   : > { %v9036_v32 = vsel %vm3851_vm10, %v8939_v15, %v3546_v8  ;;  %v9038_v36 = vpop.permute.xlu1 %2307  ;;  %v6739_v15 = vld [vmem:[%s9513_s6 + $0x8] sm:$0xff]   ;;  %v2688_v8 = vshll.u32 %v9739_v2, 16 }
 0x2cd   : > { %6361 = vmatprep.subr.bf16.mxu0 %v6739_v15 }
 0x2ce   : > { %6362 = vmatpush3.bf16.msra.mxu0 %v6739_v15  ;;  %v2690_v63 = vrot.slane %v2688_v8, 1 }
 0x2cf   : > { %v2982_v19 = vpop.permute.xlu0 %2981 }
 0x2d0   : > { %v9040_v21 = vpop.permute.xlu1 %2467  ;;  %v3960_v55 = vsel %vm3689_vm8, %v2705_v39, %v2982_v19 }
 0x2d3   : > { %v3142_v5 = vpop.permute.xlu0 %3141 }
 0x2d4   : > { %v2984_v28 = vpop.permute.xlu1 %2983  ;;  %v4041_v7 = vsel %vm3786_vm9, %v3960_v55, %v3142_v5  ;;  %v9742_v55 = vld [vmem:[#allocation43_spill] sm:$0xff] }
 0x2d5   : > { %v3963_v48 = vsel %vm3689_vm8, %v2712_v30, %v2984_v28  ;;  %v9740_v28 = vld [vmem:[#allocation20_spill] sm:$0xff]  ;;  %v2691_v30 = vor.u32 %v2690_v63, %v2686_v13 }
 0x2d6   : > { %v4043_v15 = vsel %vm3786_vm9, %v3963_v48, %v9740_v28 }
 0x2d7   : > { %v2978_v33 = vpop.permute.xlu0 %2977  ;;  %v4107_v3 = vsel %vm3851_vm10, %v4043_v15, %v9741_v24  ;;  %v9744_v24 = vld [vmem:[#allocation66_spill] sm:$0xff] }
 0x2d8   : > { %v2980_v31 = vpop.permute.xlu1 %2979  ;;  %v3954_v5 = vsel %vm3689_vm8, %v2691_v30, %v2978_v33 }
 0x2d9   : > { %v3957_v61 = vsel %vm3689_vm8, %v2698_v58, %v2980_v31  ;;  %v3728_v31 = vsel %vm3689_vm8, %v6793_v53, %v8982_v34 }
 0x2da   : > { %v4039_v17 = vsel %vm3786_vm9, %v3957_v61, %v9003_v47  ;;  %v3812_v63 = vsel %vm3786_vm9, %v3728_v31, %v8950_v16  ;;  %v9747_v31 = vld [vmem:[#allocation26_spill] sm:$0xff] }
 0x2db   : > { %v3138_v54 = vpop.permute.xlu0 %3137 }
 0x2dc   : > { %v3524_v42 = vpop.permute.xlu1 %3523  ;;  %v4037_v48 = vsel %vm3786_vm9, %v3954_v5, %v3138_v54  ;;  %v3877_v54 = vsel %vm3851_vm10, %v3812_v63, %v9030_v20 }
 0x2dd   : > { %v4103_v39 = vsel %vm3851_vm10, %v4039_v17, %v3524_v42  ;;  %v9749_v17 = vld [vmem:[#allocation81_spill] sm:$0xff] }
 0x2df   : > { %v9054_v51 = vpop.permute.xlu0 %2309 }
 0x2e0   : > { %v2120_v35 = vpop.permute.xlu1 %2119 }
 0x2e3   : > { %v9061_v22 = vpop.permute.xlu0 %2489 }
 0x2e4   : > { %v3520_v6 = vpop.permute.xlu1 %3519 }
 0x2e5   : > { %v4099_v14 = vsel %vm3851_vm10, %v4035_v12, %v3520_v6  ;;  %v6794_v6 = vld [vmem:[#allocation2 + $0x88] sm:$0xf] }
 0x2e6   : > { %v5908_v41 = vcombine.low %v4097_v56, %v4099_v14  ;;  %v3737_v56 = vsel %vm3689_vm8, %v6794_v6, %v2120_v35 }
 0x2e7   : > { %v3526_v52 = vpop.permute.xlu0 %3525 }
 0x2e8   : > { %v4105_v2 = vsel %vm3851_vm10, %v4041_v7, %v3526_v52  ;;  %4644 = vmatprep.mubr.bf16.mxu1 %v5908_v41  ;;  %v3548_v8 = vpop.permute.xlu1 %3547 }
 0x2e9   : > { %v5914_v38 = vcombine.low %v4105_v2, %v4107_v3  ;;  %v9083_v19 = vsel %vm3851_vm10, %v8948_v62, %v3548_v8  ;;  %4645 = vmatmul.mubr.bf16.gmra.mrb[36].mxu1 %v5907_v23  ;;  %v9743_v23 = vld [vmem:[#allocation68_spill] sm:$0xff]  ;;  %v2786_v3 = vshll.u32 %v9744_v24, 16 }
 0x2ea   : > { %v5929_v45 = vcombine.low %v9036_v32, %v9083_v19 }
 0x2eb   : > { %v3522_v10 = vpop.permute.xlu0 %3521 }
 0x2ec   : > { %v4101_v62 = vsel %vm3851_vm10, %v4037_v48, %v3522_v10  ;;  %v2116_v12 = vpop.permute.xlu1 %2115  ;;  %v9748_v48 = vld [vmem:[#allocation82_spill] sm:$0xff] }
 0x2ed   : > { %v5911_v13 = vcombine.low %v4101_v62, %v4103_v39  ;;  %v3731_v33 = vsel %vm3689_vm8, %v8606_v60, %v2116_v12  ;;  %v9750_v10 = vcombine.low %v9748_v48, %v9749_v17  ;;  %v2784_v62 = vshrl.u32 %v9744_v24, 16  ;;  %v9756_v24 = vld [vmem:[#allocation64_spill] sm:$0xff] }
 0x2ee   : > { %v3814_v34 = vsel %vm3786_vm9, %v3731_v33, %v9038_v36  ;;  %v9108_v15 = vpop.f32.mrb[44].mxu0  ;;  %v3818_v36 = vsel %vm3786_vm9, %v3737_v56, %v9026_v49  ;;  %v6795_v49 = vld [vmem:[#allocation2 + $0xa8] sm:$0xf]  ;;  %v2788_v12 = vrot.slane %v2786_v3, 1  ;;  %v9753_v56 = vld [vmem:[#allocation39_spill] sm:$0xff] }
 0x2ef   : > { %v3006_v47 = vpop.permute.xlu0 %3005  ;;  %4652 = vmatprep.mubr.bf16.mxu1 %v5911_v13  ;;  %v3879_v42 = vsel %vm3851_vm10, %v3814_v34, %v9040_v21  ;;  %v9110_v16 = vpop.f32.mrb[45].mxu0  ;;  %v3883_v52 = vsel %vm3851_vm10, %v3818_v36, %v9032_v27  ;;  %v3743_v30 = vsel %vm3689_vm8, %v6795_v49, %v9743_v23  ;;  %v9751_v34 = vld [vmem:[#allocation52_spill] sm:$0xff]  ;;  %v6797_v36 = vld [vmem:[#allocation2 + $0xb0] sm:$0xf]  ;;  %v6798_v49 = vld [vmem:[#allocation2 + $0xb8] sm:$0xf] }
 0x2f0   : > { %v9106_v28 = vpop.permute.xlu1 %2491  ;;  %v5910_v60 = vcombine.low %v3877_v54, %v3879_v42  ;;  %v9114_v14 = vpop.f32.mrb[46].mxu0  ;;  %v9752_v42 = vld [vmem:[#allocation28_spill] sm:$0xff]  ;;  %v9755_v23 = vld [vmem:[#allocation65_spill] sm:$0xff] }
 0x2f1   : > { %v9118_v35 = vpop.f32.mrb[47].mxu0 }
 0x2f2   : > { %4653 = vmatmul.mubr.bf16.gmra.mrb[40].mxu1 %v5910_v60 }
 0x2f3   : > { %4660 = vmatprep.mubr.bf16.mxu1 %v5914_v38  ;;  %v2118_v20 = vpop.permute.xlu0 %2117  ;;  %v9745_v38 = vld [vmem:[#allocation67_spill] sm:$0xff] }
 0x2f4   : > { %v3734_v21 = vsel %vm3689_vm8, %v9742_v55, %v2118_v20  ;;  %v3008_v58 = vpop.permute.xlu1 %3007  ;;  %v2793_v5 = vshll.u32 %v9745_v38, 16  ;;  %v2791_v33 = vshrl.u32 %v9745_v38, 16  ;;  %v9754_v20 = vld [vmem:[#allocation84_spill] sm:$0xff] }
 0x2f5   : > { %v3816_v41 = vsel %vm3786_vm9, %v3734_v21, %v9054_v51  ;;  %v9746_v51 = vld [vmem:[#allocation49_spill] sm:$0xff]  ;;  %v3746_v55 = vsel %vm3689_vm8, %v6797_v36, %v9754_v20 }
 0x2f6   : > { %v3881_v7 = vsel %vm3851_vm10, %v3816_v41, %v8997_v50  ;;  %v3822_v53 = vsel %vm3786_vm9, %v3743_v30, %v9746_v51  ;;  %v6796_v50 = vld [vmem:[#allocation2 + $0xa0] sm:$0xf]  ;;  %v2795_v63 = vrot.slane %v2793_v5, 1  ;;  %v2789_v41 = vor.u32 %v2788_v12, %v2784_v62 }
 0x2f7   : > { %v9128_v61 = vpop.permute.xlu0 %2141  ;;  %v5913_v2 = vcombine.low %v3881_v7, %v3883_v52  ;;  %v3740_v27 = vsel %vm3689_vm8, %v6796_v50, %v9747_v31  ;;  %v3887_v54 = vsel %vm3851_vm10, %v3822_v53, %v9751_v34  ;;  %v3749_v30 = vsel %vm3689_vm8, %v6798_v49, %v9755_v23  ;;  %v9758_v31 = vld [vmem:[#allocation44_spill] sm:$0xff]  ;;  %v9764_v23 = vld [vmem:[#allocation97_spill] sm:$0xff] }
 0x2f8   : > { %v9131_v8 = vpop.permute.xlu1 %2143  ;;  %v3820_v6 = vsel %vm3786_vm9, %v3740_v27, %v9752_v42  ;;  %v3824_v3 = vsel %vm3786_vm9, %v3746_v55, %v9756_v24  ;;  %v3996_v38 = vsel %vm3689_vm8, %v2789_v41, %v3006_v47  ;;  %v9757_v53 = vcombine.low %v8783_v44, %v8788_v29  ;;  %v6799_v29 = vld [vmem:[#allocation2 + $0xc8] sm:$0xf] }
 0x2f9   : > { %v3885_v60 = vsel %vm3851_vm10, %v3820_v6, %v9753_v56  ;;  %v3826_v27 = vsel %vm3786_vm9, %v3749_v30, %v9758_v31  ;;  %v3755_v62 = vsel %vm3689_vm8, %v6799_v29, %v8809_v1  ;;  %v6800_v6 = vld [vmem:[#allocation2 + $0xc0] sm:$0xf]  ;;  %v9762_v56 = vld [vmem:[#allocation73_spill] sm:$0xff]  ;;  %v9763_v1 = vcombine.low %v8861_v25, %v8858_v37  ;;  %v6801_v37 = vld [vmem:[#allocation2 + $0xd0] sm:$0xf] }
 0x2fa   : > { %4661 = vmatmul.mubr.bf16.gmra.mrb[44].mxu1 %v5913_v2  ;;  %v5916_v52 = vcombine.low %v3885_v60, %v3887_v54  ;;  %v2796_v2 = vor.u32 %v2795_v63, %v2791_v33  ;;  %v9761_v54 = vld [vmem:[#allocation94_spill] sm:$0xff]  ;;  %v3752_v60 = vsel %vm3689_vm8, %v6800_v6, %v9762_v56  ;;  %v3758_v25 = vsel %vm3689_vm8, %v6801_v37, %v8878_v18  ;;  %v9771_v6 = vld [vmem:[#allocation45_spill] sm:$0xff] }
 0x2fb   : > { %4668 = vmatprep.mubr.bf16.mxu1 %v9750_v10  ;;  %v3166_v39 = vpop.permute.xlu0 %3165  ;;  %v3830_v42 = vsel %vm3786_vm9, %v3755_v62, %v9761_v54  ;;  %v6802_v62 = vld [vmem:[#allocation2 + $0xd8] sm:$0xf]  ;;  %v9769_v18 = vld [vmem:[#allocation78_spill] sm:$0xff]  ;;  %v9770_v54 = vld [vmem:[#allocation93_spill] sm:$0xff]  ;;  %v3832_v56 = vsel %vm3786_vm9, %v3758_v25, %v9771_v6 }
 0x2fc   : > { %v3168_v13 = vpop.permute.xlu1 %3167  ;;  %v3999_v5 = vsel %vm3689_vm8, %v2796_v2, %v3008_v58  ;;  %v4065_v51 = vsel %vm3786_vm9, %v3996_v38, %v3166_v39  ;;  %v9759_v58 = vld [vmem:[#allocation35_spill] sm:$0xff]  ;;  %v3895_v30 = vsel %vm3851_vm10, %v3830_v42, %v9764_v23  ;;  %v9765_v2 = vld [vmem:[#allocation60_spill] sm:$0xff] }
 0x2fd   : > { %v4067_v48 = vsel %vm3786_vm9, %v3999_v5, %v3168_v13  ;;  %v3889_v39 = vsel %vm3851_vm10, %v3824_v3, %v9759_v58  ;;  %v9760_v13 = vld [vmem:[#allocation46_spill] sm:$0xff]  ;;  %v3828_v24 = vsel %vm3786_vm9, %v3752_v60, %v9765_v2  ;;  %v9198_v3 = vld [vmem:[%s7082_s25] ss:$0 sm:$0xff]  ;;  %v2805_v2 = vshrl.u32 %v9769_v18, 16 }
 0x2fe   : > { %v3891_v33 = vsel %vm3851_vm10, %v3826_v27, %v9760_v13  ;;  %v9766_v5 = vld [vmem:[#allocation90_spill] sm:$0xff]  ;;  %v9211_v58 = vld [vmem:[%s9512_s5] ss:$0 sm:$0xff]  ;;  %v3761_v13 = vsel %vm3689_vm8, %v6802_v62, %v8679_v26 }
 0x2ff   : > { %v9151_v21 = vpop.permute.xlu0 %2333  ;;  %v5919_v34 = vcombine.low %v3889_v39, %v3891_v33  ;;  %v2807_v33 = vshll.u32 %v9769_v18, 16  ;;  %v9773_v26 = vld [vmem:[#allocation80_spill] sm:$0xff]  ;;  %v9776_v18 = vld [vmem:[#allocation30_spill] sm:$0xff] }
 0x300   : > { %v9153_v7 = vpop.permute.xlu1 %2335 }
 0x302   : > { %4669 = vmatmul.mubr.bf16.gmra.mrb[48].mxu1 %v5916_v52 }
 0x303   : > { %4676 = vmatprep.mubr.bf16.mxu1 %v9757_v53  ;;  %v3550_v50 = vpop.permute.xlu0 %3549  ;;  %v9767_v53 = vld [vmem:[#allocation89_spill] sm:$0xff] }
 0x304   : > { %v9169_v17 = vsel %vm3851_vm10, %v4065_v51, %v3550_v50  ;;  %v3552_v10 = vpop.permute.xlu1 %3551  ;;  %v3893_v51 = vsel %vm3851_vm10, %v3828_v24, %v9766_v5  ;;  %v2809_v24 = vrot.slane %v2807_v33, 1  ;;  %v9774_v5 = vld [vmem:[#allocation77_spill] sm:$0xff] }
 0x305   : > { %v9172_v47 = vsel %vm3851_vm10, %v4067_v48, %v3552_v10  ;;  %v9768_v48 = vld [vmem:[#allocation76_spill] sm:$0xff]  ;;  %v5922_v29 = vcombine.low %v3893_v51, %v3895_v30  ;;  %v3897_v51 = vsel %vm3851_vm10, %v3832_v56, %v9774_v5 }
 0x306   : > { %v5932_v44 = vcombine.low %v9169_v17, %v9172_v47  ;;  %v2800_v10 = vshll.u32 %v9768_v48, 16  ;;  %v9778_v5 = vld [vmem:[#allocation88_spill] sm:$0xff]  ;;  %v9779_v47 = vld [vmem:[#allocation91_spill] sm:$0xff] }
 0x307   : > { %v9180_v12 = vpop.permute.xlu0 %2493 }
 0x308   : > { %v9184_v63 = vpop.permute.xlu1 %2495  ;;  %v2802_v23 = vrot.slane %v2800_v10, 1 }
 0x30a   : > { %4677 = vmatmul.mubr.bf16.gmra.mrb[52].mxu1 %v5919_v34 }
 0x30b   : > { %4684 = vmatprep.mubr.bf16.mxu1 %v9763_v1  ;;  %v3010_v36 = vpop.permute.xlu0 %3009  ;;  %v6143_v20 = vpop.f32.mrb[16].mxu1 }
 0x30c   : > { %v3012_v55 = vpop.permute.xlu1 %3011  ;;  %v6144_v41 = vpop.f32.mrb[17].mxu1 }
 0x30d   : > { %v6145_v52 = vadd.f32 %v6144_v41, %v6143_v20  ;;  %v6146_v49 = vpop.f32.mrb[18].mxu1  ;;  %v9772_v20 = vcombine.low %v8772_v57, %v8776_v59  ;;  %v9775_v59 = vld [vmem:[#allocation83_spill] sm:$0xff] }
 0x30e   : > { %v6147_v38 = vpop.f32.mrb[19].mxu1 }
 0x30f   : > { %v4768_v50 = vadd.f32 %v6145_v52, %v9767_v53  ;;  %v6148_v31 = vadd.f32 %v6147_v38, %v6146_v49  ;;  %v9205_v27 = vpop.permute.xlu0 %2145  ;;  %v3834_v52 = vsel %vm3786_vm9, %v3761_v13, %v9773_v26  ;;  %v2798_v49 = vshrl.u32 %v9768_v48, 16  ;;  %v6803_v13 = vld [vmem:[#allocation2 + $0xf0] sm:$0xf] }
 0x310   : > { %v9213_v39 = vpop.permute.xlu1 %2147  ;;  %v3899_v53 = vsel %vm3851_vm10, %v3834_v52, %v9775_v59  ;;  %v2810_v48 = vor.u32 %v2809_v24, %v2805_v2  ;;  %v3764_v33 = vsel %vm3689_vm8, %v6803_v13, %v9776_v18  ;;  %v6804_v52 = vld [vmem:[#allocation2 + $0x100] sm:$0xf] }
 0x311   : > { %v4922_v34 = vmul.f32 %v9198_v3, %v4768_v50  ;;  %v4771_v42 = vadd.f32 %v6148_v31, %v9770_v54  ;;  %v2803_v50 = vor.u32 %v2802_v23, %v2798_v49  ;;  %v3770_v49 = vsel %vm3689_vm8, %v6804_v52, %v9128_v61  ;;  %v6805_v23 = vld [vmem:[#allocation2 + $0x108] sm:$0xf] }
 0x312   : > { %4685 = vmatmul.mubr.bf16.gmra.mrb[56].mxu1 %v5922_v29  ;;  %v5925_v29 = vcombine.low %v3897_v51, %v3899_v53  ;;  %v2814_v51 = vshll.u32 %v9778_v5, 16 }
 0x313   : > { %v4961_v60 = vadd.f32 %v9211_v58, %v4922_v34  ;;  %v4923_v1 = vmul.f32 %v9198_v3, %v4771_v42  ;;  %4692 = vmatprep.mubr.bf16.mxu1 %v9772_v20  ;;  %v3170_v41 = vpop.permute.xlu0 %3169  ;;  %v4002_v62 = vsel %vm3689_vm8, %v2803_v50, %v3010_v36  ;;  %v4005_v34 = vsel %vm3689_vm8, %v2810_v48, %v3012_v55 }
 0x314   : > { %v3172_v30 = vpop.permute.xlu1 %3171  ;;  %v4069_v54 = vsel %vm3786_vm9, %v4002_v62, %v3170_v41  ;;  %v2816_v59 = vrot.slane %v2814_v51, 1 }
 0x315   : > { %v4962_v38 = vadd.f32 %v9211_v58, %v4923_v1  ;;  %v4993_v37 = vmax.f32 %v4961_v60, 0.0  ;;  %v4071_v6 = vsel %vm3786_vm9, %v4005_v34, %v3172_v30  ;;  %v3903_v60 = vsel %vm3851_vm10, %v8995_v43, %v9106_v28  ;;  %v9777_v1 = vld [vmem:[#allocation32_spill] sm:$0xff] }
 0x316   : > { %v3836_v20 = vsel %vm3786_vm9, %v3764_v33, %v9777_v1  ;;  %v3773_v43 = vsel %vm3689_vm8, %v6805_v23, %v9131_v8  ;;  %v9780_v23 = vld [vmem:[#allocation87_spill] sm:$0xff] }
 0x317   : > { %v4994_v25 = vmax.f32 %v4962_v38, 0.0  ;;  %v2338_v57 = vpop.permute.xlu0 %2337  ;;  %v3901_v32 = vsel %vm3851_vm10, %v3836_v20, %v9061_v22  ;;  %v3840_v22 = vsel %vm3786_vm9, %v3770_v49, %v9151_v21  ;;  %v3842_v30 = vsel %vm3786_vm9, %v3773_v43, %v9153_v7 }
 0x318   : > { %v2340_v31 = vpop.permute.xlu1 %2339  ;;  %v3905_v24 = vsel %vm3851_vm10, %v3840_v22, %v9180_v12  ;;  %v3907_v61 = vsel %vm3851_vm10, %v3842_v30, %v9184_v63  ;;  %v3776_v21 = vsel %vm3689_vm8, %v8865_v4, %v9205_v27  ;;  %v3779_v7 = vsel %vm3689_vm8, %v8872_v9, %v9213_v39  ;;  %v9781_v22 = vld [vmem:[#allocation92_spill] sm:$0xff] }
 0x319   : > { %v5025_v10 = vpack.c.bf16 %v4994_v25, %v4993_v37  ;;  %v5931_v8 = vcombine.low %v3905_v24, %v3907_v61  ;;  %v3844_v63 = vsel %vm3786_vm9, %v3776_v21, %v2338_v57  ;;  %v3846_v37 = vsel %vm3786_vm9, %v3779_v7, %v2340_v31  ;;  %v9782_v7 = vld [vmem:[#allocation96_spill] sm:$0xff] }
 0x31a   : > { %4693 = vmatmul.mubr.bf16.gmra.mrb[60].mxu1 %v5925_v29  ;;  %v2812_v25 = vshrl.u32 %v9778_v5, 16  ;;  %v2819_v4 = vshrl.u32 %v9779_v47, 16 }
 0x31b   : > { %4700 = vmatprep.mubr.bf16.mxu1 %v5929_v45  ;;  %v3554_v42 = vpop.permute.xlu0 %3553  ;;  %6363 = vmatprep.mubr.msk.bf16.mxu0 %vm3689_vm8, %v5025_v10  ;;  %v5928_v45 = vcombine.low %v3901_v32, %v3903_v60 }
 0x31c   : > { %v4133_v36 = vsel %vm3851_vm10, %v4069_v54, %v3554_v42  ;;  %v3556_v56 = vpop.permute.xlu1 %3555  ;;  %v2817_v9 = vor.u32 %v2816_v59, %v2812_v25  ;;  %v9783_v25 = vld [vmem:[#allocation99_spill] sm:$0xff] }
 0x31d   : > { %v4135_v55 = vsel %vm3851_vm10, %v4071_v6, %v3556_v56 }
 0x31e   : > { %v5935_v41 = vcombine.low %v4133_v36, %v4135_v55 }
 0x31f   : > { %v2498_v19 = vpop.permute.xlu0 %2497 }
 0x320   : > { %v2500_v26 = vpop.permute.xlu1 %2499  ;;  %v3909_v50 = vsel %vm3851_vm10, %v3844_v63, %v2498_v19 }
 0x321   : > { %v3911_v29 = vsel %vm3851_vm10, %v3846_v37, %v2500_v26 }
 0x322   : > { %4701 = vmatmul.mubr.bf16.gmra.mrb[64].mxu1 %v5928_v45  ;;  %v5934_v10 = vcombine.low %v3909_v50, %v3911_v29 }
 0x323   : > { %4708 = vmatprep.mubr.bf16.mxu1 %v5932_v44  ;;  %v3014_v28 = vpop.permute.xlu0 %3013  ;;  %v2821_v44 = vshll.u32 %v9779_v47, 16 }
 0x324   : > { %v3016_v2 = vpop.permute.xlu1 %3015  ;;  %v4008_v57 = vsel %vm3689_vm8, %v2817_v9, %v3014_v28 }
 0x325   : > { %v2823_v27 = vrot.slane %v2821_v44, 1 }
 0x327   : > { %v2150_v38 = vpop.permute.xlu0 %2149  ;;  %v2824_v62 = vor.u32 %v2823_v27, %v2819_v4 }
 0x328   : > { %v2152_v17 = vpop.permute.xlu1 %2151  ;;  %v3782_v6 = vsel %vm3689_vm8, %v8926_v46, %v2150_v38 }
 0x329   : > { %v4011_v31 = vsel %vm3689_vm8, %v2824_v62, %v3016_v2  ;;  %v3785_v56 = vsel %vm3689_vm8, %v8931_v11, %v2152_v17 }
 0x32a   : > { %4709 = vmatmul.mubr.bf16.gmra.mrb[68].mxu1 %v5931_v8 }
 0x32b   : > { %4716 = vmatprep.mubr.bf16.mxu1 %v5935_v41  ;;  %v3174_v12 = vpop.permute.xlu0 %3173 }
 0x32c   : > { %v3176_v53 = vpop.permute.xlu1 %3175  ;;  %v4073_v13 = vsel %vm3786_vm9, %v4008_v57, %v3174_v12  ;;  %v9784_v57 = vld [vmem:[#allocation95_spill] sm:$0xff] }
 0x32d   : > { %v4075_v33 = vsel %vm3786_vm9, %v4011_v31, %v3176_v53 }
 0x32f   : > { %v2342_v48 = vpop.permute.xlu0 %2341 }
 0x330   : > { %v2344_v39 = vpop.permute.xlu1 %2343  ;;  %v3848_v60 = vsel %vm3786_vm9, %v3782_v6, %v2342_v48 }
 0x331   : > { %v3850_v1 = vsel %vm3786_vm9, %v3785_v56, %v2344_v39 }
 0x332   : > { %4717 = vmatmul.mubr.bf16.gmra.mrb[72].mxu1 %v5934_v10 }
 0x333   : > { %v3558_v18 = vpop.permute.xlu0 %3557 }
 0x334   : > { %v4137_v34 = vsel %vm3851_vm10, %v4073_v13, %v3558_v18  ;;  %v3560_v54 = vpop.permute.xlu1 %3559 }
 0x335   : > { %v4139_v42 = vsel %vm3851_vm10, %v4075_v33, %v3560_v54  ;;  %v9785_v33 = vld [vmem:[#allocation98_spill] sm:$0xff] }
 0x336   : > { %v5938_v36 = vcombine.low %v4137_v34, %v4139_v42 }
 0x337   : > { %v2502_v55 = vpop.permute.xlu0 %2501 }
 0x338   : > { %v3913_v20 = vsel %vm3851_vm10, %v3848_v60, %v2502_v55  ;;  %4724 = vmatprep.mubr.bf16.mxu1 %v5938_v36  ;;  %v2504_v41 = vpop.permute.xlu1 %2503 }
 0x339   : > { %v3915_v32 = vsel %vm3851_vm10, %v3850_v1, %v2504_v41 }
 0x33a   : > { %v5937_v19 = vcombine.low %v3913_v20, %v3915_v32 }
 0x33c   : > { %4725 = vmatmul.mubr.bf16.gmra.mrb[76].mxu1 %v5937_v19  ;;  %v5975_v19 = vld [vmem:[%s7082_s25 + $0x1] ss:$0 sm:$0xff] }
 0x34c   : > { %v6149_v45 = vpop.f32.mrb[20].mxu1 }
 0x34d   : > { %v6150_v26 = vpop.f32.mrb[21].mxu1 }
 0x34e   : > { %v6151_v46 = vadd.f32 %v6150_v26, %v6149_v45  ;;  %v6152_v52 = vpop.f32.mrb[22].mxu1  ;;  %v9786_v26 = vld [vmem:[#allocation101_spill] sm:$0xff] }
 0x34f   : > { %v6153_v49 = vpop.f32.mrb[23].mxu1 }
 0x350   : > { %v4776_v11 = vadd.f32 %v9780_v23, %v6151_v46  ;;  %v6154_v43 = vadd.f32 %v6153_v49, %v6152_v52 }
 0x352   : > { %v4924_v28 = vmul.f32 %v9198_v3, %v4776_v11  ;;  %v4779_v30 = vadd.f32 %v9781_v22, %v6154_v43 }
 0x354   : > { %v4963_v2 = vadd.f32 %v9211_v58, %v4924_v28  ;;  %v4925_v24 = vmul.f32 %v9198_v3, %v4779_v30 }
 0x356   : > { %v4964_v61 = vadd.f32 %v9211_v58, %v4925_v24  ;;  %v4995_v8 = vmax.f32 %v4963_v2, 0.0 }
 0x357   : > { %v6155_v38 = vpop.f32.mrb[24].mxu1 }
 0x358   : > { %v4996_v5 = vmax.f32 %v4964_v61, 0.0  ;;  %v6156_v51 = vpop.f32.mrb[25].mxu1 }
 0x359   : > { %v6157_v17 = vadd.f32 %v6156_v51, %v6155_v38  ;;  %v6158_v47 = vpop.f32.mrb[26].mxu1  ;;  %v9788_v51 = vld [vmem:[#allocation100_spill] sm:$0xff] }
 0x35a   : > { %v5026_v44 = vpack.c.bf16 %v4996_v5, %v4995_v8  ;;  %v6159_v21 = vpop.f32.mrb[27].mxu1 }
 0x35b   : > { %v4784_v12 = vadd.f32 %v6157_v17, %v9782_v7  ;;  %v6160_v63 = vadd.f32 %v6159_v21, %v6158_v47  ;;  %v9789_v21 = vld [vmem:[#allocation102_spill] sm:$0xff] }
 0x35c   : > { %6364 = vmatmul.mubr.msk.bf16.vlgmr.msra.gmra.mrb[48].mxu0 %vm3689_vm8, %v5026_v44 }
 0x35d   : > { %v4926_v37 = vmul.f32 %v9198_v3, %v4784_v12  ;;  %v4787_v59 = vadd.f32 %v6160_v63, %v9783_v25 }
 0x35f   : > { %v4965_v53 = vadd.f32 %v9211_v58, %v4926_v37  ;;  %v4927_v50 = vmul.f32 %v9198_v3, %v4787_v59  ;;  %v6161_v29 = vpop.f32.mrb[28].mxu1 }
 0x360   : > { %v6162_v4 = vpop.f32.mrb[29].mxu1 }
 0x361   : > { %v4966_v27 = vadd.f32 %v9211_v58, %v4927_v50  ;;  %v6163_v48 = vadd.f32 %v6162_v4, %v6161_v29  ;;  %v6164_v10 = vpop.f32.mrb[30].mxu1  ;;  %v4997_v39 = vmax.f32 %v4965_v53, 0.0 }
 0x362   : > { %v6165_v9 = vpop.f32.mrb[31].mxu1 }
 0x363   : > { %v4998_v62 = vmax.f32 %v4966_v27, 0.0  ;;  %v4792_v31 = vadd.f32 %v9784_v57, %v6163_v48  ;;  %v6166_v13 = vadd.f32 %v6165_v9, %v6164_v10  ;;  %v9790_v48 = vld [vmem:[#allocation11_spill] sm:$0xff]  ;;  %v9791_v57 = vld [vmem:[#allocation14_spill] sm:$0xff] }
 0x365   : > { %v4928_v18 = vmul.f32 %v9198_v3, %v4792_v31  ;;  %v4795_v34 = vadd.f32 %v9785_v33, %v6166_v13  ;;  %v5027_v54 = vpack.c.bf16 %v4998_v62, %v4997_v39 }
 0x367   : > { %v4967_v42 = vadd.f32 %v9211_v58, %v4928_v18  ;;  %v4929_v6 = vmul.f32 %v9198_v3, %v4795_v34  ;;  %6367 = vmatprep.mubr.msk.bf16.mxu0 %vm3689_vm8, %v5027_v54  ;;  %v9787_v3 = vld [vmem:[#allocation9_spill] sm:$0xff] }
 0x369   : > { %v4968_v36 = vadd.f32 %v9211_v58, %v4929_v6  ;;  %v4999_v56 = vmax.f32 %v4967_v42, 0.0 }
 0x36b   : > { %v5000_v60 = vmax.f32 %v4968_v36, 0.0 }
 0x36d   : > { %v5028_v55 = vpack.c.bf16 %v5000_v60, %v4999_v56 }
 0x36f   : > { %6368 = vmatmul.mubr.msk.bf16.gmra.mrb[52].mxu0 %vm3689_vm8, %v5028_v55  ;;  %v9792_v55 = vld [vmem:[#allocation10_spill] sm:$0xff] }
 0x397   : > { %v6167_v1 = vpop.f32.mrb[32].mxu1 }
 0x398   : > { %v6168_v20 = vpop.f32.mrb[33].mxu1 }
 0x399   : > { %v6169_v41 = vadd.f32 %v6168_v20, %v6167_v1  ;;  %v6170_v32 = vpop.f32.mrb[34].mxu1 }
 0x39a   : > { %v6171_v45 = vpop.f32.mrb[35].mxu1 }
 0x39b   : > { %v4800_v46 = vadd.f32 %v6169_v41, %v9786_v26  ;;  %v6172_v52 = vadd.f32 %v6171_v45, %v6170_v32  ;;  %v9793_v32 = vld [vmem:[#allocation13_spill] sm:$0xff] }
 0x39d   : > { %v4930_v49 = vmul.f32 %v5975_v19, %v4800_v46  ;;  %v4803_v23 = vadd.f32 %v6172_v52, %v9787_v3 }
 0x39f   : > { %v4969_v11 = vadd.f32 %v9211_v58, %v4930_v49  ;;  %v4931_v43 = vmul.f32 %v5975_v19, %v4803_v23 }
 0x3a1   : > { %v4970_v28 = vadd.f32 %v9211_v58, %v4931_v43  ;;  %v5001_v22 = vmax.f32 %v4969_v11, 0.0 }
 0x3a3   : > { %v5002_v30 = vmax.f32 %v4970_v28, 0.0  ;;  %v5976_v28 = vld [vmem:[%s7082_s25 + $0x2] ss:$0 sm:$0xff] }
 0x3a5   : > { %v5029_v2 = vpack.c.bf16 %v5002_v30, %v5001_v22 }
 0x3a7   : > { %6371 = vmatprep.mubr.msk.bf16.mxu0 %vm3689_vm8, %v5029_v2 }
 0x3bc   : > { %v6173_v24 = vpop.f32.mrb[36].mxu1 }
 0x3bd   : > { %v6174_v61 = vpop.f32.mrb[37].mxu1 }
 0x3be   : > { %v6175_v38 = vadd.f32 %v6174_v61, %v6173_v24  ;;  %v6176_v8 = vpop.f32.mrb[38].mxu1  ;;  %v9794_v24 = vld [vmem:[#allocation17_spill] sm:$0xff] }
 0x3bf   : > { %v6177_v5 = vpop.f32.mrb[39].mxu1 }
 0x3c0   : > { %v4808_v17 = vadd.f32 %v9788_v51, %v6175_v38  ;;  %v6178_v47 = vadd.f32 %v6177_v5, %v6176_v8  ;;  %v9795_v5 = vld [vmem:[#allocation21_spill] sm:$0xff] }
 0x3c2   : > { %v4932_v44 = vmul.f32 %v5975_v19, %v4808_v17  ;;  %v4811_v7 = vadd.f32 %v9789_v21, %v6178_v47 }
 0x3c4   : > { %v4971_v12 = vadd.f32 %v9211_v58, %v4932_v44  ;;  %v4933_v63 = vmul.f32 %v5975_v19, %v4811_v7 }
 0x3c5   : > { %v6179_v37 = vpop.f32.mrb[40].mxu1 }
 0x3c6   : > { %v4972_v25 = vadd.f32 %v9211_v58, %v4933_v63  ;;  %v6180_v59 = vpop.f32.mrb[41].mxu1  ;;  %v5003_v29 = vmax.f32 %v4971_v12, 0.0 }
 0x3c7   : > { %v6181_v53 = vadd.f32 %v6180_v59, %v6179_v37  ;;  %v6182_v50 = vpop.f32.mrb[42].mxu1 }
 0x3c8   : > { %v5004_v4 = vmax.f32 %v4972_v25, 0.0  ;;  %v6183_v27 = vpop.f32.mrb[43].mxu1 }
 0x3c9   : > { %v4816_v10 = vadd.f32 %v6181_v53, %v9790_v48  ;;  %v6184_v9 = vadd.f32 %v6183_v27, %v6182_v50  ;;  %v9796_v53 = vld [vmem:[#allocation51_spill] sm:$0xff] }
 0x3ca   : > { %v5030_v39 = vpack.c.bf16 %v5004_v4, %v5003_v29  ;;  %v9797_v27 = vld [vmem:[#allocation19_spill] sm:$0xff] }
 0x3cb   : > { %v4934_v62 = vmul.f32 %v5975_v19, %v4816_v10  ;;  %v4819_v31 = vadd.f32 %v6184_v9, %v9791_v57 }
 0x3cc   : > { %6372 = vmatmul.mubr.msk.bf16.gmra.mrb[56].mxu0 %vm3689_vm8, %v5030_v39 }
 0x3cd   : > { %v4973_v13 = vadd.f32 %v9211_v58, %v4934_v62  ;;  %v4935_v18 = vmul.f32 %v5975_v19, %v4819_v31  ;;  %v6185_v33 = vpop.f32.mrb[44].mxu1 }
 0x3ce   : > { %v6186_v34 = vpop.f32.mrb[45].mxu1 }
 0x3cf   : > { %v4974_v54 = vadd.f32 %v9211_v58, %v4935_v18  ;;  %v6187_v42 = vadd.f32 %v6186_v34, %v6185_v33  ;;  %v6188_v6 = vpop.f32.mrb[46].mxu1  ;;  %v5005_v56 = vmax.f32 %v4973_v13, 0.0 }
 0x3d0   : > { %v6189_v36 = vpop.f32.mrb[47].mxu1 }
 0x3d1   : > { %v5006_v60 = vmax.f32 %v4974_v54, 0.0  ;;  %v4824_v1 = vadd.f32 %v9792_v55, %v6187_v42  ;;  %v6190_v20 = vadd.f32 %v6189_v36, %v6188_v6 }
 0x3d3   : > { %v4936_v41 = vmul.f32 %v5975_v19, %v4824_v1  ;;  %v4827_v45 = vadd.f32 %v9793_v32, %v6190_v20  ;;  %v5031_v26 = vpack.c.bf16 %v5006_v60, %v5005_v56 }
 0x3d5   : > { %v4975_v46 = vadd.f32 %v9211_v58, %v4936_v41  ;;  %v4937_v52 = vmul.f32 %v5975_v19, %v4827_v45  ;;  %v6191_v49 = vpop.f32.mrb[48].mxu1  ;;  %6375 = vmatprep.mubr.msk.bf16.mxu0 %vm3689_vm8, %v5031_v26 }
 0x3d6   : > { %v6192_v3 = vpop.f32.mrb[49].mxu1 }
 0x3d7   : > { %v4976_v23 = vadd.f32 %v9211_v58, %v4937_v52  ;;  %v6193_v11 = vadd.f32 %v6192_v3, %v6191_v49  ;;  %v6194_v43 = vpop.f32.mrb[50].mxu1  ;;  %v5007_v30 = vmax.f32 %v4975_v46, 0.0  ;;  %v9798_v49 = vld [vmem:[#allocation47_spill] sm:$0xff] }
 0x3d8   : > { %v6195_v22 = vpop.f32.mrb[51].mxu1 }
 0x3d9   : > { %v5008_v2 = vmax.f32 %v4976_v23, 0.0  ;;  %v4832_v61 = vadd.f32 %v6193_v11, %v9794_v24  ;;  %v6196_v38 = vadd.f32 %v6195_v22, %v6194_v43  ;;  %v9799_v11 = vld [vmem:[#allocation36_spill] sm:$0xff] }
 0x3db   : > { %v4938_v8 = vmul.f32 %v5976_v28, %v4832_v61  ;;  %v4835_v51 = vadd.f32 %v6196_v38, %v9795_v5  ;;  %v5032_v17 = vpack.c.bf16 %v5008_v2, %v5007_v30 }
 0x3dd   : > { %v4977_v19 = vadd.f32 %v9211_v58, %v4938_v8  ;;  %v4939_v47 = vmul.f32 %v5976_v28, %v4835_v51  ;;  %v6197_v44 = vpop.f32.mrb[52].mxu1  ;;  %6376 = vmatmul.mubr.msk.bf16.gmra.mrb[60].mxu0 %vm3689_vm8, %v5032_v17  ;;  %v5977_v51 = vld [vmem:[%s7082_s25 + $0x3] ss:$0 sm:$0xff]  ;;  %s6856_s25 = sshll.u32 %s6927_s20, 4  ;;  %s6857_s25 = int_to_ptr.vmem [resolvable:$false] %s6856_s25 }
 0x3de   : > { %v6198_v21 = vpop.f32.mrb[53].mxu1  ;;  %s6858_s15 = scalar_lea.vmem %s6857_s25, 4096  ;;  %p6859_p10 = scmp.lt.s32.totalorder %s9459_s16, %s6857_s25 }
 0x3df   : > { %v4978_v7 = vadd.f32 %v9211_v58, %v4939_v47  ;;  %v6199_v12 = vadd.f32 %v6198_v21, %v6197_v44  ;;  %v6200_v63 = vpop.f32.mrb[54].mxu1  ;;  %v5009_v25 = vmax.f32 %v4977_v19, 0.0  ;;  %v9800_v44 = vld [vmem:[#allocation56_spill] sm:$0xff]  ;;  %p6860_p0 = scmp.lt.s32.totalorder %s6858_s15, %s6852_s12 }
 0x3e0   : > { %v6201_v37 = vpop.f32.mrb[55].mxu1 }
 0x3e1   : > { %v5010_v59 = vmax.f32 %v4978_v7, 0.0  ;;  %v4840_v50 = vadd.f32 %v9796_v53, %v6199_v12  ;;  %v6202_v29 = vadd.f32 %v6201_v37, %v6200_v63  ;;  %v9801_v63 = vld [vmem:[#allocation15_spill] sm:$0xff]  ;;  %p6861_p2 = por %p6860_p0, %p6859_p10 }
 0x3e3   : > { %v4940_v4 = vmul.f32 %v5976_v28, %v4840_v50  ;;  %v4843_v48 = vadd.f32 %v9797_v27, %v6202_v29  ;;  %v5033_v10 = vpack.c.bf16 %v5010_v59, %v5009_v25  ;;  %p6862_p4 = pnand %p6861_p2, %p6855_p8 }
 0x3e5   : > { %v4979_v9 = vadd.f32 %v9211_v58, %v4940_v4  ;;  %v4941_v39 = vmul.f32 %v5976_v28, %v4843_v48  ;;  %v6203_v62 = vpop.f32.mrb[56].mxu1  ;;  %6379 = vmatprep.mubr.msk.bf16.mxu0 %vm3689_vm8, %v5033_v10 }
 0x3e6   : > { %v6204_v57 = vpop.f32.mrb[57].mxu1 }
 0x3e7   : > { %v4980_v31 = vadd.f32 %v9211_v58, %v4941_v39  ;;  %v6205_v13 = vadd.f32 %v6204_v57, %v6203_v62  ;;  %v6206_v18 = vpop.f32.mrb[58].mxu1  ;;  %v5011_v34 = vmax.f32 %v4979_v9, 0.0  ;;  %v9802_v39 = vld [vmem:[#allocation48_spill] sm:$0xff] }
 0x3e8   : > { %v6207_v33 = vpop.f32.mrb[59].mxu1 }
 0x3e9   : > { %v5012_v54 = vmax.f32 %v4980_v31, 0.0  ;;  %v4848_v42 = vadd.f32 %v6205_v13, %v8744_v40  ;;  %v6208_v6 = vadd.f32 %v6207_v33, %v6206_v18  ;;  %v9803_v13 = vld [vmem:[#allocation63_spill] sm:$0xff] }
 0x3eb   : > { %v4942_v36 = vmul.f32 %v5976_v28, %v4848_v42  ;;  %v4851_v56 = vadd.f32 %v6208_v6, %v8759_v0  ;;  %v5034_v60 = vpack.c.bf16 %v5012_v54, %v5011_v34 }
 0x3ed   : > { %v4981_v55 = vadd.f32 %v9211_v58, %v4942_v36  ;;  %v4943_v1 = vmul.f32 %v5976_v28, %v4851_v56  ;;  %v6209_v20 = vpop.f32.mrb[60].mxu1  ;;  %6380 = vmatmul.mubr.msk.bf16.gmra.mrb[64].mxu0 %vm3689_vm8, %v5034_v60 }
 0x3ee   : > { %v6210_v41 = vpop.f32.mrb[61].mxu1 }
 0x3ef   : > { %v4982_v32 = vadd.f32 %v9211_v58, %v4943_v1  ;;  %v6211_v45 = vadd.f32 %v6210_v41, %v6209_v20  ;;  %v6212_v26 = vpop.f32.mrb[62].mxu1  ;;  %v5013_v52 = vmax.f32 %v4981_v55, 0.0 }
 0x3f0   : > { %v6213_v46 = vpop.f32.mrb[63].mxu1 }
 0x3f1   : > { %v5014_v40 = vmax.f32 %v4982_v32, 0.0  ;;  %v4856_v3 = vadd.f32 %v9798_v49, %v6211_v45  ;;  %v6214_v23 = vadd.f32 %v6213_v46, %v6212_v26 }
 0x3f3   : > { %v4944_v0 = vmul.f32 %v5976_v28, %v4856_v3  ;;  %v4859_v43 = vadd.f32 %v9799_v11, %v6214_v23  ;;  %v5035_v22 = vpack.c.bf16 %v5014_v40, %v5013_v52 }
 0x3f5   : > { %v4983_v30 = vadd.f32 %v9211_v58, %v4944_v0  ;;  %v4945_v2 = vmul.f32 %v5976_v28, %v4859_v43  ;;  %v6215_v24 = vpop.f32.mrb[64].mxu1  ;;  %6383 = vmatprep.mubr.msk.bf16.mxu0 %vm3689_vm8, %v5035_v22 }
 0x3f6   : > { %v6216_v61 = vpop.f32.mrb[65].mxu1 }
 0x3f7   : > { %v4984_v38 = vadd.f32 %v9211_v58, %v4945_v2  ;;  %v6217_v8 = vadd.f32 %v6216_v61, %v6215_v24  ;;  %v6218_v5 = vpop.f32.mrb[66].mxu1  ;;  %v5015_v19 = vmax.f32 %v4983_v30, 0.0 }
 0x3f8   : > { %v6219_v17 = vpop.f32.mrb[67].mxu1 }
 0x3f9   : > { %v5016_v47 = vmax.f32 %v4984_v38, 0.0  ;;  %v4864_v21 = vadd.f32 %v6217_v8, %v9800_v44  ;;  %v6220_v7 = vadd.f32 %v6219_v17, %v6218_v5  ;;  %v6806_v44 = vld [vmem:[%s7123_s26 + $0x8] sm:$0xff]  }
 0x3fb   : > { %v4946_v12 = vmul.f32 %v5977_v51, %v4864_v21  ;;  %v4867_v37 = vadd.f32 %v6220_v7, %v9801_v63  ;;  %v5036_v25 = vpack.c.bf16 %v5016_v47, %v5015_v19  ;;  %v6807_v21 = vld [vmem:[%s7123_s26] sm:$0xff]  }
 0x3fc   : > { %v5273_v7 = vunpack.c.l.bf16 %v6807_v21 }
 0x3fd   : > { %v4985_v28 = vadd.f32 %v9211_v58, %v4946_v12  ;;  %v4947_v59 = vmul.f32 %v5977_v51, %v4867_v37  ;;  %v6221_v53 = vpop.f32.mrb[68].mxu1  ;;  %6384 = vmatmul.mubr.msk.bf16.gmra.mrb[68].mxu0 %vm3689_vm8, %v5036_v25  ;;  %v5274_v37 = vunpack.c.h.bf16 %v6807_v21 }
 0x3fe   : > { %v6222_v50 = vpop.f32.mrb[69].mxu1 }
 0x3ff   : > { %v4986_v29 = vadd.f32 %v9211_v58, %v4947_v59  ;;  %v6223_v4 = vadd.f32 %v6222_v50, %v6221_v53  ;;  %v6224_v27 = vpop.f32.mrb[70].mxu1  ;;  %v5017_v10 = vmax.f32 %v4985_v28, 0.0 }
 0x400   : > { %v6225_v48 = vpop.f32.mrb[71].mxu1 }
 0x401   : > { %v5018_v9 = vmax.f32 %v4986_v29, 0.0  ;;  %v4872_v62 = vadd.f32 %v9802_v39, %v6223_v4  ;;  %v6226_v57 = vadd.f32 %v6225_v48, %v6224_v27 }
 0x403   : > { %v4948_v31 = vmul.f32 %v5977_v51, %v4872_v62  ;;  %v4875_v18 = vadd.f32 %v9803_v13, %v6226_v57  ;;  %v5037_v33 = vpack.c.bf16 %v5018_v9, %v5017_v10  ;;  %v6808_v13 = vld [vmem:[%s7123_s26 + $0x18] sm:$0xff]  }
 0x405   : > { %v4987_v34 = vadd.f32 %v9211_v58, %v4948_v31  ;;  %v4949_v54 = vmul.f32 %v5977_v51, %v4875_v18  ;;  %v6227_v42 = vpop.f32.mrb[72].mxu1  ;;  %6387 = vmatprep.mubr.msk.bf16.mxu0 %vm3689_vm8, %v5037_v33  ;;  %v5279_v18 = vunpack.c.l.bf16 %v6808_v13 }
 0x406   : > { %v6228_v6 = vpop.f32.mrb[73].mxu1 }
 0x407   : > { %v4988_v36 = vadd.f32 %v9211_v58, %v4949_v54  ;;  %v6229_v56 = vadd.f32 %v6228_v6, %v6227_v42  ;;  %v6230_v60 = vpop.f32.mrb[74].mxu1  ;;  %v5019_v1 = vmax.f32 %v4987_v34, 0.0  ;;  %v6809_v34 = vld [vmem:[%s7123_s26 + $0x10] sm:$0xff]  }
 0x408   : > { %v6231_v55 = vpop.f32.mrb[75].mxu1  ;;  %v5277_v54 = vunpack.c.l.bf16 %v6809_v34 }
 0x409   : > { %v5020_v20 = vmax.f32 %v4988_v36, 0.0  ;;  %v4880_v41 = vadd.f32 %v6229_v56, %v9110_v16  ;;  %v6232_v32 = vadd.f32 %v6231_v55, %v6230_v60  ;;  %v5280_v36 = vunpack.c.h.bf16 %v6808_v13 }
 0x40a   : > { %v5278_v55 = vunpack.c.h.bf16 %v6809_v34 }
 0x40b   : > { %v4950_v45 = vmul.f32 %v5977_v51, %v4880_v41  ;;  %v4883_v26 = vadd.f32 %v6232_v32, %v9118_v35  ;;  %v5038_v46 = vpack.c.bf16 %v5020_v20, %v5019_v1 }
 0x40d   : > { %v4989_v52 = vadd.f32 %v9211_v58, %v4950_v45  ;;  %v4951_v40 = vmul.f32 %v5977_v51, %v4883_v26  ;;  %6388 = vmatmul.mubr.msk.bf16.gmra.mrb[72].mxu0 %vm3689_vm8, %v5038_v46 }
 0x40f   : > { %v4990_v49 = vadd.f32 %v9211_v58, %v4951_v40  ;;  %v6233_v3 = vpop.f32.mrb[76].mxu1  ;;  %v5021_v0 = vmax.f32 %v4989_v52, 0.0 }
 0x410   : > { %v6234_v23 = vpop.f32.mrb[77].mxu1 }
 0x411   : > { %v5022_v11 = vmax.f32 %v4990_v49, 0.0  ;;  %v6235_v43 = vadd.f32 %v6234_v23, %v6233_v3  ;;  %v6236_v22 = vpop.f32.mrb[78].mxu1 }
 0x412   : > { %v6237_v16 = vpop.f32.mrb[79].mxu1 }
 0x413   : > { %v4888_v30 = vadd.f32 %v9108_v15, %v6235_v43  ;;  %v6238_v35 = vadd.f32 %v6237_v16, %v6236_v22  ;;  %v5039_v2 = vpack.c.bf16 %v5022_v11, %v5021_v0  ;;  %v9385_v15 = vld [vmem:[%s9514_s7] ss:$0 sm:$0xff]  ;;  %v6810_v11 = vld [vmem:[%s7123_s26 + $0x28] sm:$0xff]  }
 0x414   : > { %v5283_v43 = vunpack.c.l.bf16 %v6810_v11  ;;  %v6811_v16 = vld [vmem:[%s7123_s26 + $0x20] sm:$0xff]  }
 0x415   : > { %v4952_v24 = vmul.f32 %v5977_v51, %v4888_v30  ;;  %v4891_v61 = vadd.f32 %v9114_v14, %v6238_v35  ;;  %6391 = vmatprep.mubr.msk.bf16.mxu0 %vm3689_vm8, %v5039_v2  ;;  %v5275_v14 = vunpack.c.l.bf16 %v6806_v44  ;;  %v5281_v30 = vunpack.c.l.bf16 %v6811_v16 }
 0x417   : > { %v4991_v38 = vadd.f32 %v9211_v58, %v4952_v24  ;;  %v4953_v8 = vmul.f32 %v5977_v51, %v4891_v61  ;;  %v5284_v24 = vunpack.c.h.bf16 %v6810_v11 }
 0x419   : > { %v4992_v5 = vadd.f32 %v9211_v58, %v4953_v8  ;;  %v5023_v17 = vmax.f32 %v4991_v38, 0.0  ;;  %v5276_v58 = vunpack.c.h.bf16 %v6806_v44  ;;  %v5282_v8 = vunpack.c.h.bf16 %v6811_v16 }
 0x41b   : > { %v5024_v19 = vmax.f32 %v4992_v5, 0.0 }
 0x41d   : > { %v5040_v47 = vpack.c.bf16 %v5024_v19, %v5023_v17 }
 0x41f   : > { %6392 = vmatmul.mubr.msk.bf16.gmra.mrb[76].mxu0 %vm3689_vm8, %v5040_v47 }
 0x42f   : > { %v6365_v12 = vpop.f32.mrb[48].mxu0 }
 0x430   : > { %v5155_v51 = vadd.f32 %v6365_v12, %v9385_v15  ;;  %v5146_v63 = vpop.f32.mrb[49].mxu0 }
 0x431   : > { %v5147_v25 = vadd.f32 %v9385_v15, %v5146_v63  ;;  %v6366_v28 = vpop.f32.mrb[50].mxu0 }
 0x432   : > { %v5307_v59 = vadd.f32 %v5275_v14, %v5155_v51  ;;  %v5158_v53 = vadd.f32 %v6366_v28, %v9385_v15  ;;  %v5149_v50 = vpop.f32.mrb[51].mxu0 }
 0x433   : > { %v5305_v29 = vadd.f32 %v5273_v7, %v5147_v25  ;;  %v5150_v4 = vadd.f32 %v9385_v15, %v5149_v50  ;;  %v6812_v25 = vld [vmem:[%s7123_s26 + $0x38] sm:$0xff]  }
 0x434   : > { %v5308_v27 = vadd.f32 %v5276_v58, %v5158_v53  ;;  %v5339_v10 = vmax.f32 %v5307_v59, 0.0  ;;  %v5287_v28 = vunpack.c.l.bf16 %v6812_v25  ;;  %v6813_v53 = vld [vmem:[%s7123_s26 + $0x30] sm:$0xff]  }
 0x435   : > { %v5306_v48 = vadd.f32 %v5274_v37, %v5150_v4  ;;  %v5337_v39 = vmax.f32 %v5305_v29, 0.0  ;;  %v5285_v50 = vunpack.c.l.bf16 %v6813_v53 }
 0x436   : > { %v5340_v9 = vmax.f32 %v5308_v27, 0.0  ;;  %v5288_v27 = vunpack.c.h.bf16 %v6812_v25 }
 0x437   : > { %v5338_v62 = vmax.f32 %v5306_v48, 0.0 }
 0x438   : > { %v6016_v57 = vpack.c.bf16 %v5340_v9, %v5339_v10  ;;  %v5286_v9 = vunpack.c.h.bf16 %v6813_v53 }
 0x439   : > { %v6011_v31 = vpack.c.bf16 %v5338_v62, %v5337_v39 }
 0x43a   : > { %6088 = vst [vmem:[%s9394_s23 + $0x8] sm:$0xff] %v6016_v57  }
 0x43b   : > { %6012 = vst [vmem:[%s9394_s23] sm:$0xff] %v6011_v31  }
 0x442   : > { %v6369_v33 = vpop.f32.mrb[52].mxu0 }
 0x443   : > { %v5171_v42 = vadd.f32 %v6369_v33, %v9385_v15  ;;  %v5162_v6 = vpop.f32.mrb[53].mxu0 }
 0x444   : > { %v5163_v56 = vadd.f32 %v9385_v15, %v5162_v6  ;;  %v6370_v60 = vpop.f32.mrb[54].mxu0 }
 0x445   : > { %v5311_v1 = vadd.f32 %v5279_v18, %v5171_v42  ;;  %v5174_v20 = vadd.f32 %v6370_v60, %v9385_v15  ;;  %v5165_v41 = vpop.f32.mrb[55].mxu0  ;;  %v6814_v60 = vld [vmem:[%s7123_s26 + $0x48] sm:$0xff]  }
 0x446   : > { %v5309_v32 = vadd.f32 %v5277_v54, %v5163_v56  ;;  %v5166_v45 = vadd.f32 %v9385_v15, %v5165_v41 }
 0x447   : > { %v5312_v26 = vadd.f32 %v5280_v36, %v5174_v20  ;;  %v5343_v52 = vmax.f32 %v5311_v1, 0.0  ;;  %v6815_v1 = vld [vmem:[%s7123_s26 + $0x40] sm:$0xff]  }
 0x448   : > { %v5310_v46 = vadd.f32 %v5278_v55, %v5166_v45  ;;  %v5341_v49 = vmax.f32 %v5309_v32, 0.0  ;;  %v5291_v55 = vunpack.c.l.bf16 %v6814_v60  ;;  %v5289_v20 = vunpack.c.l.bf16 %v6815_v1 }
 0x449   : > { %v5344_v40 = vmax.f32 %v5312_v26, 0.0  ;;  %v5292_v26 = vunpack.c.h.bf16 %v6814_v60 }
 0x44a   : > { %v5342_v3 = vmax.f32 %v5310_v46, 0.0  ;;  %v5290_v46 = vunpack.c.h.bf16 %v6815_v1 }
 0x44b   : > { %v6026_v23 = vpack.c.bf16 %v5344_v40, %v5343_v52 }
 0x44c   : > { %v6021_v0 = vpack.c.bf16 %v5342_v3, %v5341_v49 }
 0x44d   : > { %6090 = vst [vmem:[%s9394_s23 + $0x18] sm:$0xff] %v6026_v23  }
 0x44e   : > { %6089 = vst [vmem:[%s9394_s23 + $0x10] sm:$0xff] %v6021_v0  }
 0x49f   : > { %v6373_v22 = vpop.f32.mrb[56].mxu0 }
 0x4a0   : > { %v5187_v35 = vadd.f32 %v6373_v22, %v9385_v15  ;;  %v5178_v2 = vpop.f32.mrb[57].mxu0 }
 0x4a1   : > { %v5179_v61 = vadd.f32 %v9385_v15, %v5178_v2  ;;  %v6374_v38 = vpop.f32.mrb[58].mxu0 }
 0x4a2   : > { %v5315_v5 = vadd.f32 %v5283_v43, %v5187_v35  ;;  %v5190_v17 = vadd.f32 %v6374_v38, %v9385_v15  ;;  %v5181_v19 = vpop.f32.mrb[59].mxu0  ;;  %v6816_v38 = vld [vmem:[%s7123_s26 + $0x58] sm:$0xff]  }
 0x4a3   : > { %v5313_v47 = vadd.f32 %v5281_v30, %v5179_v61  ;;  %v5182_v44 = vadd.f32 %v9385_v15, %v5181_v19 }
 0x4a4   : > { %v5316_v14 = vadd.f32 %v5284_v24, %v5190_v17  ;;  %v5347_v7 = vmax.f32 %v5315_v5, 0.0  ;;  %v6817_v17 = vld [vmem:[%s7123_s26 + $0x50] sm:$0xff]  }
 0x4a5   : > { %v5314_v21 = vadd.f32 %v5282_v8, %v5182_v44  ;;  %v5345_v51 = vmax.f32 %v5313_v47, 0.0  ;;  %v5295_v8 = vunpack.c.l.bf16 %v6816_v38  ;;  %v5293_v19 = vunpack.c.l.bf16 %v6817_v17 }
 0x4a6   : > { %v5348_v12 = vmax.f32 %v5316_v14, 0.0  ;;  %v5296_v14 = vunpack.c.h.bf16 %v6816_v38 }
 0x4a7   : > { %v5346_v63 = vmax.f32 %v5314_v21, 0.0 }
 0x4a8   : > { %v6036_v58 = vpack.c.bf16 %v5348_v12, %v5347_v7  ;;  %v5294_v12 = vunpack.c.h.bf16 %v6817_v17 }
 0x4a9   : > { %v6031_v37 = vpack.c.bf16 %v5346_v63, %v5345_v51 }
 0x4aa   : > { %6092 = vst [vmem:[%s9394_s23 + $0x28] sm:$0xff] %v6036_v58  }
 0x4ab   : > { %6091 = vst [vmem:[%s9394_s23 + $0x20] sm:$0xff] %v6031_v37  }
 0x4b0   : > { %v6377_v59 = vpop.f32.mrb[60].mxu0 }
 0x4b1   : > { %v5203_v29 = vadd.f32 %v6377_v59, %v9385_v15  ;;  %v5194_v4 = vpop.f32.mrb[61].mxu0 }
 0x4b2   : > { %v5195_v48 = vadd.f32 %v9385_v15, %v5194_v4  ;;  %v6378_v10 = vpop.f32.mrb[62].mxu0 }
 0x4b3   : > { %v5319_v39 = vadd.f32 %v5287_v28, %v5203_v29  ;;  %v5206_v62 = vadd.f32 %v6378_v10, %v9385_v15  ;;  %v5197_v57 = vpop.f32.mrb[63].mxu0  ;;  %v6818_v10 = vld [vmem:[%s7123_s26 + $0x68] sm:$0xff]  }
 0x4b4   : > { %v5317_v31 = vadd.f32 %v5285_v50, %v5195_v48  ;;  %v5198_v13 = vadd.f32 %v9385_v15, %v5197_v57 }
 0x4b5   : > { %v5320_v18 = vadd.f32 %v5288_v27, %v5206_v62  ;;  %v5351_v34 = vmax.f32 %v5319_v39, 0.0  ;;  %v6819_v62 = vld [vmem:[%s7123_s26 + $0x60] sm:$0xff]  }
 0x4b6   : > { %v5318_v33 = vadd.f32 %v5286_v9, %v5198_v13  ;;  %v5349_v42 = vmax.f32 %v5317_v31, 0.0  ;;  %v5299_v9 = vunpack.c.l.bf16 %v6818_v10  ;;  %v5297_v57 = vunpack.c.l.bf16 %v6819_v62 }
 0x4b7   : > { %v5352_v54 = vmax.f32 %v5320_v18, 0.0  ;;  %v5300_v18 = vunpack.c.h.bf16 %v6818_v10 }
 0x4b8   : > { %v5350_v6 = vmax.f32 %v5318_v33, 0.0 }
 0x4b9   : > { %v6046_v36 = vpack.c.bf16 %v5352_v54, %v5351_v34  ;;  %v5298_v54 = vunpack.c.h.bf16 %v6819_v62 }
 0x4ba   : > { %v6041_v56 = vpack.c.bf16 %v5350_v6, %v5349_v42 }
 0x4bb   : > { %6094 = vst [vmem:[%s9394_s23 + $0x38] sm:$0xff] %v6046_v36  }
 0x4bc   : > { %6093 = vst [vmem:[%s9394_s23 + $0x30] sm:$0xff] %v6041_v56  }
 0x4c0   : > { %v6381_v41 = vpop.f32.mrb[64].mxu0 }
 0x4c1   : > { %v5219_v32 = vadd.f32 %v6381_v41, %v9385_v15  ;;  %v5210_v45 = vpop.f32.mrb[65].mxu0 }
 0x4c2   : > { %v5211_v52 = vadd.f32 %v9385_v15, %v5210_v45  ;;  %v6382_v40 = vpop.f32.mrb[66].mxu0 }
 0x4c3   : > { %v5323_v49 = vadd.f32 %v5291_v55, %v5219_v32  ;;  %v5222_v3 = vadd.f32 %v6382_v40, %v9385_v15  ;;  %v5213_v23 = vpop.f32.mrb[67].mxu0 }
 0x4c4   : > { %v5321_v0 = vadd.f32 %v5289_v20, %v5211_v52  ;;  %v5214_v11 = vadd.f32 %v9385_v15, %v5213_v23  ;;  %v6820_v52 = vld [vmem:[%s7123_s26 + $0x78] sm:$0xff]  }
 0x4c5   : > { %v5324_v43 = vadd.f32 %v5292_v26, %v5222_v3  ;;  %v5355_v16 = vmax.f32 %v5323_v49, 0.0  ;;  %v5303_v40 = vunpack.c.l.bf16 %v6820_v52  ;;  %v6821_v3 = vld [vmem:[%s7123_s26 + $0x70] sm:$0xff]   ;;  %s6007_s26 = sshll.u32 %s6995_s9, 11  ;;  %s5434_s9 = scalar_lea.sflag [#allocation5], %s7078_s22 }
 0x4c6   : > { %v5322_v22 = vadd.f32 %v5290_v46, %v5214_v11  ;;  %v5353_v35 = vmax.f32 %v5321_v0, 0.0  ;;  %v5301_v23 = vunpack.c.l.bf16 %v6821_v3  ;;  %s9457_s24 = scalar_lea.hbm %s9515_s8, %s6007_s26 }
 0x4c7   : > { %v5356_v30 = vmax.f32 %v5324_v43, 0.0  ;;  %v5304_v43 = vunpack.c.h.bf16 %v6820_v52 }
 0x4c8   : > { %v5354_v2 = vmax.f32 %v5322_v22, 0.0 }
 0x4c9   : > { %v6056_v24 = vpack.c.bf16 %v5356_v30, %v5355_v16  ;;  %v5302_v30 = vunpack.c.h.bf16 %v6821_v3 }
 0x4ca   : > { %v6051_v61 = vpack.c.bf16 %v5354_v2, %v5353_v35 }
 0x4cb   : > { %6096 = vst [vmem:[%s9394_s23 + $0x48] sm:$0xff] %v6056_v24  }
 0x4cc   : > { %6095 = vst [vmem:[%s9394_s23 + $0x40] sm:$0xff] %v6051_v61  }
 0x4d0   : > { %v6385_v5 = vpop.f32.mrb[68].mxu0 }
 0x4d1   : > { %v5235_v47 = vadd.f32 %v6385_v5, %v9385_v15  ;;  %v5226_v44 = vpop.f32.mrb[69].mxu0 }
 0x4d2   : > { %v5227_v21 = vadd.f32 %v9385_v15, %v5226_v44  ;;  %v6386_v7 = vpop.f32.mrb[70].mxu0 }
 0x4d3   : > { %v5327_v51 = vadd.f32 %v5295_v8, %v5235_v47  ;;  %v5238_v63 = vadd.f32 %v6386_v7, %v9385_v15  ;;  %v5229_v58 = vpop.f32.mrb[71].mxu0 }
 0x4d4   : > { %v5325_v37 = vadd.f32 %v5293_v19, %v5227_v21  ;;  %v5230_v25 = vadd.f32 %v9385_v15, %v5229_v58 }
 0x4d5   : > { %v5328_v28 = vadd.f32 %v5296_v14, %v5238_v63  ;;  %v5359_v53 = vmax.f32 %v5327_v51, 0.0 }
 0x4d6   : > { %v5326_v59 = vadd.f32 %v5294_v12, %v5230_v25  ;;  %v5357_v29 = vmax.f32 %v5325_v37, 0.0 }
 0x4d7   : > { %v5360_v50 = vmax.f32 %v5328_v28, 0.0 }
 0x4d8   : > { %v5358_v4 = vmax.f32 %v5326_v59, 0.0 }
 0x4d9   : > { %v6066_v27 = vpack.c.bf16 %v5360_v50, %v5359_v53 }
 0x4da   : > { %v6061_v48 = vpack.c.bf16 %v5358_v4, %v5357_v29 }
 0x4db   : > { %6098 = vst [vmem:[%s9394_s23 + $0x58] sm:$0xff] %v6066_v27  }
 0x4dc   : > { %6097 = vst [vmem:[%s9394_s23 + $0x50] sm:$0xff] %v6061_v48  }
 0x4e0   : > { %v6389_v39 = vpop.f32.mrb[72].mxu0 }
 0x4e1   : > { %v5251_v31 = vadd.f32 %v6389_v39, %v9385_v15  ;;  %v5242_v13 = vpop.f32.mrb[73].mxu0 }
 0x4e2   : > { %v5243_v33 = vadd.f32 %v9385_v15, %v5242_v13  ;;  %v6390_v34 = vpop.f32.mrb[74].mxu0 }
 0x4e3   : > { %v5331_v42 = vadd.f32 %v5299_v9, %v5251_v31  ;;  %v5254_v6 = vadd.f32 %v6390_v34, %v9385_v15  ;;  %v5245_v36 = vpop.f32.mrb[75].mxu0 }
 0x4e4   : > { %v5329_v56 = vadd.f32 %v5297_v57, %v5243_v33  ;;  %v5246_v60 = vadd.f32 %v9385_v15, %v5245_v36 }
 0x4e5   : > { %v5332_v55 = vadd.f32 %v5300_v18, %v5254_v6  ;;  %v5363_v20 = vmax.f32 %v5331_v42, 0.0 }
 0x4e6   : > { %v5330_v1 = vadd.f32 %v5298_v54, %v5246_v60  ;;  %v5361_v32 = vmax.f32 %v5329_v56, 0.0 }
 0x4e7   : > { %v5364_v41 = vmax.f32 %v5332_v55, 0.0 }
 0x4e8   : > { %v5362_v45 = vmax.f32 %v5330_v1, 0.0 }
 0x4e9   : > { %v6076_v26 = vpack.c.bf16 %v5364_v41, %v5363_v20 }
 0x4ea   : > { %v6071_v46 = vpack.c.bf16 %v5362_v45, %v5361_v32 }
 0x4eb   : > { %6100 = vst [vmem:[%s9394_s23 + $0x68] sm:$0xff] %v6076_v26  }
 0x4ec   : > { %6099 = vst [vmem:[%s9394_s23 + $0x60] sm:$0xff] %v6071_v46  }
 0x4f2   : > { %v6393_v49 = vpop.f32.mrb[76].mxu0 }
 0x4f3   : > { %v5267_v0 = vadd.f32 %v6393_v49, %v9385_v15  ;;  %v5258_v11 = vpop.f32.mrb[77].mxu0 }
 0x4f4   : > { %v5259_v22 = vadd.f32 %v9385_v15, %v5258_v11  ;;  %v6394_v16 = vpop.f32.mrb[78].mxu0 }
 0x4f5   : > { %v5335_v35 = vadd.f32 %v5303_v40, %v5267_v0  ;;  %v5270_v2 = vadd.f32 %v6394_v16, %v9385_v15  ;;  %v5261_v24 = vpop.f32.mrb[79].mxu0 }
 0x4f6   : > { %v5333_v61 = vadd.f32 %v5301_v23, %v5259_v22  ;;  %v5262_v38 = vadd.f32 %v9385_v15, %v5261_v24 }
 0x4f7   : > { %v5336_v8 = vadd.f32 %v5304_v43, %v5270_v2  ;;  %v5367_v17 = vmax.f32 %v5335_v35, 0.0 }
 0x4f8   : > { %v5334_v5 = vadd.f32 %v5302_v30, %v5262_v38  ;;  %v5365_v47 = vmax.f32 %v5333_v61, 0.0 }
 0x4f9   : > { %v5368_v19 = vmax.f32 %v5336_v8, 0.0 }
 0x4fa   : > { %v5366_v44 = vmax.f32 %v5334_v5, 0.0 }
 0x4fb   : > { %v6086_v14 = vpack.c.bf16 %v5368_v19, %v5367_v17 }
 0x4fc   : > { %v6081_v21 = vpack.c.bf16 %v5366_v44, %v5365_v47 }
 0x4fd   : > { %6102 = vst [vmem:[%s9394_s23 + $0x78] sm:$0xff] %v6086_v14  }
 0x4fe   : > { %6101 = vst [vmem:[%s9394_s23 + $0x70] sm:$0xff] %v6081_v21  }
 0x4ff   : > { %6865 = shalt.err (!%p6862_p4)
}
 0x500   : > { %s6866_s21 = scalar_lea.hbm %s9457_s24, 2048  ;;  %s6870_s10 = scalar_lea.hbm %s9515_s8, 4096 }
 0x501   : > { %p6867_p5 = scmp.ne.s32.totalorder %s9457_s24, %s6866_s21  ;;  %p6871_p1 = scmp.lt.u32.totalorder %s9457_s24, %s9515_s8 }
 0x502   : > { %p6872_p3 = scmp.lt.u32.totalorder %s6870_s10, %s6866_s21  ;;  %p6874_p6 = scmp.lt.u32.totalorder %s6866_s21, %s9457_s24 }
 0x503   : > { %p6868_p7 = pnand %p6867_p5, %p9804_p12 }
 0x504   : > { %p6873_p11 = por %p6872_p3, %p6871_p1 }
 0x505   : > { %p6869_p9 = pneg %p6868_p7 }
 0x506   : > { %p6875_p13 = por %p6874_p6, %p6873_p11 }
 0x508   : > { %p6876_p8 = pnand %p6875_p13, %p6869_p9 }
 0x50a   : > { %6879 = shalt.err (!%p6876_p8)
}
 0x50b   : > { %s6928_s12 = smov 4  }
 0x50c   : > { %6413 = dma.vmem_to_hbm [thread:$0]  (%p9804_p12), %s9459_s16, 2048, %s9457_s24, %s5434_s9, %s6924_s13, %s6924_s13, %s6928_s12  }
 0x50d PF: > { %s5463_s25 = sand.u32 1, %s6906_s27   ;;  %p9805_p10 = scmp.ne.s32.totalorder %s9558_s18, 0 }
 0x50e   : > { %p9806_p0 = scmp.ge.s32.totalorder %s6918_s30, 2  ;;  %s5464_s15 = scalar_lea.sflag [#allocation5], %s5463_s25 }
 0x510   : > { %p6420_p2 = pnand %p9806_p0, %p9805_p10 }
 0x512   : > { %6901 = dma.done.wait (!%p6420_p2), %s5464_s15, 2048  }
 0x513   : > { %6903 = vsyncadd (!%p6420_p2), %s5464_s15, 4294965248  ;;  %p21_p4 = scmp.ge.s32.totalorder %s6999_s11, 4   ;;  %s9807_s27 = smov %s6910_s28 }
 0x514   : > { %s9808_s28 = smov %s6914_s29  ;;  %s9809_s29 = smov %s7011_s14 }
 0x515   : > { %s9810_s30 = smov %s6999_s11  ;;  %23 = sbr.rel (!%p21_p4) target bundleno = 5 (0x5), region = 102 }
 0x51c   :  { %5469 = vsyncpa [#allocation4], 1 }
 0x51d   :  { %5471 = vsyncpa [#allocation4 + $0x1], 1 }
 0x51e   :  { %5472 = vsyncpa [#allocation5], 1 }
 0x51f   :  { %5474 = vsyncpa [#allocation5 + $0x1], 1 }

</bundles_post_ra>
